<compile_context>
chip_gen: v7x
topology: tpu7x:2x2x1
jax: 0.10.0
libtpu: 0.0.40
codegen_flags: <defaults>
</compile_context>

<pallas_src>
import math
from functools import partial

import jax
import jax.numpy as jnp
from jax.experimental import pallas as pl
from jax.experimental.pallas import tpu as pltpu


# ----------------------------- packed-weight layout -----------------------------

def _wa_cols(D, d_ff):
    # column layout of the packed (D, 8D + d_ff) weight slab
    return dict(
        sqkv_w=(0, 3 * D),            # fused self-attn QKV
        so_w=(3 * D, 4 * D),          # self-attn W_o
        cq_w=(4 * D, 5 * D),          # cross-attn W_q
        ckv_w=(5 * D, 7 * D),         # fused cross-attn KV
        co_w=(7 * D, 8 * D),          # cross-attn W_o
        w1=(8 * D, 8 * D + d_ff),     # FFN W1
    )


def _bias_cols(D, d_ff):
    # column layout of the packed (1, 9D + d_ff) bias vector
    return dict(
        sqkv_b=(0, 3 * D), so_b=(3 * D, 4 * D), cq_b=(4 * D, 5 * D),
        ckv_b=(5 * D, 7 * D), co_b=(7 * D, 8 * D),
        w1_b=(8 * D, 8 * D + d_ff), w2_b=(8 * D + d_ff, 9 * D + d_ff),
    )


def _layer_params(D, d_ff, wa_slice, w2_full, b_slice, ln_slice):
    """Build the per-layer param dict from slicing callables (refs or arrays)."""
    p = {name: wa_slice(a, b) for name, (a, b) in _wa_cols(D, d_ff).items()}
    p.update({name: b_slice(a, b) for name, (a, b) in _bias_cols(D, d_ff).items()})
    p["w2"] = w2_full()
    p["ln_g"] = ln_slice(0, 3)
    p["ln_b"] = ln_slice(3, 6)
    return p


# ----------------------------- shared math helpers ------------------------------
# Pure jnp/lax ops, shared by the Pallas kernel (dot_dtype=bf16) and the
# plain-JAX reference (dot_dtype=f32).

def _layer_norm(x, gamma, beta, eps=1e-5):
    mu = jnp.mean(x, axis=-1, keepdims=True)
    var = jnp.mean(jnp.square(x - mu), axis=-1, keepdims=True)
    return (x - mu) * jax.lax.rsqrt(var + eps) * gamma + beta


def _mha(q, k, v, bias, *, num_heads, d_k, batch, seq, dot_dtype):
    """Multi-head attention on flattened (B*S, D) projections.

    q, k, v : (B*S, D) projected activations (scale already folded into W_q).
    bias    : (B, S, S) additive float32 bias (-1e9 at masked positions).
    """
    D = num_heads * d_k
    q3 = q.reshape(batch, seq, D)
    k3 = k.reshape(batch, seq, D)
    v3 = v.reshape(batch, seq, D)
    heads = []
    for h in range(num_heads):                     # static unroll; heads stay in lanes
        sl = slice(h * d_k, (h + 1) * d_k)
        s = jnp.einsum('bqd,bkd->bqk',
                       q3[:, :, sl].astype(dot_dtype),
                       k3[:, :, sl].astype(dot_dtype),
                       preferred_element_type=jnp.float32)
        s = s + bias                               # additive -1e9 mask bias
        s = s - jnp.max(s, axis=-1, keepdims=True)
        p = jnp.exp(s)
        p = p / jnp.sum(p, axis=-1, keepdims=True)
        heads.append(jnp.einsum('bqk,bkd->bqd',
                                p.astype(dot_dtype),
                                v3[:, :, sl].astype(dot_dtype),
                                preferred_element_type=jnp.float32))
    return jnp.concatenate(heads, axis=-1).reshape(batch * seq, D)


def _decoder_layer_compute(y, enc, dec_bias, enc_bias, p, *, num_heads, d_k,
                           batch, seq, dot_dtype):
    """One Decoder layer. y, enc: (B*S, D) f32. p: single-layer param dict."""
    D = num_heads * d_k

    def matmul(x, w, b):
        return jnp.dot(x.astype(dot_dtype), w.astype(dot_dtype),
                       preferred_element_type=jnp.float32) + b

    ln_g, ln_b = p["ln_g"], p["ln_b"]              # (3, D) each

    # --- self attention: x1 = y + W_o(SelfAttn(LN1(y))) ---
    ln1_y = _layer_norm(y, ln_g[0:1, :], ln_b[0:1, :])
    qkv = matmul(ln1_y, p["sqkv_w"], p["sqkv_b"])
    attn = _mha(qkv[:, 0:D], qkv[:, D:2 * D], qkv[:, 2 * D:3 * D], dec_bias,
                num_heads=num_heads, d_k=d_k, batch=batch, seq=seq,
                dot_dtype=dot_dtype)
    x1 = y + matmul(attn, p["so_w"], p["so_b"])

    # --- enc-dec attention: x2 = x1 + W_o(Attn(q=LN2(x1), k=v=LN2(enc))) ---
    ln2_x1 = _layer_norm(x1, ln_g[1:2, :], ln_b[1:2, :])
    ln2_enc = _layer_norm(enc, ln_g[1:2, :], ln_b[1:2, :])
    qc = matmul(ln2_x1, p["cq_w"], p["cq_b"])
    kvc = matmul(ln2_enc, p["ckv_w"], p["ckv_b"])
    attn = _mha(qc, kvc[:, 0:D], kvc[:, D:2 * D], enc_bias,
                num_heads=num_heads, d_k=d_k, batch=batch, seq=seq,
                dot_dtype=dot_dtype)
    x2 = x1 + matmul(attn, p["co_w"], p["co_b"])

    # --- position-wise FFN: out = x2 + FFN(LN3(x2)) ---
    ln3 = _layer_norm(x2, ln_g[2:3, :], ln_b[2:3, :])
    hid = jnp.maximum(matmul(ln3, p["w1"], p["w1_b"]), 0.0)
    return x2 + matmul(hid, p["w2"], p["w2_b"])


# --------------------------------- Pallas kernel --------------------------------

def decoders_kernel(enc_ref, y0_ref, dec_bias_ref, enc_bias_ref,
                    wa_ref, w2_ref, bvec_ref, ln_ref, out_ref,
                    *, num_heads, d_k, d_ff, batch, seq):
    D = num_heads * d_k

    # out_ref's block index is constant across the layer grid axis, so it stays
    # resident in VMEM and carries the activation between layers.
    @pl.when(pl.program_id(0) == 0)
    def _():
        out_ref[...] = y0_ref[...]

    # static ref-view slices of the packed per-layer weight/bias slabs
    p = _layer_params(
        D, d_ff,
        lambda a, b: wa_ref[0, :, a:b],
        lambda: w2_ref[0],
        lambda a, b: bvec_ref[0, :, a:b],
        lambda a, b: ln_ref[0, a:b, :],
    )

    new_y = _decoder_layer_compute(out_ref[...], enc_ref[...],
                                   dec_bias_ref[...], enc_bias_ref[...], p,
                                   num_heads=num_heads, d_k=d_k,
                                   batch=batch, seq=seq,
                                   dot_dtype=jnp.bfloat16)
    out_ref[...] = new_y.astype(out_ref.dtype)


def decoders_pallas(enc, y0, dec_bias, enc_bias, packed, num_heads):
    B, S, D = y0.shape
    num_layers = packed["wA"].shape[0]
    d_ff = packed["w2"].shape[1]
    d_k = D // num_heads

    # batch collapsed into block rows (wrapper-side; lane dim stays D)
    enc_flat = enc.reshape(B * S, D)
    y0_flat = y0.reshape(B * S, D)

    def fixed(shape):                      # whole array, invariant across layers
        n = len(shape)
        return pl.BlockSpec(shape, lambda l, n=n: (0,) * n)

    def per_layer(arr):                    # one layer slice, streamed per grid step
        blk = (1,) + arr.shape[1:]
        n = len(arr.shape) - 1
        return pl.BlockSpec(blk, lambda l, n=n: (l,) + (0,) * n)

    in_specs = [
        fixed((B * S, D)),                 # enc (flattened)
        fixed((B * S, D)),                 # embedded decoder input (aliased w/ out)
        fixed((B, S, S)),                  # decoder-side mask bias
        fixed((B, S, S)),                  # encoder-side mask bias
        per_layer(packed["wA"]),           # packed (D, 8D+d_ff) weight slab, bf16
        per_layer(packed["w2"]),           # FFN W2 (d_ff, D), bf16
        per_layer(packed["b"]),            # packed bias vector (1, 9D+d_ff), f32
        per_layer(packed["ln"]),           # layer-norm gammas/betas (6, D), f32
    ]

    # VMEM budget: double-buffered streamed weight blocks + resident blocks.
    per_layer_bytes = sum(math.prod(a.shape[1:]) * a.dtype.itemsize
                          for a in (packed["wA"], packed["w2"],
                                    packed["b"], packed["ln"]))
    resident_bytes = (3 * B * S * D + 2 * B * S * S) * 4   # enc, y0, out, 2 biases
    vmem_limit = int(min(96 * 2**20,
                         max(32 * 2**20, 4 * per_layer_bytes + 2 * resident_bytes)))

    out = pl.pallas_call(
        partial(decoders_kernel, num_heads=num_heads, d_k=d_k, d_ff=d_ff,
                batch=B, seq=S),
        out_shape=jax.ShapeDtypeStruct((B * S, D), jnp.float32),
        grid=(num_layers,),
        in_specs=in_specs,
        out_specs=fixed((B * S, D)),
        input_output_aliases={1: 0},       # donate y0_flat's HBM buffer to out
        compiler_params=pltpu.CompilerParams(
            # layers are sequential (activation carried in out_ref) -> arbitrary
            dimension_semantics=("arbitrary",),
            vmem_limit_bytes=vmem_limit),
    )(enc_flat, y0_flat, dec_bias, enc_bias,
      packed["wA"], packed["w2"], packed["b"], packed["ln"])
    return out.reshape(B, S, D)


# ------------------------------- glue (plain JAX) -------------------------------

def positional_encoding(seq_len, d_model):
    # Faithful to the PyTorch PositionalEncoding (including its nonstandard
    # frequency formula (1/10000)**(2*idx) / d_model).
    pos = jnp.arange(seq_len, dtype=jnp.float32)[:, None]
    pe = jnp.zeros((seq_len, d_model), jnp.float32) + pos
    idx = jnp.arange(0, d_model, 2, dtype=jnp.float32)
    idx = (1.0 / 10000.0) ** (2.0 * idx) / d_model
    pe_even = jnp.sin(pe[:, 0::2] * idx)
    pe_odd = jnp.cos(pe[:, 1::2] * idx)
    pe = pe.at[:, 0::2].set(pe_even)
    pe = pe.at[:, 1::2].set(pe_odd)
    return pe


def init_decoders_params(key, voc_size, d_model, d_ff, num_decoder, num_heads):
    """Returns (embedding table, packed per-layer params stacked on a layer axis)."""
    D = d_model
    d_k = D // num_heads
    inv_sqrt_dk = 1.0 / math.sqrt(d_k)
    keys = jax.random.split(key, 1 + num_decoder)
    emb = jax.random.normal(keys[0], (voc_size, D), jnp.float32)

    def lin(k, din, dout, scale=0.05):
        kw, kb = jax.random.split(k)
        w = jax.random.normal(kw, (din, dout), jnp.float32) * scale    # [in, out]
        b = jax.random.normal(kb, (dout,), jnp.float32) * scale
        return w, b

    wa_l, w2_l, b_l, ln_l = [], [], [], []
    for i in range(num_decoder):
        lk = jax.random.split(keys[1 + i], 10)
        wq, bq = lin(lk[0], D, D)
        wk, bk = lin(lk[1], D, D)
        wv, bv = lin(lk[2], D, D)
        wo, bo = lin(lk[3], D, D)
        cwq, cbq = lin(lk[4], D, D)
        cwk, cbk = lin(lk[5], D, D)
        cwv, cbv = lin(lk[6], D, D)
        cwo, cbo = lin(lk[7], D, D)
        w1, b1 = lin(lk[8], D, d_ff)
        w2, b2 = lin(lk[9], d_ff, D)

        # fold the 1/sqrt(d_k) attention scale into the Q projections
        wq, bq = wq * inv_sqrt_dk, bq * inv_sqrt_dk
        cwq, cbq = cwq * inv_sqrt_dk, cbq * inv_sqrt_dk

        # packed weight slab, column order must match _wa_cols:
        # [sqkv (3D) | so (D) | cq (D) | ckv (2D) | co (D) | w1 (d_ff)]
        wa = jnp.concatenate(
            [jnp.concatenate([wq, wk, wv], axis=1), wo, cwq,
             jnp.concatenate([cwk, cwv], axis=1), cwo, w1], axis=1)
        # packed bias vector, order must match _bias_cols
        bvec = jnp.concatenate([bq, bk, bv, bo, cbq, cbk, cbv, cbo, b1, b2])[None, :]
        # layer-norm params: rows [g1,g2,g3,b1,b2,b3] (PyTorch default init)
        ln = jnp.concatenate([jnp.ones((3, D), jnp.float32),
                              jnp.zeros((3, D), jnp.float32)], axis=0)

        wa_l.append(wa), w2_l.append(w2), b_l.append(bvec), ln_l.append(ln)

    packed = dict(
        wA=jnp.stack(wa_l).astype(jnp.bfloat16),   # bf16 in HBM: half the DMA/VMEM
        w2=jnp.stack(w2_l).astype(jnp.bfloat16),
        b=jnp.stack(b_l),
        ln=jnp.stack(ln_l),
    )
    return emb, packed


def _mask_biases(enc_pad_mask, dec_pad_mask, enc_dec_mask):
    # dec_mask = dec_pad_mask + enc_dec_mask; masked where == 1, reproducing the
    # PyTorch masked_fill_(mask == True, -1e9) (so summed value 2 is NOT masked).
    dec_mask = dec_pad_mask + enc_dec_mask
    neg, zero = jnp.float32(-1e9), jnp.float32(0.0)
    return (jnp.where(dec_mask == 1, neg, zero),
            jnp.where(enc_pad_mask == 1, neg, zero))


def decoders_forward(emb_table, packed, pe, d_model, num_heads,
                     enc_attn_score, y_tokens, enc_pad_mask, dec_pad_mask,
                     enc_dec_mask):
    # Embedding gather + positional encoding kept in plain JAX (glue); dropout = id.
    y_emb = emb_table[y_tokens] * jnp.float32(math.sqrt(d_model)) + pe
    dec_bias, enc_bias = _mask_biases(enc_pad_mask, dec_pad_mask, enc_dec_mask)
    return decoders_pallas(enc_attn_score, y_emb, dec_bias, enc_bias, packed,
                           num_heads)


# ------------------------------ plain-JAX reference ------------------------------

def decoders_ref(emb_table, packed, pe, d_model, num_heads,
                 enc_attn_score, y_tokens, enc_pad_mask, dec_pad_mask,
                 enc_dec_mask):
    B, S = y_tokens.shape
    D = d_model
    d_k = D // num_heads
    d_ff = packed["w2"].shape[1]
    dec_bias, enc_bias = _mask_biases(enc_pad_mask, dec_pad_mask, enc_dec_mask)
    y = (emb_table[y_tokens] * jnp.float32(math.sqrt(d_model)) + pe).reshape(B * S, D)
    enc_flat = enc_attn_score.reshape(B * S, D)
    for l in range(packed["wA"].shape[0]):
        wa, w2 = packed["wA"][l], packed["w2"][l]
        bv, ln = packed["b"][l], packed["ln"][l]
        p = _layer_params(D, d_ff,
                          lambda a, b: wa[:, a:b],
                          lambda: w2,
                          lambda a, b: bv[:, a:b],
                          lambda a, b: ln[a:b, :])
        y = _decoder_layer_compute(y, enc_flat, dec_bias, enc_bias, p,
                                   num_heads=num_heads, d_k=d_k,
                                   batch=B, seq=S, dot_dtype=jnp.float32)
    return y.reshape(B, S, D)


# -------------------------------------- main --------------------------------------

if __name__ == "__main__":
    # small but lane-dense shapes (d_model = 128 fills the 128-lane vregs)
    B, S, D, H, D_FF = 2, 16, 128, 4, 256
    VOC, NUM_DEC = 50, 2

    key = jax.random.PRNGKey(0)
    k_param, k_enc, k_tok = jax.random.split(key, 3)

    emb_table, packed = init_decoders_params(k_param, VOC, D, D_FF, NUM_DEC, H)
    pe = positional_encoding(S, D)

    enc_attn_score = jax.random.normal(k_enc, (B, S, D), jnp.float32)
    y_tokens = jax.random.randint(k_tok, (B, S), 0, VOC)

    # masks: value 1 == masked (reproducing `masked_fill_(mask == True, -1e9)`)
    enc_pad_mask = jnp.zeros((B, S, S), jnp.int32).at[:, :, S - 2:].set(1)
    dec_pad_mask = jnp.zeros((B, S, S), jnp.int32).at[:, :, S - 1:].set(1)
    tri = jnp.triu(jnp.ones((S, S), jnp.int32), k=1)
    enc_dec_mask = jnp.broadcast_to(tri[None], (B, S, S)).astype(jnp.int32)

    fwd = jax.jit(decoders_forward, static_argnums=(3, 4))
    out = fwd(emb_table, packed, pe, D, H,
              enc_attn_score, y_tokens, enc_pad_mask, dec_pad_mask, enc_dec_mask)
    out = jax.block_until_ready(out)

    # cross-check against a plain-JAX reference of the same math (the only
    # intentional difference: the kernel feeds bf16 operands to the MXU)
    ref = decoders_ref(emb_table, packed, pe, D, H,
                       enc_attn_score, y_tokens, enc_pad_mask, dec_pad_mask,
                       enc_dec_mask)
    abs_err = float(jnp.max(jnp.abs(out - ref)))
    rel_err = abs_err / (float(jnp.max(jnp.abs(ref))) + 1e-6)
    assert rel_err < 3e-2, f"mismatch vs reference: abs={abs_err} rel={rel_err}"

    print("KERNEL_OK")
</pallas_src>

<mosaic_0001>
module attributes {stable_mosaic.version = 11 : i64} {
  func.func @decoders_kernel(%arg0: i32, %arg1: memref<32x128xf32, #tpu.memory_space<vmem>>, %arg2: memref<32x128xf32, #tpu.memory_space<vmem>>, %arg3: memref<2x16x16xf32, #tpu.memory_space<vmem>>, %arg4: memref<2x16x16xf32, #tpu.memory_space<vmem>>, %arg5: memref<1x128x1280xbf16, #tpu.memory_space<vmem>>, %arg6: memref<1x256x128xbf16, #tpu.memory_space<vmem>>, %arg7: memref<1x1x1408xf32, #tpu.memory_space<vmem>>, %arg8: memref<1x6x128xf32, #tpu.memory_space<vmem>>, %arg9: memref<32x128xf32, #tpu.memory_space<vmem>>) attributes {dimension_semantics = [#tpu.dimension_semantics<arbitrary>], iteration_bounds = array<i64: 2>, scalar_prefetch = 0 : i64, scratch_operands = 0 : i64, tpu.core_type = #tpu.core_type<tc>, window_params = [{pipeline_mode = #tpu.pipeline_mode<synchronous>, transform_indices = @transform_0, window_bounds = array<i64: 32, 128>}, {pipeline_mode = #tpu.pipeline_mode<synchronous>, transform_indices = @transform_1, window_bounds = array<i64: 32, 128>}, {pipeline_mode = #tpu.pipeline_mode<synchronous>, transform_indices = @transform_2, window_bounds = array<i64: 2, 16, 16>}, {pipeline_mode = #tpu.pipeline_mode<synchronous>, transform_indices = @transform_3, window_bounds = array<i64: 2, 16, 16>}, {transform_indices = @transform_4, window_bounds = array<i64: 1, 128, 1280>}, {transform_indices = @transform_5, window_bounds = array<i64: 1, 256, 128>}, {transform_indices = @transform_6, window_bounds = array<i64: 1, 1, 1408>}, {transform_indices = @transform_7, window_bounds = array<i64: 1, 6, 128>}, {pipeline_mode = #tpu.pipeline_mode<synchronous>, transform_indices = @transform_8, window_bounds = array<i64: 32, 128>}]} {
    %c0_i32 = arith.constant 0 : i32
    %0 = arith.cmpi eq, %arg0, %c0_i32 : i32
    %1 = arith.extui %0 : i1 to i32
    %c0_i32_0 = arith.constant 0 : i32
    %2 = arith.cmpi ne, %1, %c0_i32_0 : i32
    scf.if %2 {
      %c0_112 = arith.constant 0 : index
      %c0_113 = arith.constant 0 : index
      %336 = vector.load %arg2[%c0_112, %c0_113] : memref<32x128xf32, #tpu.memory_space<vmem>>, vector<32x128xf32>
      %c0_114 = arith.constant 0 : index
      %c0_115 = arith.constant 0 : index
      %337 = vector.load %arg9[%c0_114, %c0_115] : memref<32x128xf32, #tpu.memory_space<vmem>>, vector<32x128xf32>
      tpu.vector_store %arg9[%c0_114, %c0_115], %336 {strides = array<i32>} : memref<32x128xf32, #tpu.memory_space<vmem>>, vector<32x128xf32>,
    } else {
    }
    %c0 = arith.constant 0 : index
    %c0_1 = arith.constant 0 : index
    %c0_2 = arith.constant 0 : index
    %3 = vector.load %arg5[%c0, %c0_1, %c0_2] : memref<1x128x1280xbf16, #tpu.memory_space<vmem>>, vector<1x128x384xbf16>
    %4 = vector.shape_cast %3 : vector<1x128x384xbf16> to vector<128x384xbf16>
    %c0_3 = arith.constant 0 : index
    %c0_4 = arith.constant 0 : index
    %c384 = arith.constant 384 : index
    %5 = vector.load %arg5[%c0_3, %c0_4, %c384] : memref<1x128x1280xbf16, #tpu.memory_space<vmem>>, vector<1x128x128xbf16>
    %6 = vector.shape_cast %5 : vector<1x128x128xbf16> to vector<128x128xbf16>
    %c0_5 = arith.constant 0 : index
    %c0_6 = arith.constant 0 : index
    %c512 = arith.constant 512 : index
    %7 = vector.load %arg5[%c0_5, %c0_6, %c512] : memref<1x128x1280xbf16, #tpu.memory_space<vmem>>, vector<1x128x128xbf16>
    %8 = vector.shape_cast %7 : vector<1x128x128xbf16> to vector<128x128xbf16>
    %c0_7 = arith.constant 0 : index
    %c0_8 = arith.constant 0 : index
    %c640 = arith.constant 640 : index
    %9 = vector.load %arg5[%c0_7, %c0_8, %c640] : memref<1x128x1280xbf16, #tpu.memory_space<vmem>>, vector<1x128x256xbf16>
    %10 = vector.shape_cast %9 : vector<1x128x256xbf16> to vector<128x256xbf16>
    %c0_9 = arith.constant 0 : index
    %c0_10 = arith.constant 0 : index
    %c896 = arith.constant 896 : index
    %11 = vector.load %arg5[%c0_9, %c0_10, %c896] : memref<1x128x1280xbf16, #tpu.memory_space<vmem>>, vector<1x128x128xbf16>
    %12 = vector.shape_cast %11 : vector<1x128x128xbf16> to vector<128x128xbf16>
    %c0_11 = arith.constant 0 : index
    %c0_12 = arith.constant 0 : index
    %c1024 = arith.constant 1024 : index
    %13 = vector.load %arg5[%c0_11, %c0_12, %c1024] : memref<1x128x1280xbf16, #tpu.memory_space<vmem>>, vector<1x128x256xbf16>
    %14 = vector.shape_cast %13 : vector<1x128x256xbf16> to vector<128x256xbf16>
    %c0_13 = arith.constant 0 : index
    %c0_14 = arith.constant 0 : index
    %c0_15 = arith.constant 0 : index
    %15 = vector.load %arg7[%c0_13, %c0_14, %c0_15] : memref<1x1x1408xf32, #tpu.memory_space<vmem>>, vector<1x1x384xf32>
    %16 = vector.shape_cast %15 : vector<1x1x384xf32> to vector<1x384xf32>
    %c0_16 = arith.constant 0 : index
    %c0_17 = arith.constant 0 : index
    %c384_18 = arith.constant 384 : index
    %17 = vector.load %arg7[%c0_16, %c0_17, %c384_18] : memref<1x1x1408xf32, #tpu.memory_space<vmem>>, vector<1x1x128xf32>
    %18 = vector.shape_cast %17 : vector<1x1x128xf32> to vector<1x128xf32>
    %c0_19 = arith.constant 0 : index
    %c0_20 = arith.constant 0 : index
    %c512_21 = arith.constant 512 : index
    %19 = vector.load %arg7[%c0_19, %c0_20, %c512_21] : memref<1x1x1408xf32, #tpu.memory_space<vmem>>, vector<1x1x128xf32>
    %20 = vector.shape_cast %19 : vector<1x1x128xf32> to vector<1x128xf32>
    %c0_22 = arith.constant 0 : index
    %c0_23 = arith.constant 0 : index
    %c640_24 = arith.constant 640 : index
    %21 = vector.load %arg7[%c0_22, %c0_23, %c640_24] : memref<1x1x1408xf32, #tpu.memory_space<vmem>>, vector<1x1x256xf32>
    %22 = vector.shape_cast %21 : vector<1x1x256xf32> to vector<1x256xf32>
    %c0_25 = arith.constant 0 : index
    %c0_26 = arith.constant 0 : index
    %c896_27 = arith.constant 896 : index
    %23 = vector.load %arg7[%c0_25, %c0_26, %c896_27] : memref<1x1x1408xf32, #tpu.memory_space<vmem>>, vector<1x1x128xf32>
    %24 = vector.shape_cast %23 : vector<1x1x128xf32> to vector<1x128xf32>
    %c0_28 = arith.constant 0 : index
    %c0_29 = arith.constant 0 : index
    %c1024_30 = arith.constant 1024 : index
    %25 = vector.load %arg7[%c0_28, %c0_29, %c1024_30] : memref<1x1x1408xf32, #tpu.memory_space<vmem>>, vector<1x1x256xf32>
    %26 = vector.shape_cast %25 : vector<1x1x256xf32> to vector<1x256xf32>
    %c0_31 = arith.constant 0 : index
    %c0_32 = arith.constant 0 : index
    %c1280 = arith.constant 1280 : index
    %27 = vector.load %arg7[%c0_31, %c0_32, %c1280] : memref<1x1x1408xf32, #tpu.memory_space<vmem>>, vector<1x1x128xf32>
    %28 = vector.shape_cast %27 : vector<1x1x128xf32> to vector<1x128xf32>
    %c0_33 = arith.constant 0 : index
    %c0_34 = arith.constant 0 : index
    %c0_35 = arith.constant 0 : index
    %29 = vector.load %arg6[%c0_33, %c0_34, %c0_35] : memref<1x256x128xbf16, #tpu.memory_space<vmem>>, vector<1x256x128xbf16>
    %30 = vector.shape_cast %29 : vector<1x256x128xbf16> to vector<256x128xbf16>
    %c0_36 = arith.constant 0 : index
    %c0_37 = arith.constant 0 : index
    %c0_38 = arith.constant 0 : index
    %31 = vector.load %arg8[%c0_36, %c0_37, %c0_38] : memref<1x6x128xf32, #tpu.memory_space<vmem>>, vector<1x3x128xf32>
    %32 = vector.shape_cast %31 : vector<1x3x128xf32> to vector<3x128xf32>
    %c0_39 = arith.constant 0 : index
    %c3 = arith.constant 3 : index
    %c0_40 = arith.constant 0 : index
    %33 = vector.load %arg8[%c0_39, %c3, %c0_40] : memref<1x6x128xf32, #tpu.memory_space<vmem>>, vector<1x3x128xf32>
    %34 = vector.shape_cast %33 : vector<1x3x128xf32> to vector<3x128xf32>
    %c0_41 = arith.constant 0 : index
    %c0_42 = arith.constant 0 : index
    %35 = vector.load %arg9[%c0_41, %c0_42] : memref<32x128xf32, #tpu.memory_space<vmem>>, vector<32x128xf32>
    %c0_43 = arith.constant 0 : index
    %c0_44 = arith.constant 0 : index
    %36 = vector.load %arg1[%c0_43, %c0_44] : memref<32x128xf32, #tpu.memory_space<vmem>>, vector<32x128xf32>
    %c0_45 = arith.constant 0 : index
    %c0_46 = arith.constant 0 : index
    %c0_47 = arith.constant 0 : index
    %37 = vector.load %arg3[%c0_45, %c0_46, %c0_47] : memref<2x16x16xf32, #tpu.memory_space<vmem>>, vector<2x16x16xf32>
    %c0_48 = arith.constant 0 : index
    %c0_49 = arith.constant 0 : index
    %c0_50 = arith.constant 0 : index
    %38 = vector.load %arg4[%c0_48, %c0_49, %c0_50] : memref<2x16x16xf32, #tpu.memory_space<vmem>>, vector<2x16x16xf32>
    %39 = vector.extract_strided_slice %32 {offsets = [0, 0], sizes = [1, 128], strides = [1, 1]} : vector<3x128xf32> to vector<1x128xf32>
    %40 = vector.extract_strided_slice %34 {offsets = [0, 0], sizes = [1, 128], strides = [1, 1]} : vector<3x128xf32> to vector<1x128xf32>
    %cst = arith.constant dense<0.000000e+00> : vector<32xf32>
    %41 = vector.multi_reduction <add>, %35, %cst [1] : vector<32x128xf32> to vector<32xf32>
    %42 = vector.shape_cast %41 : vector<32xf32> to vector<32x1xf32>
    %cst_51 = arith.constant 1.280000e+02 : f32
    %43 = vector.broadcast %cst_51 : f32 to vector<32x1xf32>
    %44 = arith.divf %42, %43 : vector<32x1xf32>
    %45 = vector.broadcast %44 : vector<32x1xf32> to vector<32x128xf32>
    %46 = arith.subf %35, %45 : vector<32x128xf32>
    %47 = arith.mulf %46, %46 : vector<32x128xf32>
    %cst_52 = arith.constant dense<0.000000e+00> : vector<32xf32>
    %48 = vector.multi_reduction <add>, %47, %cst_52 [1] : vector<32x128xf32> to vector<32xf32>
    %49 = vector.shape_cast %48 : vector<32xf32> to vector<32x1xf32>
    %cst_53 = arith.constant 1.280000e+02 : f32
    %50 = vector.broadcast %cst_53 : f32 to vector<32x1xf32>
    %51 = arith.divf %49, %50 : vector<32x1xf32>
    %52 = vector.broadcast %44 : vector<32x1xf32> to vector<32x128xf32>
    %53 = arith.subf %35, %52 : vector<32x128xf32>
    %cst_54 = arith.constant 9.99999974E-6 : f32
    %54 = vector.broadcast %cst_54 : f32 to vector<32x1xf32>
    %55 = arith.addf %51, %54 : vector<32x1xf32>
    %56 = math.rsqrt %55 : vector<32x1xf32>
    %57 = vector.broadcast %56 : vector<32x1xf32> to vector<32x128xf32>
    %58 = arith.mulf %53, %57 : vector<32x128xf32>
    %59 = vector.broadcast %39 : vector<1x128xf32> to vector<32x128xf32>
    %60 = arith.mulf %58, %59 : vector<32x128xf32>
    %61 = vector.broadcast %40 : vector<1x128xf32> to vector<32x128xf32>
    %62 = arith.addf %60, %61 : vector<32x128xf32>
    %63 = arith.truncf %62 : vector<32x128xf32> to vector<32x128xbf16>
    %cst_55 = arith.constant dense<0.000000e+00> : vector<32x384xf32>
    %64 = tpu.matmul %63, %4, %cst_55 {dimension_numbers = #tpu.dot_dimension_numbers<[1], [0], [0], [1], [0, 0, 1, 1], [], []>} : vector<32x128xbf16>, vector<128x384xbf16>, vector<32x384xf32> -> vector<32x384xf32>
    %65 = vector.broadcast %16 : vector<1x384xf32> to vector<32x384xf32>
    %66 = arith.addf %64, %65 : vector<32x384xf32>
    %67 = vector.extract_strided_slice %66 {offsets = [0, 0], sizes = [32, 128], strides = [1, 1]} : vector<32x384xf32> to vector<32x128xf32>
    %68 = vector.extract_strided_slice %66 {offsets = [0, 128], sizes = [32, 128], strides = [1, 1]} : vector<32x384xf32> to vector<32x128xf32>
    %69 = vector.extract_strided_slice %66 {offsets = [0, 256], sizes = [32, 128], strides = [1, 1]} : vector<32x384xf32> to vector<32x128xf32>
    %70 = vector.shape_cast %67 : vector<32x128xf32> to vector<2x16x128xf32>
    %71 = vector.shape_cast %68 : vector<32x128xf32> to vector<2x16x128xf32>
    %72 = vector.shape_cast %69 : vector<32x128xf32> to vector<2x16x128xf32>
    %73 = vector.extract_strided_slice %70 {offsets = [0, 0, 0], sizes = [2, 16, 32], strides = [1, 1, 1]} : vector<2x16x128xf32> to vector<2x16x32xf32>
    %74 = arith.truncf %73 : vector<2x16x32xf32> to vector<2x16x32xbf16>
    %75 = vector.extract_strided_slice %71 {offsets = [0, 0, 0], sizes = [2, 16, 32], strides = [1, 1, 1]} : vector<2x16x128xf32> to vector<2x16x32xf32>
    %76 = arith.truncf %75 : vector<2x16x32xf32> to vector<2x16x32xbf16>
    "tpu.trace_start"() <{level = 10 : i32, message = "bqd,bkd->bqk"}> : () -> ()
    %cst_56 = arith.constant dense<0.000000e+00> : vector<2x16x16xf32>
    %77 = tpu.matmul %74, %76, %cst_56 {dimension_numbers = #tpu.dot_dimension_numbers<[2], [2], [1], [1], [0, 0, 0, 1, 1, 1], [0], [0]>} : vector<2x16x32xbf16>, vector<2x16x32xbf16>, vector<2x16x16xf32> -> vector<2x16x16xf32>
    "tpu.trace_stop"() : () -> ()
    %78 = arith.addf %77, %37 : vector<2x16x16xf32>
    %cst_57 = arith.constant dense<0xFF800000> : vector<2x16xf32>
    %79 = vector.multi_reduction <maximumf>, %78, %cst_57 [2] : vector<2x16x16xf32> to vector<2x16xf32>
    %80 = vector.shape_cast %79 : vector<2x16xf32> to vector<2x16x1xf32>
    %81 = vector.broadcast %80 : vector<2x16x1xf32> to vector<2x16x16xf32>
    %82 = arith.subf %78, %81 : vector<2x16x16xf32>
    %83 = math.exp %82 : vector<2x16x16xf32>
    %cst_58 = arith.constant dense<0.000000e+00> : vector<2x16xf32>
    %84 = vector.multi_reduction <add>, %83, %cst_58 [2] : vector<2x16x16xf32> to vector<2x16xf32>
    %85 = vector.shape_cast %84 : vector<2x16xf32> to vector<2x16x1xf32>
    %86 = vector.broadcast %85 : vector<2x16x1xf32> to vector<2x16x16xf32>
    %87 = arith.divf %83, %86 : vector<2x16x16xf32>
    %88 = arith.truncf %87 : vector<2x16x16xf32> to vector<2x16x16xbf16>
    %89 = vector.extract_strided_slice %72 {offsets = [0, 0, 0], sizes = [2, 16, 32], strides = [1, 1, 1]} : vector<2x16x128xf32> to vector<2x16x32xf32>
    %90 = arith.truncf %89 : vector<2x16x32xf32> to vector<2x16x32xbf16>
    "tpu.trace_start"() <{level = 10 : i32, message = "bqk,bkd->bqd"}> : () -> ()
    %cst_59 = arith.constant dense<0.000000e+00> : vector<2x16x32xf32>
    %91 = tpu.matmul %88, %90, %cst_59 {dimension_numbers = #tpu.dot_dimension_numbers<[2], [1], [1], [2], [0, 0, 0, 1, 1, 2], [0], [0]>} : vector<2x16x16xbf16>, vector<2x16x32xbf16>, vector<2x16x32xf32> -> vector<2x16x32xf32>
    "tpu.trace_stop"() : () -> ()
    %92 = vector.extract_strided_slice %70 {offsets = [0, 0, 32], sizes = [2, 16, 32], strides = [1, 1, 1]} : vector<2x16x128xf32> to vector<2x16x32xf32>
    %93 = arith.truncf %92 : vector<2x16x32xf32> to vector<2x16x32xbf16>
    %94 = vector.extract_strided_slice %71 {offsets = [0, 0, 32], sizes = [2, 16, 32], strides = [1, 1, 1]} : vector<2x16x128xf32> to vector<2x16x32xf32>
    %95 = arith.truncf %94 : vector<2x16x32xf32> to vector<2x16x32xbf16>
    "tpu.trace_start"() <{level = 10 : i32, message = "bqd,bkd->bqk"}> : () -> ()
    %cst_60 = arith.constant dense<0.000000e+00> : vector<2x16x16xf32>
    %96 = tpu.matmul %93, %95, %cst_60 {dimension_numbers = #tpu.dot_dimension_numbers<[2], [2], [1], [1], [0, 0, 0, 1, 1, 1], [0], [0]>} : vector<2x16x32xbf16>, vector<2x16x32xbf16>, vector<2x16x16xf32> -> vector<2x16x16xf32>
    "tpu.trace_stop"() : () -> ()
    %97 = arith.addf %96, %37 : vector<2x16x16xf32>
    %cst_61 = arith.constant dense<0xFF800000> : vector<2x16xf32>
    %98 = vector.multi_reduction <maximumf>, %97, %cst_61 [2] : vector<2x16x16xf32> to vector<2x16xf32>
    %99 = vector.shape_cast %98 : vector<2x16xf32> to vector<2x16x1xf32>
    %100 = vector.broadcast %99 : vector<2x16x1xf32> to vector<2x16x16xf32>
    %101 = arith.subf %97, %100 : vector<2x16x16xf32>
    %102 = math.exp %101 : vector<2x16x16xf32>
    %cst_62 = arith.constant dense<0.000000e+00> : vector<2x16xf32>
    %103 = vector.multi_reduction <add>, %102, %cst_62 [2] : vector<2x16x16xf32> to vector<2x16xf32>
    %104 = vector.shape_cast %103 : vector<2x16xf32> to vector<2x16x1xf32>
    %105 = vector.broadcast %104 : vector<2x16x1xf32> to vector<2x16x16xf32>
    %106 = arith.divf %102, %105 : vector<2x16x16xf32>
    %107 = arith.truncf %106 : vector<2x16x16xf32> to vector<2x16x16xbf16>
    %108 = vector.extract_strided_slice %72 {offsets = [0, 0, 32], sizes = [2, 16, 32], strides = [1, 1, 1]} : vector<2x16x128xf32> to vector<2x16x32xf32>
    %109 = arith.truncf %108 : vector<2x16x32xf32> to vector<2x16x32xbf16>
    "tpu.trace_start"() <{level = 10 : i32, message = "bqk,bkd->bqd"}> : () -> ()
    %cst_63 = arith.constant dense<0.000000e+00> : vector<2x16x32xf32>
    %110 = tpu.matmul %107, %109, %cst_63 {dimension_numbers = #tpu.dot_dimension_numbers<[2], [1], [1], [2], [0, 0, 0, 1, 1, 2], [0], [0]>} : vector<2x16x16xbf16>, vector<2x16x32xbf16>, vector<2x16x32xf32> -> vector<2x16x32xf32>
    "tpu.trace_stop"() : () -> ()
    %111 = vector.extract_strided_slice %70 {offsets = [0, 0, 64], sizes = [2, 16, 32], strides = [1, 1, 1]} : vector<2x16x128xf32> to vector<2x16x32xf32>
    %112 = arith.truncf %111 : vector<2x16x32xf32> to vector<2x16x32xbf16>
    %113 = vector.extract_strided_slice %71 {offsets = [0, 0, 64], sizes = [2, 16, 32], strides = [1, 1, 1]} : vector<2x16x128xf32> to vector<2x16x32xf32>
    %114 = arith.truncf %113 : vector<2x16x32xf32> to vector<2x16x32xbf16>
    "tpu.trace_start"() <{level = 10 : i32, message = "bqd,bkd->bqk"}> : () -> ()
    %cst_64 = arith.constant dense<0.000000e+00> : vector<2x16x16xf32>
    %115 = tpu.matmul %112, %114, %cst_64 {dimension_numbers = #tpu.dot_dimension_numbers<[2], [2], [1], [1], [0, 0, 0, 1, 1, 1], [0], [0]>} : vector<2x16x32xbf16>, vector<2x16x32xbf16>, vector<2x16x16xf32> -> vector<2x16x16xf32>
    "tpu.trace_stop"() : () -> ()
    %116 = arith.addf %115, %37 : vector<2x16x16xf32>
    %cst_65 = arith.constant dense<0xFF800000> : vector<2x16xf32>
    %117 = vector.multi_reduction <maximumf>, %116, %cst_65 [2] : vector<2x16x16xf32> to vector<2x16xf32>
    %118 = vector.shape_cast %117 : vector<2x16xf32> to vector<2x16x1xf32>
    %119 = vector.broadcast %118 : vector<2x16x1xf32> to vector<2x16x16xf32>
    %120 = arith.subf %116, %119 : vector<2x16x16xf32>
    %121 = math.exp %120 : vector<2x16x16xf32>
    %cst_66 = arith.constant dense<0.000000e+00> : vector<2x16xf32>
    %122 = vector.multi_reduction <add>, %121, %cst_66 [2] : vector<2x16x16xf32> to vector<2x16xf32>
    %123 = vector.shape_cast %122 : vector<2x16xf32> to vector<2x16x1xf32>
    %124 = vector.broadcast %123 : vector<2x16x1xf32> to vector<2x16x16xf32>
    %125 = arith.divf %121, %124 : vector<2x16x16xf32>
    %126 = arith.truncf %125 : vector<2x16x16xf32> to vector<2x16x16xbf16>
    %127 = vector.extract_strided_slice %72 {offsets = [0, 0, 64], sizes = [2, 16, 32], strides = [1, 1, 1]} : vector<2x16x128xf32> to vector<2x16x32xf32>
    %128 = arith.truncf %127 : vector<2x16x32xf32> to vector<2x16x32xbf16>
    "tpu.trace_start"() <{level = 10 : i32, message = "bqk,bkd->bqd"}> : () -> ()
    %cst_67 = arith.constant dense<0.000000e+00> : vector<2x16x32xf32>
    %129 = tpu.matmul %126, %128, %cst_67 {dimension_numbers = #tpu.dot_dimension_numbers<[2], [1], [1], [2], [0, 0, 0, 1, 1, 2], [0], [0]>} : vector<2x16x16xbf16>, vector<2x16x32xbf16>, vector<2x16x32xf32> -> vector<2x16x32xf32>
    "tpu.trace_stop"() : () -> ()
    %130 = vector.extract_strided_slice %70 {offsets = [0, 0, 96], sizes = [2, 16, 32], strides = [1, 1, 1]} : vector<2x16x128xf32> to vector<2x16x32xf32>
    %131 = arith.truncf %130 : vector<2x16x32xf32> to vector<2x16x32xbf16>
    %132 = vector.extract_strided_slice %71 {offsets = [0, 0, 96], sizes = [2, 16, 32], strides = [1, 1, 1]} : vector<2x16x128xf32> to vector<2x16x32xf32>
    %133 = arith.truncf %132 : vector<2x16x32xf32> to vector<2x16x32xbf16>
    "tpu.trace_start"() <{level = 10 : i32, message = "bqd,bkd->bqk"}> : () -> ()
    %cst_68 = arith.constant dense<0.000000e+00> : vector<2x16x16xf32>
    %134 = tpu.matmul %131, %133, %cst_68 {dimension_numbers = #tpu.dot_dimension_numbers<[2], [2], [1], [1], [0, 0, 0, 1, 1, 1], [0], [0]>} : vector<2x16x32xbf16>, vector<2x16x32xbf16>, vector<2x16x16xf32> -> vector<2x16x16xf32>
    "tpu.trace_stop"() : () -> ()
    %135 = arith.addf %134, %37 : vector<2x16x16xf32>
    %cst_69 = arith.constant dense<0xFF800000> : vector<2x16xf32>
    %136 = vector.multi_reduction <maximumf>, %135, %cst_69 [2] : vector<2x16x16xf32> to vector<2x16xf32>
    %137 = vector.shape_cast %136 : vector<2x16xf32> to vector<2x16x1xf32>
    %138 = vector.broadcast %137 : vector<2x16x1xf32> to vector<2x16x16xf32>
    %139 = arith.subf %135, %138 : vector<2x16x16xf32>
    %140 = math.exp %139 : vector<2x16x16xf32>
    %cst_70 = arith.constant dense<0.000000e+00> : vector<2x16xf32>
    %141 = vector.multi_reduction <add>, %140, %cst_70 [2] : vector<2x16x16xf32> to vector<2x16xf32>
    %142 = vector.shape_cast %141 : vector<2x16xf32> to vector<2x16x1xf32>
    %143 = vector.broadcast %142 : vector<2x16x1xf32> to vector<2x16x16xf32>
    %144 = arith.divf %140, %143 : vector<2x16x16xf32>
    %145 = arith.truncf %144 : vector<2x16x16xf32> to vector<2x16x16xbf16>
    %146 = vector.extract_strided_slice %72 {offsets = [0, 0, 96], sizes = [2, 16, 32], strides = [1, 1, 1]} : vector<2x16x128xf32> to vector<2x16x32xf32>
    %147 = arith.truncf %146 : vector<2x16x32xf32> to vector<2x16x32xbf16>
    "tpu.trace_start"() <{level = 10 : i32, message = "bqk,bkd->bqd"}> : () -> ()
    %cst_71 = arith.constant dense<0.000000e+00> : vector<2x16x32xf32>
    %148 = tpu.matmul %145, %147, %cst_71 {dimension_numbers = #tpu.dot_dimension_numbers<[2], [1], [1], [2], [0, 0, 0, 1, 1, 2], [0], [0]>} : vector<2x16x16xbf16>, vector<2x16x32xbf16>, vector<2x16x32xf32> -> vector<2x16x32xf32>
    "tpu.trace_stop"() : () -> ()
    %149 = tpu.concatenate %91, %110, %129, %148 in 2 : vector<2x16x32xf32>, vector<2x16x32xf32>, vector<2x16x32xf32>, vector<2x16x32xf32> -> vector<2x16x128xf32>
    %150 = vector.shape_cast %149 : vector<2x16x128xf32> to vector<32x128xf32>
    %151 = arith.truncf %150 : vector<32x128xf32> to vector<32x128xbf16>
    %cst_72 = arith.constant dense<0.000000e+00> : vector<32x128xf32>
    %152 = tpu.matmul %151, %6, %cst_72 {dimension_numbers = #tpu.dot_dimension_numbers<[1], [0], [0], [1], [0, 0, 1, 1], [], []>} : vector<32x128xbf16>, vector<128x128xbf16>, vector<32x128xf32> -> vector<32x128xf32>
    %153 = vector.broadcast %18 : vector<1x128xf32> to vector<32x128xf32>
    %154 = arith.addf %152, %153 : vector<32x128xf32>
    %155 = arith.addf %35, %154 : vector<32x128xf32>
    %156 = vector.extract_strided_slice %32 {offsets = [1, 0], sizes = [1, 128], strides = [1, 1]} : vector<3x128xf32> to vector<1x128xf32>
    %157 = vector.extract_strided_slice %34 {offsets = [1, 0], sizes = [1, 128], strides = [1, 1]} : vector<3x128xf32> to vector<1x128xf32>
    %cst_73 = arith.constant dense<0.000000e+00> : vector<32xf32>
    %158 = vector.multi_reduction <add>, %155, %cst_73 [1] : vector<32x128xf32> to vector<32xf32>
    %159 = vector.shape_cast %158 : vector<32xf32> to vector<32x1xf32>
    %cst_74 = arith.constant 1.280000e+02 : f32
    %160 = vector.broadcast %cst_74 : f32 to vector<32x1xf32>
    %161 = arith.divf %159, %160 : vector<32x1xf32>
    %162 = vector.broadcast %161 : vector<32x1xf32> to vector<32x128xf32>
    %163 = arith.subf %155, %162 : vector<32x128xf32>
    %164 = arith.mulf %163, %163 : vector<32x128xf32>
    %cst_75 = arith.constant dense<0.000000e+00> : vector<32xf32>
    %165 = vector.multi_reduction <add>, %164, %cst_75 [1] : vector<32x128xf32> to vector<32xf32>
    %166 = vector.shape_cast %165 : vector<32xf32> to vector<32x1xf32>
    %cst_76 = arith.constant 1.280000e+02 : f32
    %167 = vector.broadcast %cst_76 : f32 to vector<32x1xf32>
    %168 = arith.divf %166, %167 : vector<32x1xf32>
    %169 = vector.broadcast %161 : vector<32x1xf32> to vector<32x128xf32>
    %170 = arith.subf %155, %169 : vector<32x128xf32>
    %cst_77 = arith.constant 9.99999974E-6 : f32
    %171 = vector.broadcast %cst_77 : f32 to vector<32x1xf32>
    %172 = arith.addf %168, %171 : vector<32x1xf32>
    %173 = math.rsqrt %172 : vector<32x1xf32>
    %174 = vector.broadcast %173 : vector<32x1xf32> to vector<32x128xf32>
    %175 = arith.mulf %170, %174 : vector<32x128xf32>
    %176 = vector.broadcast %156 : vector<1x128xf32> to vector<32x128xf32>
    %177 = arith.mulf %175, %176 : vector<32x128xf32>
    %178 = vector.broadcast %157 : vector<1x128xf32> to vector<32x128xf32>
    %179 = arith.addf %177, %178 : vector<32x128xf32>
    %180 = vector.extract_strided_slice %32 {offsets = [1, 0], sizes = [1, 128], strides = [1, 1]} : vector<3x128xf32> to vector<1x128xf32>
    %181 = vector.extract_strided_slice %34 {offsets = [1, 0], sizes = [1, 128], strides = [1, 1]} : vector<3x128xf32> to vector<1x128xf32>
    %cst_78 = arith.constant dense<0.000000e+00> : vector<32xf32>
    %182 = vector.multi_reduction <add>, %36, %cst_78 [1] : vector<32x128xf32> to vector<32xf32>
    %183 = vector.shape_cast %182 : vector<32xf32> to vector<32x1xf32>
    %cst_79 = arith.constant 1.280000e+02 : f32
    %184 = vector.broadcast %cst_79 : f32 to vector<32x1xf32>
    %185 = arith.divf %183, %184 : vector<32x1xf32>
    %186 = vector.broadcast %185 : vector<32x1xf32> to vector<32x128xf32>
    %187 = arith.subf %36, %186 : vector<32x128xf32>
    %188 = arith.mulf %187, %187 : vector<32x128xf32>
    %cst_80 = arith.constant dense<0.000000e+00> : vector<32xf32>
    %189 = vector.multi_reduction <add>, %188, %cst_80 [1] : vector<32x128xf32> to vector<32xf32>
    %190 = vector.shape_cast %189 : vector<32xf32> to vector<32x1xf32>
    %cst_81 = arith.constant 1.280000e+02 : f32
    %191 = vector.broadcast %cst_81 : f32 to vector<32x1xf32>
    %192 = arith.divf %190, %191 : vector<32x1xf32>
    %193 = vector.broadcast %185 : vector<32x1xf32> to vector<32x128xf32>
    %194 = arith.subf %36, %193 : vector<32x128xf32>
    %cst_82 = arith.constant 9.99999974E-6 : f32
    %195 = vector.broadcast %cst_82 : f32 to vector<32x1xf32>
    %196 = arith.addf %192, %195 : vector<32x1xf32>
    %197 = math.rsqrt %196 : vector<32x1xf32>
    %198 = vector.broadcast %197 : vector<32x1xf32> to vector<32x128xf32>
    %199 = arith.mulf %194, %198 : vector<32x128xf32>
    %200 = vector.broadcast %180 : vector<1x128xf32> to vector<32x128xf32>
    %201 = arith.mulf %199, %200 : vector<32x128xf32>
    %202 = vector.broadcast %181 : vector<1x128xf32> to vector<32x128xf32>
    %203 = arith.addf %201, %202 : vector<32x128xf32>
    %204 = arith.truncf %179 : vector<32x128xf32> to vector<32x128xbf16>
    %cst_83 = arith.constant dense<0.000000e+00> : vector<32x128xf32>
    %205 = tpu.matmul %204, %8, %cst_83 {dimension_numbers = #tpu.dot_dimension_numbers<[1], [0], [0], [1], [0, 0, 1, 1], [], []>} : vector<32x128xbf16>, vector<128x128xbf16>, vector<32x128xf32> -> vector<32x128xf32>
    %206 = vector.broadcast %20 : vector<1x128xf32> to vector<32x128xf32>
    %207 = arith.addf %205, %206 : vector<32x128xf32>
    %208 = arith.truncf %203 : vector<32x128xf32> to vector<32x128xbf16>
    %cst_84 = arith.constant dense<0.000000e+00> : vector<32x256xf32>
    %209 = tpu.matmul %208, %10, %cst_84 {dimension_numbers = #tpu.dot_dimension_numbers<[1], [0], [0], [1], [0, 0, 1, 1], [], []>} : vector<32x128xbf16>, vector<128x256xbf16>, vector<32x256xf32> -> vector<32x256xf32>
    %210 = vector.broadcast %22 : vector<1x256xf32> to vector<32x256xf32>
    %211 = arith.addf %209, %210 : vector<32x256xf32>
    %212 = vector.extract_strided_slice %211 {offsets = [0, 0], sizes = [32, 128], strides = [1, 1]} : vector<32x256xf32> to vector<32x128xf32>
    %213 = vector.extract_strided_slice %211 {offsets = [0, 128], sizes = [32, 128], strides = [1, 1]} : vector<32x256xf32> to vector<32x128xf32>
    %214 = vector.shape_cast %207 : vector<32x128xf32> to vector<2x16x128xf32>
    %215 = vector.shape_cast %212 : vector<32x128xf32> to vector<2x16x128xf32>
    %216 = vector.shape_cast %213 : vector<32x128xf32> to vector<2x16x128xf32>
    %217 = vector.extract_strided_slice %214 {offsets = [0, 0, 0], sizes = [2, 16, 32], strides = [1, 1, 1]} : vector<2x16x128xf32> to vector<2x16x32xf32>
    %218 = arith.truncf %217 : vector<2x16x32xf32> to vector<2x16x32xbf16>
    %219 = vector.extract_strided_slice %215 {offsets = [0, 0, 0], sizes = [2, 16, 32], strides = [1, 1, 1]} : vector<2x16x128xf32> to vector<2x16x32xf32>
    %220 = arith.truncf %219 : vector<2x16x32xf32> to vector<2x16x32xbf16>
    "tpu.trace_start"() <{level = 10 : i32, message = "bqd,bkd->bqk"}> : () -> ()
    %cst_85 = arith.constant dense<0.000000e+00> : vector<2x16x16xf32>
    %221 = tpu.matmul %218, %220, %cst_85 {dimension_numbers = #tpu.dot_dimension_numbers<[2], [2], [1], [1], [0, 0, 0, 1, 1, 1], [0], [0]>} : vector<2x16x32xbf16>, vector<2x16x32xbf16>, vector<2x16x16xf32> -> vector<2x16x16xf32>
    "tpu.trace_stop"() : () -> ()
    %222 = arith.addf %221, %38 : vector<2x16x16xf32>
    %cst_86 = arith.constant dense<0xFF800000> : vector<2x16xf32>
    %223 = vector.multi_reduction <maximumf>, %222, %cst_86 [2] : vector<2x16x16xf32> to vector<2x16xf32>
    %224 = vector.shape_cast %223 : vector<2x16xf32> to vector<2x16x1xf32>
    %225 = vector.broadcast %224 : vector<2x16x1xf32> to vector<2x16x16xf32>
    %226 = arith.subf %222, %225 : vector<2x16x16xf32>
    %227 = math.exp %226 : vector<2x16x16xf32>
    %cst_87 = arith.constant dense<0.000000e+00> : vector<2x16xf32>
    %228 = vector.multi_reduction <add>, %227, %cst_87 [2] : vector<2x16x16xf32> to vector<2x16xf32>
    %229 = vector.shape_cast %228 : vector<2x16xf32> to vector<2x16x1xf32>
    %230 = vector.broadcast %229 : vector<2x16x1xf32> to vector<2x16x16xf32>
    %231 = arith.divf %227, %230 : vector<2x16x16xf32>
    %232 = arith.truncf %231 : vector<2x16x16xf32> to vector<2x16x16xbf16>
    %233 = vector.extract_strided_slice %216 {offsets = [0, 0, 0], sizes = [2, 16, 32], strides = [1, 1, 1]} : vector<2x16x128xf32> to vector<2x16x32xf32>
    %234 = arith.truncf %233 : vector<2x16x32xf32> to vector<2x16x32xbf16>
    "tpu.trace_start"() <{level = 10 : i32, message = "bqk,bkd->bqd"}> : () -> ()
    %cst_88 = arith.constant dense<0.000000e+00> : vector<2x16x32xf32>
    %235 = tpu.matmul %232, %234, %cst_88 {dimension_numbers = #tpu.dot_dimension_numbers<[2], [1], [1], [2], [0, 0, 0, 1, 1, 2], [0], [0]>} : vector<2x16x16xbf16>, vector<2x16x32xbf16>, vector<2x16x32xf32> -> vector<2x16x32xf32>
    "tpu.trace_stop"() : () -> ()
    %236 = vector.extract_strided_slice %214 {offsets = [0, 0, 32], sizes = [2, 16, 32], strides = [1, 1, 1]} : vector<2x16x128xf32> to vector<2x16x32xf32>
    %237 = arith.truncf %236 : vector<2x16x32xf32> to vector<2x16x32xbf16>
    %238 = vector.extract_strided_slice %215 {offsets = [0, 0, 32], sizes = [2, 16, 32], strides = [1, 1, 1]} : vector<2x16x128xf32> to vector<2x16x32xf32>
    %239 = arith.truncf %238 : vector<2x16x32xf32> to vector<2x16x32xbf16>
    "tpu.trace_start"() <{level = 10 : i32, message = "bqd,bkd->bqk"}> : () -> ()
    %cst_89 = arith.constant dense<0.000000e+00> : vector<2x16x16xf32>
    %240 = tpu.matmul %237, %239, %cst_89 {dimension_numbers = #tpu.dot_dimension_numbers<[2], [2], [1], [1], [0, 0, 0, 1, 1, 1], [0], [0]>} : vector<2x16x32xbf16>, vector<2x16x32xbf16>, vector<2x16x16xf32> -> vector<2x16x16xf32>
    "tpu.trace_stop"() : () -> ()
    %241 = arith.addf %240, %38 : vector<2x16x16xf32>
    %cst_90 = arith.constant dense<0xFF800000> : vector<2x16xf32>
    %242 = vector.multi_reduction <maximumf>, %241, %cst_90 [2] : vector<2x16x16xf32> to vector<2x16xf32>
    %243 = vector.shape_cast %242 : vector<2x16xf32> to vector<2x16x1xf32>
    %244 = vector.broadcast %243 : vector<2x16x1xf32> to vector<2x16x16xf32>
    %245 = arith.subf %241, %244 : vector<2x16x16xf32>
    %246 = math.exp %245 : vector<2x16x16xf32>
    %cst_91 = arith.constant dense<0.000000e+00> : vector<2x16xf32>
    %247 = vector.multi_reduction <add>, %246, %cst_91 [2] : vector<2x16x16xf32> to vector<2x16xf32>
    %248 = vector.shape_cast %247 : vector<2x16xf32> to vector<2x16x1xf32>
    %249 = vector.broadcast %248 : vector<2x16x1xf32> to vector<2x16x16xf32>
    %250 = arith.divf %246, %249 : vector<2x16x16xf32>
    %251 = arith.truncf %250 : vector<2x16x16xf32> to vector<2x16x16xbf16>
    %252 = vector.extract_strided_slice %216 {offsets = [0, 0, 32], sizes = [2, 16, 32], strides = [1, 1, 1]} : vector<2x16x128xf32> to vector<2x16x32xf32>
    %253 = arith.truncf %252 : vector<2x16x32xf32> to vector<2x16x32xbf16>
    "tpu.trace_start"() <{level = 10 : i32, message = "bqk,bkd->bqd"}> : () -> ()
    %cst_92 = arith.constant dense<0.000000e+00> : vector<2x16x32xf32>
    %254 = tpu.matmul %251, %253, %cst_92 {dimension_numbers = #tpu.dot_dimension_numbers<[2], [1], [1], [2], [0, 0, 0, 1, 1, 2], [0], [0]>} : vector<2x16x16xbf16>, vector<2x16x32xbf16>, vector<2x16x32xf32> -> vector<2x16x32xf32>
    "tpu.trace_stop"() : () -> ()
    %255 = vector.extract_strided_slice %214 {offsets = [0, 0, 64], sizes = [2, 16, 32], strides = [1, 1, 1]} : vector<2x16x128xf32> to vector<2x16x32xf32>
    %256 = arith.truncf %255 : vector<2x16x32xf32> to vector<2x16x32xbf16>
    %257 = vector.extract_strided_slice %215 {offsets = [0, 0, 64], sizes = [2, 16, 32], strides = [1, 1, 1]} : vector<2x16x128xf32> to vector<2x16x32xf32>
    %258 = arith.truncf %257 : vector<2x16x32xf32> to vector<2x16x32xbf16>
    "tpu.trace_start"() <{level = 10 : i32, message = "bqd,bkd->bqk"}> : () -> ()
    %cst_93 = arith.constant dense<0.000000e+00> : vector<2x16x16xf32>
    %259 = tpu.matmul %256, %258, %cst_93 {dimension_numbers = #tpu.dot_dimension_numbers<[2], [2], [1], [1], [0, 0, 0, 1, 1, 1], [0], [0]>} : vector<2x16x32xbf16>, vector<2x16x32xbf16>, vector<2x16x16xf32> -> vector<2x16x16xf32>
    "tpu.trace_stop"() : () -> ()
    %260 = arith.addf %259, %38 : vector<2x16x16xf32>
    %cst_94 = arith.constant dense<0xFF800000> : vector<2x16xf32>
    %261 = vector.multi_reduction <maximumf>, %260, %cst_94 [2] : vector<2x16x16xf32> to vector<2x16xf32>
    %262 = vector.shape_cast %261 : vector<2x16xf32> to vector<2x16x1xf32>
    %263 = vector.broadcast %262 : vector<2x16x1xf32> to vector<2x16x16xf32>
    %264 = arith.subf %260, %263 : vector<2x16x16xf32>
    %265 = math.exp %264 : vector<2x16x16xf32>
    %cst_95 = arith.constant dense<0.000000e+00> : vector<2x16xf32>
    %266 = vector.multi_reduction <add>, %265, %cst_95 [2] : vector<2x16x16xf32> to vector<2x16xf32>
    %267 = vector.shape_cast %266 : vector<2x16xf32> to vector<2x16x1xf32>
    %268 = vector.broadcast %267 : vector<2x16x1xf32> to vector<2x16x16xf32>
    %269 = arith.divf %265, %268 : vector<2x16x16xf32>
    %270 = arith.truncf %269 : vector<2x16x16xf32> to vector<2x16x16xbf16>
    %271 = vector.extract_strided_slice %216 {offsets = [0, 0, 64], sizes = [2, 16, 32], strides = [1, 1, 1]} : vector<2x16x128xf32> to vector<2x16x32xf32>
    %272 = arith.truncf %271 : vector<2x16x32xf32> to vector<2x16x32xbf16>
    "tpu.trace_start"() <{level = 10 : i32, message = "bqk,bkd->bqd"}> : () -> ()
    %cst_96 = arith.constant dense<0.000000e+00> : vector<2x16x32xf32>
    %273 = tpu.matmul %270, %272, %cst_96 {dimension_numbers = #tpu.dot_dimension_numbers<[2], [1], [1], [2], [0, 0, 0, 1, 1, 2], [0], [0]>} : vector<2x16x16xbf16>, vector<2x16x32xbf16>, vector<2x16x32xf32> -> vector<2x16x32xf32>
    "tpu.trace_stop"() : () -> ()
    %274 = vector.extract_strided_slice %214 {offsets = [0, 0, 96], sizes = [2, 16, 32], strides = [1, 1, 1]} : vector<2x16x128xf32> to vector<2x16x32xf32>
    %275 = arith.truncf %274 : vector<2x16x32xf32> to vector<2x16x32xbf16>
    %276 = vector.extract_strided_slice %215 {offsets = [0, 0, 96], sizes = [2, 16, 32], strides = [1, 1, 1]} : vector<2x16x128xf32> to vector<2x16x32xf32>
    %277 = arith.truncf %276 : vector<2x16x32xf32> to vector<2x16x32xbf16>
    "tpu.trace_start"() <{level = 10 : i32, message = "bqd,bkd->bqk"}> : () -> ()
    %cst_97 = arith.constant dense<0.000000e+00> : vector<2x16x16xf32>
    %278 = tpu.matmul %275, %277, %cst_97 {dimension_numbers = #tpu.dot_dimension_numbers<[2], [2], [1], [1], [0, 0, 0, 1, 1, 1], [0], [0]>} : vector<2x16x32xbf16>, vector<2x16x32xbf16>, vector<2x16x16xf32> -> vector<2x16x16xf32>
    "tpu.trace_stop"() : () -> ()
    %279 = arith.addf %278, %38 : vector<2x16x16xf32>
    %cst_98 = arith.constant dense<0xFF800000> : vector<2x16xf32>
    %280 = vector.multi_reduction <maximumf>, %279, %cst_98 [2] : vector<2x16x16xf32> to vector<2x16xf32>
    %281 = vector.shape_cast %280 : vector<2x16xf32> to vector<2x16x1xf32>
    %282 = vector.broadcast %281 : vector<2x16x1xf32> to vector<2x16x16xf32>
    %283 = arith.subf %279, %282 : vector<2x16x16xf32>
    %284 = math.exp %283 : vector<2x16x16xf32>
    %cst_99 = arith.constant dense<0.000000e+00> : vector<2x16xf32>
    %285 = vector.multi_reduction <add>, %284, %cst_99 [2] : vector<2x16x16xf32> to vector<2x16xf32>
    %286 = vector.shape_cast %285 : vector<2x16xf32> to vector<2x16x1xf32>
    %287 = vector.broadcast %286 : vector<2x16x1xf32> to vector<2x16x16xf32>
    %288 = arith.divf %284, %287 : vector<2x16x16xf32>
    %289 = arith.truncf %288 : vector<2x16x16xf32> to vector<2x16x16xbf16>
    %290 = vector.extract_strided_slice %216 {offsets = [0, 0, 96], sizes = [2, 16, 32], strides = [1, 1, 1]} : vector<2x16x128xf32> to vector<2x16x32xf32>
    %291 = arith.truncf %290 : vector<2x16x32xf32> to vector<2x16x32xbf16>
    "tpu.trace_start"() <{level = 10 : i32, message = "bqk,bkd->bqd"}> : () -> ()
    %cst_100 = arith.constant dense<0.000000e+00> : vector<2x16x32xf32>
    %292 = tpu.matmul %289, %291, %cst_100 {dimension_numbers = #tpu.dot_dimension_numbers<[2], [1], [1], [2], [0, 0, 0, 1, 1, 2], [0], [0]>} : vector<2x16x16xbf16>, vector<2x16x32xbf16>, vector<2x16x32xf32> -> vector<2x16x32xf32>
    "tpu.trace_stop"() : () -> ()
    %293 = tpu.concatenate %235, %254, %273, %292 in 2 : vector<2x16x32xf32>, vector<2x16x32xf32>, vector<2x16x32xf32>, vector<2x16x32xf32> -> vector<2x16x128xf32>
    %294 = vector.shape_cast %293 : vector<2x16x128xf32> to vector<32x128xf32>
    %295 = arith.truncf %294 : vector<32x128xf32> to vector<32x128xbf16>
    %cst_101 = arith.constant dense<0.000000e+00> : vector<32x128xf32>
    %296 = tpu.matmul %295, %12, %cst_101 {dimension_numbers = #tpu.dot_dimension_numbers<[1], [0], [0], [1], [0, 0, 1, 1], [], []>} : vector<32x128xbf16>, vector<128x128xbf16>, vector<32x128xf32> -> vector<32x128xf32>
    %297 = vector.broadcast %24 : vector<1x128xf32> to vector<32x128xf32>
    %298 = arith.addf %296, %297 : vector<32x128xf32>
    %299 = arith.addf %155, %298 : vector<32x128xf32>
    %300 = vector.extract_strided_slice %32 {offsets = [2, 0], sizes = [1, 128], strides = [1, 1]} : vector<3x128xf32> to vector<1x128xf32>
    %301 = vector.extract_strided_slice %34 {offsets = [2, 0], sizes = [1, 128], strides = [1, 1]} : vector<3x128xf32> to vector<1x128xf32>
    %cst_102 = arith.constant dense<0.000000e+00> : vector<32xf32>
    %302 = vector.multi_reduction <add>, %299, %cst_102 [1] : vector<32x128xf32> to vector<32xf32>
    %303 = vector.shape_cast %302 : vector<32xf32> to vector<32x1xf32>
    %cst_103 = arith.constant 1.280000e+02 : f32
    %304 = vector.broadcast %cst_103 : f32 to vector<32x1xf32>
    %305 = arith.divf %303, %304 : vector<32x1xf32>
    %306 = vector.broadcast %305 : vector<32x1xf32> to vector<32x128xf32>
    %307 = arith.subf %299, %306 : vector<32x128xf32>
    %308 = arith.mulf %307, %307 : vector<32x128xf32>
    %cst_104 = arith.constant dense<0.000000e+00> : vector<32xf32>
    %309 = vector.multi_reduction <add>, %308, %cst_104 [1] : vector<32x128xf32> to vector<32xf32>
    %310 = vector.shape_cast %309 : vector<32xf32> to vector<32x1xf32>
    %cst_105 = arith.constant 1.280000e+02 : f32
    %311 = vector.broadcast %cst_105 : f32 to vector<32x1xf32>
    %312 = arith.divf %310, %311 : vector<32x1xf32>
    %313 = vector.broadcast %305 : vector<32x1xf32> to vector<32x128xf32>
    %314 = arith.subf %299, %313 : vector<32x128xf32>
    %cst_106 = arith.constant 9.99999974E-6 : f32
    %315 = vector.broadcast %cst_106 : f32 to vector<32x1xf32>
    %316 = arith.addf %312, %315 : vector<32x1xf32>
    %317 = math.rsqrt %316 : vector<32x1xf32>
    %318 = vector.broadcast %317 : vector<32x1xf32> to vector<32x128xf32>
    %319 = arith.mulf %314, %318 : vector<32x128xf32>
    %320 = vector.broadcast %300 : vector<1x128xf32> to vector<32x128xf32>
    %321 = arith.mulf %319, %320 : vector<32x128xf32>
    %322 = vector.broadcast %301 : vector<1x128xf32> to vector<32x128xf32>
    %323 = arith.addf %321, %322 : vector<32x128xf32>
    %324 = arith.truncf %323 : vector<32x128xf32> to vector<32x128xbf16>
    %cst_107 = arith.constant dense<0.000000e+00> : vector<32x256xf32>
    %325 = tpu.matmul %324, %14, %cst_107 {dimension_numbers = #tpu.dot_dimension_numbers<[1], [0], [0], [1], [0, 0, 1, 1], [], []>} : vector<32x128xbf16>, vector<128x256xbf16>, vector<32x256xf32> -> vector<32x256xf32>
    %326 = vector.broadcast %26 : vector<1x256xf32> to vector<32x256xf32>
    %327 = arith.addf %325, %326 : vector<32x256xf32>
    %cst_108 = arith.constant 0.000000e+00 : f32
    %328 = vector.broadcast %cst_108 : f32 to vector<32x256xf32>
    %329 = arith.maximumf %327, %328 : vector<32x256xf32>
    %330 = arith.truncf %329 : vector<32x256xf32> to vector<32x256xbf16>
    %cst_109 = arith.constant dense<0.000000e+00> : vector<32x128xf32>
    %331 = tpu.matmul %330, %30, %cst_109 {dimension_numbers = #tpu.dot_dimension_numbers<[1], [0], [0], [1], [0, 0, 1, 1], [], []>} : vector<32x256xbf16>, vector<256x128xbf16>, vector<32x128xf32> -> vector<32x128xf32>
    %332 = vector.broadcast %28 : vector<1x128xf32> to vector<32x128xf32>
    %333 = arith.addf %331, %332 : vector<32x128xf32>
    %334 = arith.addf %299, %333 : vector<32x128xf32>
    %c0_110 = arith.constant 0 : index
    %c0_111 = arith.constant 0 : index
    %335 = vector.load %arg9[%c0_110, %c0_111] : memref<32x128xf32, #tpu.memory_space<vmem>>, vector<32x128xf32>
    tpu.vector_store %arg9[%c0_110, %c0_111], %334 {strides = array<i32>} : memref<32x128xf32, #tpu.memory_space<vmem>>, vector<32x128xf32>,
    return
  }
  func.func @transform_0(%arg0: i32) -> (i32, i32) {
    %c0_i32 = arith.constant 0 : i32
    %c0_i32_0 = arith.constant 0 : i32
    %c0_i32_1 = arith.constant 0 : i32
    return %c0_i32, %c0_i32_0 : i32, i32
  }
  func.func @transform_1(%arg0: i32) -> (i32, i32) {
    %c0_i32 = arith.constant 0 : i32
    %c0_i32_0 = arith.constant 0 : i32
    %c0_i32_1 = arith.constant 0 : i32
    return %c0_i32, %c0_i32_0 : i32, i32
  }
  func.func @transform_2(%arg0: i32) -> (i32, i32, i32) {
    %c0_i32 = arith.constant 0 : i32
    %c0_i32_0 = arith.constant 0 : i32
    %c0_i32_1 = arith.constant 0 : i32
    %c0_i32_2 = arith.constant 0 : i32
    return %c0_i32, %c0_i32_0, %c0_i32_1 : i32, i32, i32
  }
  func.func @transform_3(%arg0: i32) -> (i32, i32, i32) {
    %c0_i32 = arith.constant 0 : i32
    %c0_i32_0 = arith.constant 0 : i32
    %c0_i32_1 = arith.constant 0 : i32
    %c0_i32_2 = arith.constant 0 : i32
    return %c0_i32, %c0_i32_0, %c0_i32_1 : i32, i32, i32
  }
  func.func @transform_4(%arg0: i32) -> (i32, i32, i32) {
    %c0_i32 = arith.constant 0 : i32
    %c0_i32_0 = arith.constant 0 : i32
    %c0_i32_1 = arith.constant 0 : i32
    return %arg0, %c0_i32, %c0_i32_0 : i32, i32, i32
  }
  func.func @transform_5(%arg0: i32) -> (i32, i32, i32) {
    %c0_i32 = arith.constant 0 : i32
    %c0_i32_0 = arith.constant 0 : i32
    %c0_i32_1 = arith.constant 0 : i32
    return %arg0, %c0_i32, %c0_i32_0 : i32, i32, i32
  }
  func.func @transform_6(%arg0: i32) -> (i32, i32, i32) {
    %c0_i32 = arith.constant 0 : i32
    %c0_i32_0 = arith.constant 0 : i32
    %c0_i32_1 = arith.constant 0 : i32
    return %arg0, %c0_i32, %c0_i32_0 : i32, i32, i32
  }
  func.func @transform_7(%arg0: i32) -> (i32, i32, i32) {
    %c0_i32 = arith.constant 0 : i32
    %c0_i32_0 = arith.constant 0 : i32
    %c0_i32_1 = arith.constant 0 : i32
    return %arg0, %c0_i32, %c0_i32_0 : i32, i32, i32
  }
  func.func @transform_8(%arg0: i32) -> (i32, i32) {
    %c0_i32 = arith.constant 0 : i32
    %c0_i32_0 = arith.constant 0 : i32
    %c0_i32_1 = arith.constant 0 : i32
    return %c0_i32, %c0_i32_0 : i32, i32
  }
}

</mosaic_0001>

<bundles_post_ra>
// kernel: decoders_forward.1
= control target key start
LH: loop header
LB: loop body
LE: loop exit
PB: predicated region body
PF: predicated region fallthrough
CT: control target
= control target key end

     0   :  { %13 = vsyncpa [#allocation3], 0  ;;  %s5983_s0 = inlined_call_operand.vmem [shape: f32[32,128], index: 0, kind: input, shape index: {}]   ;;  %s5984_s1 = inlined_call_operand.vmem [shape: f32[32,128], index: 1, kind: input, shape index: {}, may-alias: {1,8}]   ;;  %s5985_s2 = inlined_call_operand.vmem [shape: f32[2,16,16], index: 2, kind: input, shape index: {}]   ;;  %s5986_s3 = inlined_call_operand.vmem [shape: f32[2,16,16], index: 3, kind: input, shape index: {}]   ;;  %s5987_s4 = inlined_call_operand.hbm [shape: bf16[2,128,1280], index: 4, kind: input, shape index: {}]   ;;  %s5988_s5 = inlined_call_operand.vmem [shape: bf16[2,256,128], index: 5, kind: input, shape index: {}]   ;;  %s5989_s6 = inlined_call_operand.vmem [shape: f32[2,1,1408], index: 6, kind: input, shape index: {}]   ;;  %s5990_s7 = inlined_call_operand.vmem [shape: f32[2,6,128], index: 7, kind: input, shape index: {}]   ;;  %s5991_s8 = inlined_call_operand.vmem [shape: f32[32,128], index: 8, kind: output, shape index: {}, may-alias: {1,8}]  }
   0x1   :  { %15 = vsyncpa [#allocation3 + $0x1], 0  ;;  %s5012_s27 = smov 0   ;;  %s5014_s28 = smov 0  }
   0x2   :  { %s5016_s29 = smov 0   ;;  %s5018_s30 = smov 0  }
   0x3 LB: > { %s5031_s9 = sadd.s32 4294967295, %s4956_s30   ;;  %s5034_s10 = sadd.s32 1, %s4956_s30   ;;  %s4956_s30 = sphi %s5018_s30, %s5998_s30   ;;  %s4952_s29 = sphi %s5016_s29, %s5997_s29   ;;  %s4948_s28 = sphi %s5014_s28, %s5996_s28   ;;  %s4944_s27 = sphi %s5012_s27, %s5995_s27  }
   0x4   : > { %s109_s11 = ssub.s32 %s4956_s30, %s5034_s10  ;;  %s112_s12 = sadd.s32 1, %s4952_s29 }
   0x5   : > { %p110_p0 = scmp.eq.s32.totalorder %s109_s11, 0  ;;  %p119_p1 = scmp.ne.s32.totalorder %s4952_s29, %s4948_s28 }
   0x6   : > { %p120_p2 = scmp.eq.s32.totalorder %s4956_s30, 0  ;;  %p125_p3 = scmp.ne.s32.totalorder %s4948_s28, %s4944_s27 }
   0x7   : > { %s5044_s13 = scalar_select %p110_p0, %s4952_s29, %s112_s12  }
   0x8   : > { %p121_p4 = por %p120_p2, %p119_p1  ;;  %p126_p5 = scmp.eq.s32.totalorder %s5031_s9, 0 }
   0x9   : > { %p4503_p6 = scmp.lt.s32.totalorder %s4956_s30, 2  ;;  %s260_s15 = sand.u32 1, %s4952_s29  }
   0xa   : > { %p5048_p7 = por %p126_p5, %p125_p3  ;;  %s4493_s16 = smul.u32 640, %s260_s15 }
   0xb   : > { %s4494_s17 = smul.u32 10240, %s4956_s30  ;;  %p5054_p8 = pnand %p4503_p6, %p121_p4 }
   0xc   : > { %s264_s22 = scalar_lea.vmem [#allocation2], %s4493_s16  ;;  %s5066_s24 = scalar_lea.sflag [#allocation3], %s260_s15 }
   0xd   : > { %s5061_s21 = scalar_lea.hbm %s5987_s4, %s4494_s17  ;;  %s271_s23 = sshll.u32 %s264_s22, 4  ;;  %s5063_s23 = int_to_ptr.vmem [resolvable:$true] %s271_s23 }
   0xe   : > { %s4892_s25 = scalar_lea.hbm %s5061_s21, 10240  ;;  %p4894_p11 = pneg %p5054_p8 }
   0xf   : > { %p4893_p10 = scmp.ne.s32.totalorder %s5061_s21, %s4892_s25  ;;  %s4897_s11 = scalar_lea.hbm %s5987_s4, 20480 }
  0x10   : > { %p4898_p0 = scmp.lt.u32.totalorder %s5061_s21, %s5987_s4  ;;  %p4899_p1 = scmp.lt.u32.totalorder %s4897_s11, %s4892_s25 }
  0x11   : > { %p4895_p12 = pnand %p4894_p11, %p4893_p10  ;;  %p4901_p3 = scmp.lt.u32.totalorder %s4892_s25, %s5061_s21 }
  0x12   : > { %p4900_p2 = por %p4899_p1, %p4898_p0 }
  0x13   : > { %p4896_p13 = pneg %p4895_p12 }
  0x14   : > { %p4902_p4 = por %p4901_p3, %p4900_p2 }
  0x16   : > { %p4903_p5 = pnand %p4902_p4, %p4896_p13 }
  0x18   : > { %4906 = shalt.err (!%p4903_p5)
}
  0x19   : > { %s4907_s15 = scalar_lea.vmem %s5063_s23, 10240  ;;  %s4958_s17 = smov [#allocation2]  }
  0x1a   : > { %p4908_p6 = scmp.ne.s32.totalorder %s5063_s23, %s4907_s15  ;;  %s4912_s19 = sshll.u32 %s4958_s17, 4  ;;  %s4913_s19 = int_to_ptr.vmem [resolvable:$false] %s4912_s19 }
  0x1b   : > { %s4914_s20 = scalar_lea.vmem %s4913_s19, 20480  ;;  %p4915_p9 = scmp.lt.s32.totalorder %s5063_s23, %s4913_s19 }
  0x1c   : > { %p4910_p10 = pnand %p4908_p6, %p4894_p11  ;;  %p4916_p0 = scmp.lt.s32.totalorder %s4914_s20, %s4907_s15 }
  0x1e   : > { %p4911_p12 = pneg %p4910_p10  ;;  %p4917_p1 = por %p4916_p0, %p4915_p9 }
  0x20   : > { %p4918_p2 = pnand %p4917_p1, %p4911_p12 }
  0x22   : > { %4921 = shalt.err (!%p4918_p2)
}
  0x23   : > { %s4959_s22 = smov 640   ;;  %s4960_s25 = smov 40  }
  0x24   : > { %4502 = dma.hbm_to_vmem [thread:$0]  (!%p5054_p8), %s5061_s21, 10240, %s5063_s23, %s5066_s24, %s4959_s22, %s4959_s22, %s4960_s25  }
  0x25   : > { %p301_p11 = scmp.lt.s32.totalorder %s4956_s30, 3  ;;  %p5994_p13 = scmp.ge.s32.totalorder %s4956_s30, 1 }
  0x27   : > { %p302_p3 = pnand %p5994_p13, %p301_p11 }
  0x28   : > { %s307_s26 = sand.u32 (!%p302_p3), 1, %s4948_s28  }
  0x29   : > { %305 = sbr.rel (%p302_p3) target bundleno = 7704 (0x1e18), region = 52  ;;  %s308_s11 = scalar_lea.sflag (!%p302_p3), [#allocation3], %s307_s26 }
  0x2a   : > { %s4495_s27 = smul.u32 (!%p302_p3), 640, %s307_s26 }
  0x2c   : > { %s5098_s12 = scalar_lea.vmem (!%p302_p3), [#allocation2], %s4495_s27 }
  0x30   : > { %4939 = dma.done.wait (%p5048_p7), %s308_s11, 10240  }
  0x31   : > { %4941 = vsyncadd (%p5048_p7), %s308_s11, 4294957056  ;;  %p352_p9 = scmp.lt.s32.totalorder %s5031_s9, 1  ;;  %p3953_p7 = scmp.ne.s32.totalorder %s5031_s9, 0 }
  0x32   : > { %v370_v0 = vld [vmem:[%s5984_s1] sm:$0xff] (!%p3953_p7)  ;;  %v371_v1 = vld [vmem:[%s5984_s1 + $0x8] sm:$0xff] (!%p3953_p7)  ;;  %v372_v2 = vld [vmem:[%s5984_s1 + $0x10] sm:$0xff] (!%p3953_p7) }
  0x33   : > { %s353_s18 = scalar_select %p352_p9, %s5031_s9, 1 }
  0x34   : > { %369 = sbr.rel (%p3953_p7) target bundleno = 62 (0x3e), region = 60  ;;  %374 = vst [vmem:[%s5991_s8] sm:$0xff] (!%p3953_p7), %v370_v0  ;;  %375 = vst [vmem:[%s5991_s8 + $0x8] sm:$0xff] (!%p3953_p7), %v371_v1 }
  0x35   : > { %s4088_s21 = sshll.u32 %s353_s18, 7  ;;  %s4496_s30 = smul.u32 11, %s353_s18  ;;  %376 = vst [vmem:[%s5991_s8 + $0x10] sm:$0xff] (!%p3953_p7), %v372_v2 }
  0x36   : > { %s5109_s16 = scalar_lea.vmem %s5988_s5, %s4088_s21  ;;  %s3952_s15 = sshll.u32 %s353_s18, 3 }
  0x37   : > { %s5114_s20 = scalar_lea.vmem %s5989_s6, %s4496_s30  ;;  %s5119_s25 = scalar_lea.vmem %s5990_s7, %s3952_s15 }
  0x3c   : > { %v373_v3 = vld [vmem:[%s5984_s1 + $0x18] sm:$0xff] }
  0x3d   : > { %377 = vst [vmem:[%s5991_s8 + $0x18] sm:$0xff] %v373_v3 }
  0x3e PF: > { %v531_v4 = vld [vmem:[%s5991_s8] sm:$0xff]  ;;  %v532_v6 = vld [vmem:[%s5991_s8 + $0x8] sm:$0xff]  ;;  %v4607_v26 = vld [vmem:[%s5098_s12 + $0x54] ss:$40 sps:$4 sm:$0xff]   ;;  %v4961_v43 = vmov 0   ;;  %v592_v54 = vlaneseq  ;;  %vm4963_vm0 = vmmov 0  }
  0x3f   : > { %v533_v5 = vld [vmem:[%s5991_s8 + $0x10] sm:$0xff]  ;;  %547 = vadd.xlane.f32.xlu0 %v531_v4  ;;  %v4604_v8 = vld [vmem:[%s5098_s12 + $0x4] ss:$40 sps:$4 sm:$0xff]   ;;  %v4606_v9 = vld [vmem:[%s5098_s12] ss:$40 sps:$4 sm:$0xff]   ;;  %786 = vmatprep.mubr.bf16.mxu0 %v4961_v43  ;;  %vm860_vm1 = vcmask 261120  }
  0x40   : > { %551 = vadd.xlane.f32.xlu1 %v533_v5  ;;  %754 = vmatprep.subr.bf16.mxu0 %v4604_v8  ;;  %v4609_v27 = vld [vmem:[%s5098_s12 + $0x8] ss:$40 sps:$4 sm:$0xff]   ;;  %v4611_v29 = vld [vmem:[%s5098_s12 + $0xa4] ss:$40 sps:$4 sm:$0xff]   ;;  %v4613_v30 = vld [vmem:[%s5098_s12 + $0x58] ss:$40 sps:$4 sm:$0xff]  }
  0x41   : > { %755 = vmatpush1.bf16.msra.mxu0 %v4606_v9  ;;  %v4610_v28 = vld [vmem:[%s5098_s12 + $0x50] ss:$40 sps:$4 sm:$0xff]   ;;  %4221 = vmatprep.subr.bf16.mxu1 %v4609_v27  ;;  %v4614_v31 = vld [vmem:[%s5098_s12 + $0xa0] ss:$40 sps:$4 sm:$0xff]   ;;  %v4615_v32 = vld [vmem:[%s5098_s12 + $0xf4] ss:$40 sps:$4 sm:$0xff]  }
  0x42   : > { %756 = vmatprep.subr.bf16.mxu0 %v4607_v26  ;;  %4222 = vmatpush3.bf16.msra.mxu1 %v4609_v27  ;;  %v4617_v33 = vld [vmem:[%s5098_s12 + $0xa8] ss:$40 sps:$4 sm:$0xff]   ;;  %v4619_v35 = vld [vmem:[%s5098_s12 + $0x144] ss:$40 sps:$4 sm:$0xff]   ;;  %v4621_v36 = vld [vmem:[%s5098_s12 + $0xf8] ss:$40 sps:$4 sm:$0xff]  }
  0x43   : > { %549 = vadd.xlane.f32.xlu0 %v532_v6  ;;  %4223 = vmatprep.subr.bf16.mxu1 %v4613_v30  ;;  %v4618_v34 = vld [vmem:[%s5098_s12 + $0xf0] ss:$40 sps:$4 sm:$0xff]   ;;  %v4622_v37 = vld [vmem:[%s5098_s12 + $0x140] ss:$40 sps:$4 sm:$0xff]   ;;  %v4623_v38 = vld [vmem:[%s5098_s12 + $0x194] ss:$40 sps:$4 sm:$0xff]  }
  0x44   : > { %v534_v7 = vld [vmem:[%s5991_s8 + $0x18] sm:$0xff]  ;;  %v4625_v39 = vld [vmem:[%s5098_s12 + $0x148] ss:$40 sps:$4 sm:$0xff]   ;;  %v4627_v41 = vld [vmem:[%s5098_s12 + $0x1e4] ss:$40 sps:$4 sm:$0xff]   ;;  %v593_v60 = vshrl.u32 %v592_v54, 7 }
  0x45   : > { %553 = vadd.xlane.f32.xlu1 %v534_v7  ;;  %757 = vmatpush1.bf16.msra.mxu0 %v4610_v28  ;;  %v4626_v40 = vld [vmem:[%s5098_s12 + $0x190] ss:$40 sps:$4 sm:$0xff]   ;;  %v4630_v44 = vld [vmem:[%s5098_s12 + $0x1e0] ss:$40 sps:$4 sm:$0xff]   ;;  %v4631_v45 = vld [vmem:[%s5098_s12 + $0x234] ss:$40 sps:$4 sm:$0xff]  }
  0x46   : > { %758 = vmatprep.subr.bf16.mxu0 %v4611_v29  ;;  %4224 = vmatpush3.bf16.msra.mxu1 %v4613_v30  ;;  %v4629_v42 = vld [vmem:[%s5098_s12 + $0x198] ss:$40 sps:$4 sm:$0xff]   ;;  %v4633_v46 = vld [vmem:[%s5098_s12 + $0x1e8] ss:$40 sps:$4 sm:$0xff]   ;;  %v5199_v63 = vsub.s32 0, %v593_v60  ;;  %vm955_vm2 = vcmask 130048  }
  0x47   : > { %4225 = vmatprep.subr.bf16.mxu1 %v4617_v33  ;;  %v4634_v47 = vld [vmem:[%s5098_s12 + $0x230] ss:$40 sps:$4 sm:$0xff]   ;;  %v529_v0 = vld [vmem:[%s5119_s25] sm:$0x7]  ;;  %s4964_s18 = smov 96   ;;  %s4965_s23 = smov 64  }
  0x48   : > { %v4635_v48 = vld [vmem:[%s5098_s12 + $0x238] ss:$40 sps:$4 sm:$0xff]   ;;  %v595_v3 = vrot.slane %v529_v0, %v5199_v63  ;;  %s4966_s30 = smov 32   ;;  %vm1876_vm3 = vcmask 523264   ;;  %vm1881_vm4 = vcmask 785408  }
  0x49   : > { %759 = vmatpush1.bf16.msra.mxu0 %v4614_v31 }
  0x4a   : > { %760 = vmatprep.subr.bf16.mxu0 %v4615_v32  ;;  %4226 = vmatpush3.bf16.msra.mxu1 %v4617_v33 }
  0x4b   : > { %4227 = vmatprep.subr.bf16.mxu1 %v4621_v36 }
  0x4d   : > { %761 = vmatpush1.bf16.msra.mxu0 %v4618_v34 }
  0x4e   : > { %762 = vmatprep.subr.bf16.mxu0 %v4619_v35  ;;  %4228 = vmatpush3.bf16.msra.mxu1 %v4621_v36 }
  0x4f   : > { %4229 = vmatprep.subr.bf16.mxu1 %v4625_v39 }
  0x51   : > { %763 = vmatpush1.bf16.msra.mxu0 %v4622_v37 }
  0x52   : > { %764 = vmatprep.subr.bf16.mxu0 %v4623_v38  ;;  %4230 = vmatpush3.bf16.msra.mxu1 %v4625_v39 }
  0x53   : > { %4231 = vmatprep.subr.bf16.mxu1 %v4629_v42 }
  0x55   : > { %765 = vmatpush1.bf16.msra.mxu0 %v4626_v40 }
  0x56   : > { %766 = vmatprep.subr.bf16.mxu0 %v4627_v41  ;;  %4232 = vmatpush3.bf16.msra.mxu1 %v4629_v42 }
  0x57   : > { %4233 = vmatprep.subr.bf16.mxu1 %v4633_v46 }
  0x59   : > { %767 = vmatpush1.bf16.msra.mxu0 %v4630_v44 }
  0x5a   : > { %768 = vmatprep.subr.bf16.mxu0 %v4631_v45  ;;  %4234 = vmatpush3.bf16.msra.mxu1 %v4633_v46 }
  0x5b   : > { %4235 = vmatprep.subr.bf16.mxu1 %v4635_v48 }
  0x5d   : > { %769 = vmatpush1.bf16.msra.mxu0 %v4634_v47 }
  0x5e   : > { %4236 = vmatpush3.bf16.msra.mxu1 %v4635_v48 }
  0xcc   : > { %v548_v10 = vpop.xlane.xlu0 %547 }
  0xcd   : > { %v552_v11 = vpop.xlane.xlu1 %551  ;;  %v556_v12 = vmul.f32 0.0078125, %v548_v10 }
  0xce   : > { %v558_v13 = vmul.f32 0.0078125, %v552_v11 }
  0xcf   : > { %v5160_v14 = vsub.f32 %v531_v4, %v556_v12  ;;  %v530_v4 = vld [vmem:[%s5119_s25 + $0x3] sm:$0x7] }
  0xd0   : > { %v5162_v15 = vsub.f32 %v533_v5, %v558_v13  ;;  %v550_v16 = vpop.xlane.xlu0 %549  ;;  %v603_v9 = vrot.slane %v530_v4, %v5199_v63 }
  0xd1   : > { %v557_v18 = vmul.f32 0.0078125, %v550_v16  ;;  %v564_v19 = vmul.f32 %v5160_v14, %v5160_v14 }
  0xd2   : > { %v554_v17 = vpop.xlane.xlu1 %553  ;;  %v566_v21 = vmul.f32 %v5162_v15, %v5162_v15 }
  0xd3   : > { %v559_v20 = vmul.f32 0.0078125, %v554_v17  ;;  %568 = vadd.xlane.f32.xlu0 %v564_v19  ;;  %v5168_v22 = vsub.f32 %v532_v6, %v557_v18 }
  0xd5   : > { %v5170_v23 = vsub.f32 %v534_v7, %v559_v20  ;;  %v565_v24 = vmul.f32 %v5168_v22, %v5168_v22 }
  0xd7   : > { %572 = vadd.xlane.f32.xlu0 %v566_v21  ;;  %570 = vadd.xlane.f32.xlu1 %v565_v24  ;;  %v567_v25 = vmul.f32 %v5170_v23, %v5170_v23  ;;  %v490_v24 = vld [vmem:[%s5114_s20] sm:$0x7] }
  0xd8   : > { %v614_v26 = vrot.slane %v490_v24, %v5199_v63 }
  0xdb   : > { %574 = vadd.xlane.f32.xlu1 %v567_v25  ;;  %v5219_v25 = vsub.s32 2, %v593_v60 }
  0xdd   : > { %v622_v30 = vrot.slane %v490_v24, %v5219_v25 }
 0x160   : > { %v569_v49 = vpop.xlane.xlu0 %568 }
 0x161   : > { %v576_v50 = vmul.f32 0.0078125, %v569_v49 }
 0x163   : > { %v580_v51 = vadd.f32 1e-05, %v576_v50 }
 0x164   : > { %v571_v52 = vpop.xlane.xlu1 %570  ;;  %v573_v53 = vpop.xlane.xlu0 %572 }
 0x165   : > { %4724 = vrsqrt.f32 %v580_v51  ;;  %v577_v55 = vmul.f32 0.0078125, %v571_v52  ;;  %v578_v56 = vmul.f32 0.0078125, %v573_v53 }
 0x167   : > { %v581_v57 = vadd.f32 1e-05, %v577_v55  ;;  %v582_v58 = vadd.f32 1e-05, %v578_v56 }
 0x168   : > { %v575_v59 = vpop.xlane.xlu1 %574 }
 0x169   : > { %4726 = vrsqrt.f32 %v581_v57  ;;  %v579_v61 = vmul.f32 0.0078125, %v575_v59 }
 0x16a   : > { %4728 = vrsqrt.f32 %v582_v58 }
 0x16b   : > { %v583_v62 = vadd.f32 1e-05, %v579_v61 }
 0x16d   : > { %4730 = vrsqrt.f32 %v583_v62  ;;  %v5255_v62 = vld [vmem:[%s5985_s2] sm:$0xff] }
 0x16f   : > { %v4725_v1 = vpop.eup %4724 }
 0x170   : > { %v588_v2 = vmul.f32 %v4725_v1, %v5160_v14  ;;  %v5260_v1 = vld [vmem:[%s5985_s2 + $0x8] sm:$0xff] }
 0x172   : > { %v596_v8 = vmul.f32 %v595_v3, %v588_v2 }
 0x173   : > { %v4727_v5 = vpop.eup %4726 }
 0x174   : > { %v4729_v6 = vpop.eup %4728  ;;  %v589_v7 = vmul.f32 %v4727_v5, %v5168_v22  ;;  %v604_v13 = vadd.f32 %v603_v9, %v596_v8 }
 0x175   : > { %v590_v10 = vmul.f32 %v4729_v6, %v5162_v15  ;;  %v4962_v15 = vmov 0.0  }
 0x176   : > { %v597_v11 = vmul.f32 %v595_v3, %v589_v7  ;;  %4241 = vmatprep.subr.bf16.mxu1 %v4962_v15  ;;  %4271 = vmatprep.subr.bf16.mxu0 %v4962_v15 }
 0x177   : > { %v4731_v12 = vpop.eup %4730  ;;  %v598_v18 = vmul.f32 %v595_v3, %v590_v10 }
 0x178   : > { %v605_v16 = vadd.f32 %v603_v9, %v597_v11  ;;  %v591_v17 = vmul.f32 %v4731_v12, %v5170_v23  ;;  %v5216_v23 = vsub.s32 1, %v593_v60  ;;  %v5274_v11 = vld [vmem:[%s5985_s2 + $0x18] sm:$0xff] }
 0x179   : > { %v606_v20 = vadd.f32 %v603_v9, %v598_v18 }
 0x17a   : > { %v608_v14 = vpack.c.bf16 %v605_v16, %v604_v13  ;;  %v599_v19 = vmul.f32 %v595_v3, %v591_v17  ;;  %v618_v28 = vrot.slane %v490_v24, %v5216_v23 }
 0x17c   : > { %787 = vmatmul.mubr.bf16.vlgmr.msra.gmra.mrb[0].mxu0 %v608_v14  ;;  %4237 = vmatprep.mubr.bf16.mxu1 %v608_v14  ;;  %v607_v21 = vadd.f32 %v603_v9, %v599_v19  ;;  %v5269_v9 = vld [vmem:[%s5985_s2 + $0x10] sm:$0xff] }
 0x17d   : > { %796 = vmatprep.mubr.bf16.mxu0 %v4961_v43 }
 0x17e   : > { %v609_v22 = vpack.c.bf16 %v607_v21, %v606_v20 }
 0x180   : > { %4238 = vmatmul.mubr.bf16.vlgmr.msra.gmra.mrb[0].mxu1 %v609_v22 }
 0x181   : > { %4243 = vmatprep.mubr.msk.bf16.mxu1 %vm4963_vm0, %v4962_v15 }
 0x184   : > { %797 = vmatmul.mubr.bf16.gmra.mrb[4].mxu0 %v609_v22 }
 0x185   : > { %4273 = vmatprep.mubr.msk.bf16.mxu0 %vm4963_vm0, %v4962_v15 }
 0x24f   : > { %v788_v27 = vpop.f32.mrb[0].mxu0 }
 0x250   : > { %v790_v29 = vpop.f32.mrb[1].mxu0  ;;  %v789_v32 = vadd.f32 %v788_v27, %v614_v26 }
 0x251   : > { %v792_v31 = vpop.f32.mrb[2].mxu0  ;;  %v791_v35 = vadd.f32 %v790_v29, %v618_v28 }
 0x252   : > { %v793_v33 = vadd.f32 %v792_v31, %v614_v26  ;;  %v794_v34 = vpop.f32.mrb[3].mxu0 }
 0x253   : > { %v795_v36 = vadd.f32 %v794_v34, %v618_v28  ;;  %v4239_v37 = vpop.f32.mrb[0].mxu1 }
 0x254   : > { %v5224_v38 = vpack.c.bf16 %v793_v33, %v789_v32  ;;  %v850_v39 = vadd.f32 %v4239_v37, %v622_v30  ;;  %v841_v40 = vpop.f32.mrb[1].mxu1 }
 0x255   : > { %v5226_v41 = vpack.c.bf16 %v795_v36, %v791_v35  ;;  %v4240_v42 = vpop.f32.mrb[2].mxu1  ;;  %v842_v46 = vadd.f32 %v841_v40, %v622_v30 }
 0x256   : > { %v853_v44 = vadd.f32 %v4240_v42, %v622_v30  ;;  %v844_v45 = vpop.f32.mrb[3].mxu1 }
 0x257   : > { %v845_v47 = vadd.f32 %v844_v45, %v622_v30  ;;  %v798_v48 = vpop.f32.mrb[4].mxu0  ;;  %v865_v49 = vsel %vm860_vm1, %v5226_v41, 0 }
 0x258   : > { %v5230_v50 = vpack.c.bf16 %v853_v44, %v850_v39  ;;  %v800_v51 = vpop.f32.mrb[5].mxu0  ;;  %4242 = vmatpush3.bf16.xpose.msra.mxu1 %v865_v49  ;;  %v799_v54 = vadd.f32 %v798_v48, %v614_v26 }
 0x259   : > { %v5232_v52 = vpack.c.bf16 %v845_v47, %v842_v46  ;;  %v802_v53 = vpop.f32.mrb[6].mxu0  ;;  %4247 = vmatprep.subr.bf16.mxu1 %v4962_v15  ;;  %v801_v57 = vadd.f32 %v800_v51, %v618_v28 }
 0x25a   : > { %v803_v55 = vadd.f32 %v802_v53, %v614_v26  ;;  %v804_v56 = vpop.f32.mrb[7].mxu0 }
 0x25b   : > { %v805_v58 = vadd.f32 %v804_v56, %v618_v28 }
 0x25c   : > { %v5235_v59 = vpack.c.bf16 %v803_v55, %v799_v54 }
 0x25d   : > { %v5237_v60 = vpack.c.bf16 %v805_v58, %v801_v57 }
 0x25f   : > { %4244 = vmatmul.mubr.msk.bf16.vlgmr.msra.gmra.mrb[4].mxu1 %vm860_vm1, %v5224_v38  ;;  %v912_v61 = vsel %vm860_vm1, %v5237_v60, 0 }
 0x260   : > { %4248 = vmatpush3.bf16.xpose.msra.mxu1 %v912_v61  ;;  %4249 = vmatprep.mubr.msk.bf16.mxu1 %vm4963_vm0, %v4962_v15 }
 0x261   : > { %4253 = vmatprep.subr.bf16.mxu1 %v4962_v15 }
 0x267   : > { %4250 = vmatmul.mubr.msk.bf16.vlgmr.msra.gmra.mrb[8].mxu1 %vm860_vm1, %v5235_v59 }
 0x268   : > { %4254 = vmatpush3.bf16.msra.mxu1 %v5232_v52  ;;  %4255 = vmatprep.mubr.msk.bf16.mxu1 %vm4963_vm0, %v4962_v15 }
 0x269   : > { %4259 = vmatprep.subr.bf16.mxu1 %v4962_v15 }
 0x332   : > { %v901_v0 = vpop.f32.mrb[4].mxu1 }
 0x333   : > { %v902_v2 = vadd.f32 %v901_v0, %v5255_v62  ;;  %v4245_v3 = vpop.f32.mrb[5].mxu1 }
 0x334   : > { %v904_v4 = vpop.f32.mrb[6].mxu1 }
 0x335   : > { %v905_v5 = vadd.f32 %v904_v4, %v5260_v1  ;;  %v4246_v6 = vpop.f32.mrb[7].mxu1  ;;  %v956_v7 = vsel %vm955_vm2, %v902_v2, -inf }
 0x336   : > { %957 = vmax.xlane.f32.xlu0 %v956_v7 }
 0x337   : > { %v959_v8 = vsel %vm955_vm2, %v905_v5, -inf }
 0x338   : > { %960 = vmax.xlane.f32.xlu1 %v959_v8 }
 0x33a   : > { %v948_v10 = vpop.f32.mrb[8].mxu1 }
 0x33b   : > { %v949_v12 = vadd.f32 %v948_v10, %v5269_v9  ;;  %v4251_v13 = vpop.f32.mrb[9].mxu1 }
 0x33c   : > { %v951_v16 = vpop.f32.mrb[10].mxu1 }
 0x33d   : > { %v952_v17 = vadd.f32 %v951_v16, %v5274_v11  ;;  %v4252_v18 = vpop.f32.mrb[11].mxu1  ;;  %v962_v14 = vsel %vm955_vm2, %v949_v12, -inf }
 0x33e   : > { %963 = vmax.xlane.f32.xlu0 %v962_v14 }
 0x33f   : > { %v965_v19 = vsel %vm955_vm2, %v952_v17, -inf }
 0x340   : > { %966 = vmax.xlane.f32.xlu1 %v965_v19 }
 0x3c3   : > { %v958_v20 = vpop.xlane.xlu0 %957 }
 0x3c4   : > { %v968_v21 = vsub.f32 %v902_v2, %v958_v20 }
 0x3c5   : > { %v961_v22 = vpop.xlane.xlu1 %960 }
 0x3c6   : > { %v972_v24 = vmul.f32 1.442695, %v968_v21  ;;  %v969_v26 = vsub.f32 %v905_v5, %v961_v22 }
 0x3c8   : > { %4732 = vpow2.f32 %v972_v24  ;;  %v974_v27 = vmul.f32 1.442695, %v969_v26 }
 0x3ca   : > { %4734 = vpow2.f32 %v974_v27 }
 0x3cb   : > { %v964_v28 = vpop.xlane.xlu0 %963 }
 0x3cc   : > { %v970_v29 = vsub.f32 %v949_v12, %v964_v28 }
 0x3cd   : > { %v967_v37 = vpop.xlane.xlu1 %966 }
 0x3ce   : > { %v976_v30 = vmul.f32 1.442695, %v970_v29  ;;  %v971_v39 = vsub.f32 %v952_v17, %v967_v37 }
 0x3d0   : > { %4736 = vpow2.f32 %v976_v30  ;;  %v978_v40 = vmul.f32 1.442695, %v971_v39 }
 0x3d2   : > { %v4733_v31 = vpop.eup %4732  ;;  %4738 = vpow2.f32 %v978_v40 }
 0x3d3   : > { %v980_v32 = vsel %vm955_vm2, %v4733_v31, 0.0 }
 0x3d4   : > { %v4735_v33 = vpop.eup %4734  ;;  %981 = vadd.xlane.f32.xlu0 %v980_v32 }
 0x3d5   : > { %v983_v34 = vsel %vm955_vm2, %v4735_v33, 0.0 }
 0x3d6   : > { %984 = vadd.xlane.f32.xlu1 %v983_v34 }
 0x3da   : > { %v4737_v35 = vpop.eup %4736 }
 0x3db   : > { %v986_v36 = vsel %vm955_vm2, %v4737_v35, 0.0 }
 0x3dc   : > { %987 = vadd.xlane.f32.xlu0 %v986_v36  ;;  %v4739_v42 = vpop.eup %4738 }
 0x3dd   : > { %v989_v44 = vsel %vm955_vm2, %v4739_v42, 0.0 }
 0x3e7   : > { %1149 = vrot.lane.b32.xlu1 %v5237_v60, %s4964_s18 }
 0x3f2   : > { %1096 = vrot.lane.b32.xlu0 %v5226_v41, %s4964_s18 }
 0x40b   : > { %990 = vadd.xlane.f32.xlu1 %v989_v44 }
 0x41c   : > { %1093 = vrot.lane.b32.xlu1 %v5224_v38, %s4964_s18 }
 0x420   : > { %1146 = vrot.lane.b32.xlu1 %v5235_v59, %s4964_s18 }
 0x461   : > { %v982_v45 = vpop.xlane.xlu0 %981 }
 0x462   : > { %4740 = vrcp.f32 %v982_v45 }
 0x463   : > { %v985_v46 = vpop.xlane.xlu1 %984 }
 0x464   : > { %4742 = vrcp.f32 %v985_v46 }
 0x467   : > { %v1150_v47 = vpop.permute.xlu1 %1149 }
 0x468   : > { %v1155_v48 = vsel %vm860_vm1, %v1150_v47, 0 }
 0x469   : > { %4272 = vmatpush3.bf16.xpose.msra.mxu0 %v1155_v48  ;;  %v988_v56 = vpop.xlane.xlu0 %987 }
 0x46a   : > { %4283 = vmatprep.subr.bf16.mxu0 %v4962_v15  ;;  %4744 = vrcp.f32 %v988_v56 }
 0x46c   : > { %v4741_v49 = vpop.eup %4740 }
 0x46d   : > { %v993_v53 = vmul.f32 %v4741_v49, %v4733_v31  ;;  %v1097_v5 = vpop.permute.xlu0 %1096 }
 0x46e   : > { %v4743_v51 = vpop.eup %4742  ;;  %v1102_v7 = vsel %vm860_vm1, %v1097_v5, 0 }
 0x46f   : > { %v995_v54 = vmul.f32 %v4743_v51, %v4735_v33 }
 0x471   : > { %v1000_v55 = vpack.c.bf16 %v995_v54, %v993_v53 }
 0x473   : > { %4256 = vmatmul.mubr.msk.bf16.vlgmr.msra.gmra.mrb[12].mxu1 %vm955_vm2, %v1000_v55 }
 0x474   : > { %4260 = vmatpush3.bf16.msra.mxu1 %v5230_v50  ;;  %4261 = vmatprep.mubr.msk.bf16.mxu1 %vm4963_vm0, %v4962_v15  ;;  %v4745_v0 = vpop.eup %4744 }
 0x475   : > { %4265 = vmatprep.subr.bf16.mxu1 %v4962_v15  ;;  %v997_v3 = vmul.f32 %v4745_v0, %v4737_v35 }
 0x498   : > { %v991_v57 = vpop.xlane.xlu1 %990 }
 0x499   : > { %4746 = vrcp.f32 %v991_v57 }
 0x49c   : > { %v1094_v58 = vpop.permute.xlu1 %1093 }
 0x4a0   : > { %v1147_v61 = vpop.permute.xlu1 %1146 }
 0x4a1   : > { %4274 = vmatmul.mubr.msk.bf16.vlgmr.msra.gmra.mrb[8].mxu0 %vm860_vm1, %v1147_v61 }
 0x4a2   : > { %4285 = vmatprep.mubr.msk.bf16.mxu0 %vm4963_vm0, %v4962_v15 }
 0x4a3   : > { %v4747_v2 = vpop.eup %4746 }
 0x4a4   : > { %v999_v4 = vmul.f32 %v4747_v2, %v4739_v42 }
 0x4a6   : > { %v1001_v6 = vpack.c.bf16 %v999_v4, %v997_v3 }
 0x4a8   : > { %4262 = vmatmul.mubr.msk.bf16.vlgmr.msra.gmra.mrb[16].mxu1 %vm955_vm2, %v1001_v6 }
 0x4a9   : > { %4266 = vmatpush3.bf16.xpose.msra.mxu1 %v1102_v7  ;;  %4267 = vmatprep.mubr.msk.bf16.mxu1 %vm4963_vm0, %v4962_v15 }
 0x4aa   : > { %4277 = vmatprep.subr.bf16.mxu1 %v4962_v15 }
 0x4b0   : > { %4268 = vmatmul.mubr.msk.bf16.vlgmr.msra.gmra.mrb[20].mxu1 %vm860_vm1, %v1094_v58 }
 0x4b1   : > { %4279 = vmatprep.mubr.msk.bf16.mxu1 %vm4963_vm0, %v4962_v15 }
 0x546   : > { %v5310_v8 = vpop.f32.mrb[12].mxu1 }
 0x547   : > { %v4257_v10 = vpop.f32.mrb[13].mxu1 }
 0x548   : > { %v5312_v12 = vpop.f32.mrb[14].mxu1 }
 0x549   : > { %v4258_v13 = vpop.f32.mrb[15].mxu1 }
 0x574   : > { %v1191_v16 = vpop.f32.mrb[8].mxu0 }
 0x575   : > { %v4275_v17 = vpop.f32.mrb[9].mxu0  ;;  %v1192_v29 = vadd.f32 %v1191_v16, %v5269_v9 }
 0x576   : > { %v1194_v18 = vpop.f32.mrb[10].mxu0 }
 0x577   : > { %v4276_v14 = vpop.f32.mrb[11].mxu0  ;;  %v1195_v34 = vadd.f32 %v1194_v18, %v5274_v11  ;;  %v1204_v35 = vsel %vm955_vm2, %v1192_v29, -inf }
 0x579   : > { %v1207_v36 = vsel %vm955_vm2, %v1195_v34, -inf }
 0x57b   : > { %v5314_v19 = vpop.f32.mrb[16].mxu1 }
 0x57c   : > { %v4263_v20 = vpop.f32.mrb[17].mxu1 }
 0x57d   : > { %v5316_v21 = vpop.f32.mrb[18].mxu1 }
 0x57e   : > { %v4264_v22 = vpop.f32.mrb[19].mxu1 }
 0x583   : > { %v1138_v24 = vpop.f32.mrb[20].mxu1 }
 0x584   : > { %v1139_v26 = vadd.f32 %v1138_v24, %v5255_v62  ;;  %v4269_v27 = vpop.f32.mrb[21].mxu1 }
 0x585   : > { %v1141_v28 = vpop.f32.mrb[22].mxu1 }
 0x586   : > { %v1142_v30 = vadd.f32 %v1141_v28, %v5260_v1  ;;  %v4270_v31 = vpop.f32.mrb[23].mxu1  ;;  %v1198_v32 = vsel %vm955_vm2, %v1139_v26, -inf }
 0x587   : > { %1199 = vmax.xlane.f32.xlu0 %v1198_v32 }
 0x588   : > { %v1201_v33 = vsel %vm955_vm2, %v1142_v30, -inf }
 0x589   : > { %1202 = vmax.xlane.f32.xlu1 %v1201_v33 }
 0x58b   : > { %1205 = vmax.xlane.f32.xlu0 %v1204_v35 }
 0x58f   : > { %1208 = vmax.xlane.f32.xlu0 %v1207_v36 }
 0x614   : > { %v1200_v37 = vpop.xlane.xlu0 %1199 }
 0x615   : > { %v1210_v39 = vsub.f32 %v1139_v26, %v1200_v37 }
 0x616   : > { %v1203_v57 = vpop.xlane.xlu1 %1202 }
 0x617   : > { %v1214_v44 = vmul.f32 1.442695, %v1210_v39  ;;  %v1211_v58 = vsub.f32 %v1142_v30, %v1203_v57 }
 0x618   : > { %v1206_v40 = vpop.xlane.xlu0 %1205 }
 0x619   : > { %v1212_v42 = vsub.f32 %v1192_v29, %v1206_v40  ;;  %v1216_v61 = vmul.f32 1.442695, %v1211_v58 }
 0x61b   : > { %v1218_v45 = vmul.f32 1.442695, %v1212_v42 }
 0x61c   : > { %v1209_v46 = vpop.xlane.xlu0 %1208 }
 0x61d   : > { %4748 = vpow2.f32 %v1218_v45  ;;  %v1213_v47 = vsub.f32 %v1195_v34, %v1209_v46 }
 0x61e   : > { %4750 = vpow2.f32 %v1214_v44 }
 0x61f   : > { %v1220_v48 = vmul.f32 1.442695, %v1213_v47 }
 0x621   : > { %4752 = vpow2.f32 %v1220_v48 }
 0x622   : > { %4754 = vpow2.f32 %v1216_v61 }
 0x627   : > { %v4749_v49 = vpop.eup %4748 }
 0x628   : > { %v1228_v51 = vsel %vm955_vm2, %v4749_v49, 0.0  ;;  %v4751_v53 = vpop.eup %4750 }
 0x629   : > { %1229 = vadd.xlane.f32.xlu0 %v1228_v51  ;;  %v1222_v55 = vsel %vm955_vm2, %v4751_v53, 0.0 }
 0x62b   : > { %v4753_v54 = vpop.eup %4752 }
 0x62c   : > { %v1231_v56 = vsel %vm955_vm2, %v4753_v54, 0.0  ;;  %v4755_v0 = vpop.eup %4754 }
 0x62d   : > { %1223 = vadd.xlane.f32.xlu0 %v1222_v55  ;;  %1232 = vadd.xlane.f32.xlu1 %v1231_v56  ;;  %v1225_v2 = vsel %vm955_vm2, %v4755_v0, 0.0 }
 0x63e   : > { %1293 = vrot.lane.b32.xlu1 %v5230_v50, %s4964_s18 }
 0x642   : > { %1342 = vrot.lane.b32.xlu1 %v5226_v41, %s4965_s23 }
 0x643   : > { %1245 = vrot.lane.b32.xlu0 %v5232_v52, %s4964_s18 }
 0x647   : > { %1340 = vrot.lane.b32.xlu0 %v5224_v38, %s4965_s23 }
 0x666   : > { %1226 = vadd.xlane.f32.xlu1 %v1225_v2 }
 0x677   : > { %1393 = vrot.lane.b32.xlu1 %v5237_v60, %s4965_s23 }
 0x67b   : > { %1391 = vrot.lane.b32.xlu1 %v5235_v59, %s4965_s23 }
 0x6b6   : > { %v1230_v3 = vpop.xlane.xlu0 %1229 }
 0x6b7   : > { %4756 = vrcp.f32 %v1230_v3 }
 0x6ba   : > { %v1224_v4 = vpop.xlane.xlu0 %1223  ;;  %v1233_v5 = vpop.xlane.xlu1 %1232 }
 0x6bb   : > { %4758 = vrcp.f32 %v1233_v5 }
 0x6bc   : > { %4760 = vrcp.f32 %v1224_v4 }
 0x6be   : > { %v1246_v6 = vpop.permute.xlu0 %1245  ;;  %v1294_v7 = vpop.permute.xlu1 %1293 }
 0x6bf   : > { %4278 = vmatpush3.bf16.msra.mxu1 %v1246_v6  ;;  %4284 = vmatpush3.bf16.msra.mxu0 %v1294_v7 }
 0x6c0   : > { %4295 = vmatprep.subr.bf16.mxu0 %v4962_v15  ;;  %4289 = vmatprep.subr.bf16.mxu1 %v4962_v15 }
 0x6c1   : > { %v4757_v10 = vpop.eup %4756 }
 0x6c2   : > { %v1239_v16 = vmul.f32 %v4757_v10, %v4749_v49  ;;  %v1343_v14 = vpop.permute.xlu1 %1342  ;;  %v1341_v33 = vpop.permute.xlu0 %1340 }
 0x6c3   : > { %v1348_v32 = vsel %vm860_vm1, %v1343_v14, 0 }
 0x6c5   : > { %v4759_v13 = vpop.eup %4758 }
 0x6c6   : > { %v1241_v17 = vmul.f32 %v4759_v13, %v4753_v54  ;;  %v4761_v26 = vpop.eup %4760 }
 0x6c7   : > { %v1235_v28 = vmul.f32 %v4761_v26, %v4751_v53 }
 0x6c8   : > { %v1243_v18 = vpack.c.bf16 %v1241_v17, %v1239_v16 }
 0x6ca   : > { %4286 = vmatmul.mubr.msk.bf16.vlgmr.msra.gmra.mrb[12].mxu0 %vm955_vm2, %v1243_v18 }
 0x6cb   : > { %4297 = vmatprep.mubr.msk.bf16.mxu0 %vm4963_vm0, %v4962_v15 }
 0x6f3   : > { %v1227_v20 = vpop.xlane.xlu1 %1226 }
 0x6f4   : > { %4762 = vrcp.f32 %v1227_v20 }
 0x6f7   : > { %v1394_v22 = vpop.permute.xlu1 %1393 }
 0x6f8   : > { %v1399_v24 = vsel %vm860_vm1, %v1394_v22, 0 }
 0x6f9   : > { %4296 = vmatpush3.bf16.xpose.msra.mxu0 %v1399_v24 }
 0x6fa   : > { %4307 = vmatprep.subr.bf16.mxu0 %v4962_v15 }
 0x6fb   : > { %v1392_v30 = vpop.permute.xlu1 %1391 }
 0x6fe   : > { %v4763_v27 = vpop.eup %4762 }
 0x6ff   : > { %v1237_v29 = vmul.f32 %v4763_v27, %v4755_v0 }
 0x700   : > { %4298 = vmatmul.mubr.msk.bf16.vlgmr.msra.gmra.mrb[16].mxu0 %vm860_vm1, %v1392_v30 }
 0x701   : > { %v1242_v31 = vpack.c.bf16 %v1237_v29, %v1235_v28  ;;  %4309 = vmatprep.mubr.msk.bf16.mxu0 %vm4963_vm0, %v4962_v15 }
 0x703   : > { %4280 = vmatmul.mubr.msk.bf16.vlgmr.msra.gmra.mrb[24].mxu1 %vm955_vm2, %v1242_v31 }
 0x704   : > { %4290 = vmatpush3.bf16.xpose.msra.mxu1 %v1348_v32  ;;  %4291 = vmatprep.mubr.msk.bf16.mxu1 %vm4963_vm0, %v4962_v15 }
 0x705   : > { %4301 = vmatprep.subr.bf16.mxu1 %v4962_v15 }
 0x70b   : > { %4292 = vmatmul.mubr.msk.bf16.vlgmr.msra.gmra.mrb[28].mxu1 %vm860_vm1, %v1341_v33 }
 0x70c   : > { %4303 = vmatprep.mubr.msk.bf16.mxu1 %vm4963_vm0, %v4962_v15 }
 0x79d   : > { %v5360_v34 = vpop.f32.mrb[12].mxu0 }
 0x79e   : > { %v4287_v35 = vpop.f32.mrb[13].mxu0 }
 0x79f   : > { %v5362_v36 = vpop.f32.mrb[14].mxu0 }
 0x7a0   : > { %v4549_v37 = vpack.i.bf16 %v5362_v36, %v5360_v34  ;;  %v4288_v39 = vpop.f32.mrb[15].mxu0 }
 0x7d3   : > { %v1435_v40 = vpop.f32.mrb[16].mxu0 }
 0x7d4   : > { %v4299_v42 = vpop.f32.mrb[17].mxu0  ;;  %v1436_v57 = vadd.f32 %v1435_v40, %v5269_v9 }
 0x7d5   : > { %v1438_v44 = vpop.f32.mrb[18].mxu0 }
 0x7d6   : > { %v5366_v45 = vpop.f32.mrb[24].mxu1  ;;  %v4300_v46 = vpop.f32.mrb[19].mxu0  ;;  %v1439_v3 = vadd.f32 %v1438_v44, %v5274_v11  ;;  %v1448_v4 = vsel %vm955_vm2, %v1436_v57, -inf }
 0x7d7   : > { %v4281_v47 = vpop.f32.mrb[25].mxu1 }
 0x7d8   : > { %v5368_v48 = vpop.f32.mrb[26].mxu1  ;;  %v1451_v5 = vsel %vm955_vm2, %v1439_v3, -inf }
 0x7d9   : > { %v4544_v49 = vpack.i.bf16 %v5368_v48, %v5366_v45  ;;  %v4282_v51 = vpop.f32.mrb[27].mxu1 }
 0x7de   : > { %v1384_v53 = vpop.f32.mrb[28].mxu1 }
 0x7df   : > { %v1385_v54 = vadd.f32 %v1384_v53, %v5255_v62  ;;  %v4293_v55 = vpop.f32.mrb[29].mxu1 }
 0x7e0   : > { %v1387_v56 = vpop.f32.mrb[30].mxu1 }
 0x7e1   : > { %v1388_v58 = vadd.f32 %v1387_v56, %v5260_v1  ;;  %v4294_v61 = vpop.f32.mrb[31].mxu1  ;;  %v1442_v0 = vsel %vm955_vm2, %v1385_v54, -inf }
 0x7e2   : > { %1443 = vmax.xlane.f32.xlu0 %v1442_v0 }
 0x7e3   : > { %v1445_v2 = vsel %vm955_vm2, %v1388_v58, -inf }
 0x7e4   : > { %1446 = vmax.xlane.f32.xlu1 %v1445_v2 }
 0x7e6   : > { %1449 = vmax.xlane.f32.xlu0 %v1448_v4 }
 0x7ea   : > { %1452 = vmax.xlane.f32.xlu0 %v1451_v5 }
 0x86f   : > { %v1444_v6 = vpop.xlane.xlu0 %1443 }
 0x870   : > { %v1454_v7 = vsub.f32 %v1385_v54, %v1444_v6 }
 0x871   : > { %v1447_v30 = vpop.xlane.xlu1 %1446 }
 0x872   : > { %v1458_v16 = vmul.f32 1.442695, %v1454_v7  ;;  %v1455_v31 = vsub.f32 %v1388_v58, %v1447_v30 }
 0x873   : > { %v1450_v10 = vpop.xlane.xlu0 %1449 }
 0x874   : > { %v1456_v13 = vsub.f32 %v1436_v57, %v1450_v10  ;;  %v1460_v32 = vmul.f32 1.442695, %v1455_v31 }
 0x876   : > { %v1462_v17 = vmul.f32 1.442695, %v1456_v13 }
 0x877   : > { %v1453_v18 = vpop.xlane.xlu0 %1452 }
 0x878   : > { %4764 = vpow2.f32 %v1462_v17  ;;  %v1457_v14 = vsub.f32 %v1439_v3, %v1453_v18 }
 0x879   : > { %4766 = vpow2.f32 %v1458_v16 }
 0x87a   : > { %v1464_v20 = vmul.f32 1.442695, %v1457_v14 }
 0x87c   : > { %4768 = vpow2.f32 %v1464_v20 }
 0x87d   : > { %4770 = vpow2.f32 %v1460_v32 }
 0x882   : > { %v4765_v22 = vpop.eup %4764 }
 0x883   : > { %v1472_v24 = vsel %vm955_vm2, %v4765_v22, 0.0  ;;  %v4767_v26 = vpop.eup %4766 }
 0x884   : > { %1473 = vadd.xlane.f32.xlu0 %v1472_v24  ;;  %v1466_v28 = vsel %vm955_vm2, %v4767_v26, 0.0 }
 0x886   : > { %v4769_v27 = vpop.eup %4768 }
 0x887   : > { %v1475_v29 = vsel %vm955_vm2, %v4769_v27, 0.0  ;;  %v4771_v33 = vpop.eup %4770 }
 0x888   : > { %1467 = vadd.xlane.f32.xlu0 %v1466_v28  ;;  %1476 = vadd.xlane.f32.xlu1 %v1475_v29  ;;  %v1469_v35 = vsel %vm955_vm2, %v4771_v33, 0.0 }
 0x899   : > { %1535 = vrot.lane.b32.xlu1 %v5230_v50, %s4965_s23 }
 0x89d   : > { %1584 = vrot.lane.b32.xlu1 %v5226_v41, %s4966_s30 }
 0x89e   : > { %1488 = vrot.lane.b32.xlu0 %v5232_v52, %s4965_s23 }
 0x8a2   : > { %1582 = vrot.lane.b32.xlu0 %v5224_v38, %s4966_s30 }
 0x8c1   : > { %1470 = vadd.xlane.f32.xlu1 %v1469_v35 }
 0x8d2   : > { %1635 = vrot.lane.b32.xlu1 %v5237_v60, %s4966_s30 }
 0x8d6   : > { %1633 = vrot.lane.b32.xlu1 %v5235_v59, %s4966_s30 }
 0x911   : > { %v1474_v41 = vpop.xlane.xlu0 %1473 }
 0x912   : > { %4772 = vrcp.f32 %v1474_v41 }
 0x915   : > { %v1468_v39 = vpop.xlane.xlu0 %1467  ;;  %v1477_v40 = vpop.xlane.xlu1 %1476 }
 0x916   : > { %4774 = vrcp.f32 %v1477_v40 }
 0x917   : > { %4776 = vrcp.f32 %v1468_v39 }
 0x919   : > { %v1489_v38 = vpop.permute.xlu0 %1488  ;;  %v1536_v42 = vpop.permute.xlu1 %1535 }
 0x91a   : > { %4302 = vmatpush3.bf16.msra.mxu1 %v1489_v38  ;;  %4308 = vmatpush3.bf16.msra.mxu0 %v1536_v42 }
 0x91b   : > { %4319 = vmatprep.subr.bf16.mxu0 %v4962_v15  ;;  %4313 = vmatprep.subr.bf16.mxu1 %v4962_v15 }
 0x91c   : > { %v4773_v44 = vpop.eup %4772 }
 0x91d   : > { %v1483_v47 = vmul.f32 %v4773_v44, %v4765_v22  ;;  %v1585_v59 = vpop.permute.xlu1 %1584  ;;  %v1583_v4 = vpop.permute.xlu0 %1582 }
 0x91e   : > { %v1590_v3 = vsel %vm860_vm1, %v1585_v59, 0 }
 0x920   : > { %v4775_v46 = vpop.eup %4774 }
 0x921   : > { %v1485_v60 = vmul.f32 %v4775_v46, %v4769_v27  ;;  %v4777_v56 = vpop.eup %4776 }
 0x922   : > { %v1479_v58 = vmul.f32 %v4777_v56, %v4767_v26 }
 0x923   : > { %v1487_v51 = vpack.c.bf16 %v1485_v60, %v1483_v47 }
 0x925   : > { %4310 = vmatmul.mubr.msk.bf16.vlgmr.msra.gmra.mrb[20].mxu0 %vm955_vm2, %v1487_v51 }
 0x926   : > { %4321 = vmatprep.mubr.msk.bf16.mxu0 %vm4963_vm0, %v4962_v15 }
 0x94e   : > { %v1471_v53 = vpop.xlane.xlu1 %1470 }
 0x94f   : > { %4778 = vrcp.f32 %v1471_v53 }
 0x952   : > { %v1636_v54 = vpop.permute.xlu1 %1635 }
 0x953   : > { %v1641_v55 = vsel %vm860_vm1, %v1636_v54, 0 }
 0x954   : > { %4320 = vmatpush3.bf16.xpose.msra.mxu0 %v1641_v55 }
 0x955   : > { %4331 = vmatprep.subr.bf16.mxu0 %v4962_v15 }
 0x956   : > { %v1634_v0 = vpop.permute.xlu1 %1633 }
 0x959   : > { %v4779_v57 = vpop.eup %4778 }
 0x95a   : > { %v1481_v61 = vmul.f32 %v4779_v57, %v4771_v33 }
 0x95b   : > { %4322 = vmatmul.mubr.msk.bf16.vlgmr.msra.gmra.mrb[24].mxu0 %vm860_vm1, %v1634_v0 }
 0x95c   : > { %v1486_v2 = vpack.c.bf16 %v1481_v61, %v1479_v58  ;;  %4333 = vmatprep.mubr.msk.bf16.mxu0 %vm4963_vm0, %v4962_v15 }
 0x95e   : > { %4304 = vmatmul.mubr.msk.bf16.vlgmr.msra.gmra.mrb[32].mxu1 %vm955_vm2, %v1486_v2 }
 0x95f   : > { %4314 = vmatpush3.bf16.xpose.msra.mxu1 %v1590_v3  ;;  %4315 = vmatprep.mubr.msk.bf16.mxu1 %vm4963_vm0, %v4962_v15 }
 0x960   : > { %4325 = vmatprep.subr.bf16.mxu1 %v4962_v15 }
 0x966   : > { %4316 = vmatmul.mubr.msk.bf16.vlgmr.msra.gmra.mrb[36].mxu1 %vm860_vm1, %v1583_v4 }
 0x967   : > { %4327 = vmatprep.mubr.msk.bf16.mxu1 %vm4963_vm0, %v4962_v15 }
 0x9f8   : > { %v5414_v5 = vpop.f32.mrb[20].mxu0 }
 0x9f9   : > { %v4311_v6 = vpop.f32.mrb[21].mxu0 }
 0x9fa   : > { %v1578_v7 = vpop.f32.mrb[22].mxu0 }
 0x9fb   : > { %v4559_v10 = vpack.i.bf16 %v1578_v7, %v5414_v5  ;;  %v4312_v13 = vpop.f32.mrb[23].mxu0 }
 0xa2e   : > { %v1677_v16 = vpop.f32.mrb[24].mxu0 }
 0xa2f   : > { %v4323_v17 = vpop.f32.mrb[25].mxu0  ;;  %v1678_v32 = vadd.f32 %v1677_v16, %v5269_v9 }
 0xa30   : > { %v1680_v18 = vpop.f32.mrb[26].mxu0 }
 0xa31   : > { %v1528_v14 = vpop.f32.mrb[32].mxu1  ;;  %v4324_v20 = vpop.f32.mrb[27].mxu0  ;;  %v1681_v40 = vadd.f32 %v1680_v18, %v5274_v11  ;;  %v1690_v38 = vsel %vm955_vm2, %v1678_v32, -inf  ;;  %v4636_v18 = vld [vmem:[%s5098_s12 + $0xc] ss:$40 sps:$4 sm:$0xff]  }
 0xa32   : > { %v4305_v22 = vpop.f32.mrb[33].mxu1  ;;  %v4638_v20 = vld [vmem:[%s5098_s12 + $0xac] ss:$40 sps:$4 sm:$0xff]  }
 0xa33   : > { %v1531_v24 = vpop.f32.mrb[34].mxu1  ;;  %v4639_v22 = vld [vmem:[%s5098_s12 + $0xfc] ss:$40 sps:$4 sm:$0xff]  }
 0xa34   : > { %v4554_v26 = vpack.i.bf16 %v1531_v24, %v1528_v14  ;;  %v4306_v27 = vpop.f32.mrb[35].mxu1  ;;  %v4637_v14 = vld [vmem:[%s5098_s12 + $0x5c] ss:$40 sps:$4 sm:$0xff]   ;;  %v4640_v24 = vld [vmem:[%s5098_s12 + $0x14c] ss:$40 sps:$4 sm:$0xff]  }
 0xa35   : > { %v4642_v27 = vld [vmem:[%s5098_s12 + $0x1ec] ss:$40 sps:$4 sm:$0xff]  }
 0xa39   : > { %v1626_v28 = vpop.f32.mrb[36].mxu1 }
 0xa3a   : > { %v1627_v29 = vadd.f32 %v1626_v28, %v5255_v62  ;;  %v4317_v30 = vpop.f32.mrb[37].mxu1  ;;  %v1693_v62 = vsel %vm955_vm2, %v1681_v40, -inf  ;;  %v4643_v28 = vld [vmem:[%s5098_s12 + $0x23c] ss:$40 sps:$4 sm:$0xff]  }
 0xa3b   : > { %v1629_v31 = vpop.f32.mrb[38].mxu1 }
 0xa3c   : > { %v1630_v33 = vadd.f32 %v1629_v31, %v5260_v1  ;;  %v4318_v35 = vpop.f32.mrb[39].mxu1  ;;  %v1684_v41 = vsel %vm955_vm2, %v1627_v29, -inf }
 0xa3d   : > { %1685 = vmax.xlane.f32.xlu0 %v1684_v41 }
 0xa3e   : > { %v1687_v39 = vsel %vm955_vm2, %v1630_v33, -inf }
 0xa3f   : > { %1688 = vmax.xlane.f32.xlu1 %v1687_v39 }
 0xa41   : > { %1691 = vmax.xlane.f32.xlu0 %v1690_v38 }
 0xa45   : > { %1694 = vmax.xlane.f32.xlu0 %v1693_v62  ;;  %v5458_v62 = vld [vmem:[%s5983_s0] sm:$0xff] }
 0xaca   : > { %v1686_v42 = vpop.xlane.xlu0 %1685 }
 0xacb   : > { %v1696_v44 = vsub.f32 %v1627_v29, %v1686_v42  ;;  %v536_v42 = vld [vmem:[%s5983_s0 + $0x8] sm:$0xff] }
 0xacc   : > { %v1689_v9 = vpop.xlane.xlu1 %1688 }
 0xacd   : > { %v1700_v47 = vmul.f32 1.442695, %v1696_v44  ;;  %v1697_v60 = vsub.f32 %v1630_v33, %v1689_v9 }
 0xace   : > { %v1692_v46 = vpop.xlane.xlu0 %1691 }
 0xacf   : > { %v1698_v1 = vsub.f32 %v1678_v32, %v1692_v46  ;;  %v1702_v54 = vmul.f32 1.442695, %v1697_v60 }
 0xad1   : > { %v1704_v51 = vmul.f32 1.442695, %v1698_v1 }
 0xad2   : > { %v1695_v59 = vpop.xlane.xlu0 %1694 }
 0xad3   : > { %4780 = vpow2.f32 %v1704_v51  ;;  %v1699_v53 = vsub.f32 %v1681_v40, %v1695_v59 }
 0xad4   : > { %4782 = vpow2.f32 %v1700_v47 }
 0xad5   : > { %v1706_v11 = vmul.f32 1.442695, %v1699_v53 }
 0xad7   : > { %4784 = vpow2.f32 %v1706_v11 }
 0xad8   : > { %4786 = vpow2.f32 %v1702_v54 }
 0xadd   : > { %v4781_v55 = vpop.eup %4780 }
 0xade   : > { %v1714_v56 = vsel %vm955_vm2, %v4781_v55, 0.0  ;;  %v4783_v57 = vpop.eup %4782 }
 0xadf   : > { %1715 = vadd.xlane.f32.xlu0 %v1714_v56  ;;  %v1708_v61 = vsel %vm955_vm2, %v4783_v57, 0.0 }
 0xae1   : > { %v4785_v58 = vpop.eup %4784 }
 0xae2   : > { %v1717_v0 = vsel %vm955_vm2, %v4785_v58, 0.0  ;;  %v4787_v2 = vpop.eup %4786 }
 0xae3   : > { %1709 = vadd.xlane.f32.xlu0 %v1708_v61  ;;  %1718 = vadd.xlane.f32.xlu1 %v1717_v0  ;;  %v1711_v3 = vsel %vm955_vm2, %v4787_v2, 0.0 }
 0xae7   : > { %1712 = vadd.xlane.f32.xlu1 %v1711_v3 }
 0xaf8   : > { %1777 = vrot.lane.b32.xlu1 %v5230_v50, %s4966_s30 }
 0xaf9   : > { %1730 = vrot.lane.b32.xlu0 %v5232_v52, %s4966_s30 }
 0xafc   : > { %4545 = vrot.lane.b32.xlu1 %v4544_v49, %s4966_s30 }
 0xafd   : > { %4555 = vrot.lane.b32.xlu0 %v4554_v26, %s4965_s23  ;;  %v4641_v26 = vld [vmem:[%s5098_s12 + $0x19c] ss:$40 sps:$4 sm:$0xff]  }
 0xb00   : > { %4550 = vrot.lane.b32.xlu1 %v4549_v37, %s4966_s30 }
 0xb04   : > { %4560 = vrot.lane.b32.xlu1 %v4559_v10, %s4965_s23 }
 0xb6c   : > { %v1716_v4 = vpop.xlane.xlu0 %1715 }
 0xb6d   : > { %4788 = vrcp.f32 %v1716_v4 }
 0xb70   : > { %v1710_v50 = vpop.xlane.xlu0 %1709  ;;  %v1719_v5 = vpop.xlane.xlu1 %1718 }
 0xb71   : > { %4790 = vrcp.f32 %v1719_v5 }
 0xb72   : > { %4792 = vrcp.f32 %v1710_v50 }
 0xb74   : > { %v1731_v52 = vpop.permute.xlu0 %1730  ;;  %v1713_v6 = vpop.xlane.xlu1 %1712 }
 0xb75   : > { %4794 = vrcp.f32 %v1713_v6  ;;  %4326 = vmatpush3.bf16.msra.mxu1 %v1731_v52 }
 0xb76   : > { %4337 = vmatprep.subr.bf16.mxu1 %v4636_v18 }
 0xb77   : > { %v4789_v48 = vpop.eup %4788 }
 0xb78   : > { %v1778_v45 = vpop.permute.xlu1 %1777  ;;  %v1725_v36 = vmul.f32 %v4789_v48, %v4781_v55  ;;  %v4556_v54 = vpop.permute.xlu0 %4555 }
 0xb79   : > { %4332 = vmatpush3.bf16.msra.mxu0 %v1778_v45  ;;  %v4558_v4 = vunpack.i.h.bf16 %v4556_v54  ;;  %v4557_v50 = vunpack.i.l.bf16 %v4556_v54  ;;  %v4656_v54 = vld [vmem:[%s5098_s12 + $0x154] ss:$40 sps:$4 sm:$0xff]  }
 0xb7b   : > { %v4791_v49 = vpop.eup %4790 }
 0xb7c   : > { %v4793_v34 = vpop.eup %4792  ;;  %v1727_v37 = vmul.f32 %v4791_v49, %v4785_v58  ;;  %v4546_v44 = vpop.permute.xlu1 %4545 }
 0xb7d   : > { %v1721_v13 = vmul.f32 %v4793_v34, %v4783_v57  ;;  %v4548_v60 = vunpack.i.h.bf16 %v4546_v44  ;;  %v4547_v51 = vunpack.i.l.bf16 %v4546_v44 }
 0xb7e   : > { %v1729_v10 = vpack.c.bf16 %v1727_v37, %v1725_v36  ;;  %v3994_v36 = vld [vmem:[%s5114_s20 + $0x3] ss:$0 sm:$0xff] }
 0xb7f   : > { %v4795_v7 = vpop.eup %4794  ;;  %v1873_v61 = vsel %vm860_vm1, %v5312_v12, %v4548_v60  ;;  %v1872_v0 = vsel %vm860_vm1, %v5310_v8, %v4547_v51  ;;  %v4650_v60 = vld [vmem:[%s5098_s12 + $0xb4] ss:$40 sps:$4 sm:$0xff]   ;;  %v4655_v51 = vld [vmem:[%s5098_s12 + $0x108] ss:$40 sps:$4 sm:$0xff]  }
 0xb80   : > { %v1723_v16 = vmul.f32 %v4795_v7, %v4787_v2  ;;  %4334 = vmatmul.mubr.msk.bf16.vlgmr.msra.gmra.mrb[28].mxu0 %vm955_vm2, %v1729_v10  ;;  %v4551_v9 = vpop.permute.xlu1 %4550  ;;  %v1877_v12 = vsel %vm1876_vm3, %v1872_v0, %v4557_v50  ;;  %v1878_v48 = vsel %vm1876_vm3, %v1873_v61, %v4558_v4  ;;  %v4665_v61 = vld [vmem:[%s5098_s12 + $0x244] ss:$40 sps:$4 sm:$0xff]  }
 0xb81   : > { %v4553_v1 = vunpack.i.h.bf16 %v4551_v9  ;;  %v4552_v47 = vunpack.i.l.bf16 %v4551_v9  ;;  %v4646_v9 = vld [vmem:[%s5098_s12 + $0x18] ss:$40 sps:$4 sm:$0xff]  }
 0xb82   : > { %v1728_v17 = vpack.c.bf16 %v1723_v16, %v1721_v13 }
 0xb83   : > { %v1875_v55 = vsel %vm860_vm1, %v5316_v21, %v4553_v1  ;;  %v1874_v56 = vsel %vm860_vm1, %v5314_v19, %v4552_v47  ;;  %v4647_v1 = vld [vmem:[%s5098_s12 + $0x64] ss:$40 sps:$4 sm:$0xff]   ;;  %v4652_v47 = vld [vmem:[%s5098_s12 + $0xb8] ss:$40 sps:$4 sm:$0xff]  }
 0xb84   : > { %4328 = vmatmul.mubr.msk.bf16.vlgmr.msra.gmra.mrb[40].mxu1 %vm955_vm2, %v1728_v17  ;;  %v4561_v46 = vpop.permute.xlu1 %4560  ;;  %v4884_v17 = vld [vmem:[%s5991_s8 + $0x10] sm:$0xff] }
 0xb85   : > { %4338 = vmatpush3.bf16.msra.mxu1 %v4636_v18  ;;  %v4563_v59 = vunpack.i.h.bf16 %v4561_v46  ;;  %v4562_v53 = vunpack.i.l.bf16 %v4561_v46  ;;  %v4644_v46 = vld [vmem:[%s5098_s12 + $0x14] ss:$40 sps:$4 sm:$0xff]  }
 0xb86   : > { %4339 = vmatprep.subr.bf16.mxu1 %v4637_v14 }
 0xb87   : > { %v1879_v2 = vsel %vm1876_vm3, %v1874_v56, %v4562_v53  ;;  %v1880_v3 = vsel %vm1876_vm3, %v1875_v55, %v4563_v59  ;;  %v4653_v59 = vld [vmem:[%s5098_s12 + $0x104] ss:$40 sps:$4 sm:$0xff]   ;;  %v4658_v53 = vld [vmem:[%s5098_s12 + $0x158] ss:$40 sps:$4 sm:$0xff]  }
 0xb88   : > { %v4659_v55 = vld [vmem:[%s5098_s12 + $0x1a4] ss:$40 sps:$4 sm:$0xff]   ;;  %v4664_v56 = vld [vmem:[%s5098_s12 + $0x1f8] ss:$40 sps:$4 sm:$0xff]  }
 0xb89   : > { %4340 = vmatpush3.bf16.msra.mxu1 %v4637_v14 }
 0xb8a   : > { %4341 = vmatprep.subr.bf16.mxu1 %v4638_v20 }
 0xb8d   : > { %4342 = vmatpush3.bf16.msra.mxu1 %v4638_v20 }
 0xb8e   : > { %4343 = vmatprep.subr.bf16.mxu1 %v4639_v22 }
 0xb91   : > { %4344 = vmatpush3.bf16.msra.mxu1 %v4639_v22 }
 0xb92   : > { %4345 = vmatprep.subr.bf16.mxu1 %v4640_v24 }
 0xb95   : > { %4346 = vmatpush3.bf16.msra.mxu1 %v4640_v24 }
 0xb96   : > { %4347 = vmatprep.subr.bf16.mxu1 %v4641_v26 }
 0xb99   : > { %4348 = vmatpush3.bf16.msra.mxu1 %v4641_v26  ;;  %v4885_v26 = vld [vmem:[%s5991_s8 + $0x18] sm:$0xff] }
 0xb9a   : > { %4349 = vmatprep.subr.bf16.mxu1 %v4642_v27 }
 0xb9d   : > { %4350 = vmatpush3.bf16.msra.mxu1 %v4642_v27 }
 0xb9e   : > { %4351 = vmatprep.subr.bf16.mxu1 %v4643_v28 }
 0xba1   : > { %4352 = vmatpush3.bf16.msra.mxu1 %v4643_v28 }
 0xba2   : > { %2305 = vmatprep.subr.bf16.mxu1 %v4646_v9 }
 0xc53   : > { %v1817_v29 = vpop.f32.mrb[28].mxu0 }
 0xc54   : > { %v4335_v30 = vpop.f32.mrb[29].mxu0 }
 0xc55   : > { %v1820_v31 = vpop.f32.mrb[30].mxu0 }
 0xc56   : > { %v4569_v32 = vpack.i.bf16 %v1820_v31, %v1817_v29  ;;  %v4336_v33 = vpop.f32.mrb[31].mxu0  ;;  %v4886_v29 = vld [vmem:[%s5991_s8] sm:$0xff] }
 0xc57   : > { %v1770_v35 = vpop.f32.mrb[40].mxu1  ;;  %v5504_v33 = vld [vmem:[%s5983_s0 + $0x18] sm:$0xff] }
 0xc58   : > { %v4329_v41 = vpop.f32.mrb[41].mxu1  ;;  %4570 = vrot.lane.b32.xlu1 %v4569_v32, %s4964_s18 }
 0xc59   : > { %v1773_v39 = vpop.f32.mrb[42].mxu1  ;;  %v4887_v41 = vld [vmem:[%s5991_s8 + $0x8] sm:$0xff] }
 0xc5a   : > { %v4564_v40 = vpack.i.bf16 %v1773_v39, %v1770_v35  ;;  %v4330_v38 = vpop.f32.mrb[43].mxu1 }
 0xc5c   : > { %4565 = vrot.lane.b32.xlu0 %v4564_v40, %s4964_s18 }
 0xc7b   : > { %2055 = vadd.xlane.f32.xlu0 %v5458_v62 }
 0xc7c   : > { %2057 = vadd.xlane.f32.xlu1 %v536_v42 }
 0xcca   : > { %v4571_v11 = vpop.permute.xlu1 %4570 }
 0xccb   : > { %v4573_v57 = vunpack.i.h.bf16 %v4571_v11  ;;  %v4572_v58 = vunpack.i.l.bf16 %v4571_v11  ;;  %v4661_v11 = vld [vmem:[%s5098_s12 + $0x1a8] ss:$40 sps:$4 sm:$0xff]  }
 0xccd   : > { %v1884_v21 = vsel %vm1881_vm4, %v1879_v2, %v4572_v58  ;;  %v1885_v5 = vsel %vm1881_vm4, %v1880_v3, %v4573_v57  ;;  %v4662_v57 = vld [vmem:[%s5098_s12 + $0x1f4] ss:$40 sps:$4 sm:$0xff]   ;;  %v4667_v58 = vld [vmem:[%s5098_s12 + $0x248] ss:$40 sps:$4 sm:$0xff]  }
 0xcce   : > { %v4566_v19 = vpop.permute.xlu0 %4565  ;;  %v1887_v52 = vpack.c.bf16 %v1885_v5, %v1884_v21 }
 0xccf   : > { %v4568_v6 = vunpack.i.h.bf16 %v4566_v19  ;;  %v4567_v45 = vunpack.i.l.bf16 %v4566_v19 }
 0xcd1   : > { %v1882_v8 = vsel %vm1881_vm4, %v1877_v12, %v4567_v45  ;;  %v1883_v49 = vsel %vm1881_vm4, %v1878_v48, %v4568_v6 }
 0xcd2   : > { %v1886_v34 = vpack.c.bf16 %v1883_v49, %v1882_v8 }
 0xcd4   : > { %4353 = vmatprep.mubr.bf16.mxu1 %v1886_v34 }
 0xcd5   : > { %4354 = vmatmul.mubr.bf16.vlgmr.msra.gmra.mrb[44].mxu1 %v1887_v52 }
 0xcd6   : > { %2337 = vmatprep.mubr.bf16.mxu1 %v4961_v43  ;;  %2306 = vmatpush1.bf16.msra.mxu1 %v4644_v46  ;;  %v4889_v46 = vld [vmem:[%s5119_s25 + $0x3] sm:$0x7] }
 0xd08   : > { %v2056_v28 = vpop.xlane.xlu0 %2055 }
 0xd09   : > { %v2058_v7 = vpop.xlane.xlu1 %2057  ;;  %v2063_v35 = vmul.f32 0.0078125, %v2056_v28 }
 0xd0a   : > { %v2064_v24 = vmul.f32 0.0078125, %v2058_v7 }
 0xd0b   : > { %v5517_v38 = vsub.f32 %v5458_v62, %v2063_v35  ;;  %v4649_v62 = vld [vmem:[%s5098_s12 + $0x68] ss:$40 sps:$4 sm:$0xff]  }
 0xd0c   : > { %v5499_v32 = vsub.f32 %v536_v42, %v2064_v24  ;;  %v5522_v42 = vld [vmem:[%s5983_s0 + $0x10] sm:$0xff]  ;;  %2307 = vmatprep.subr.bf16.mxu1 %v4649_v62  ;;  %v5584_v62 = vrot.slane %v4889_v46, %v5216_v23 }
 0xd0d   : > { %v2071_v44 = vmul.f32 %v5517_v38, %v5517_v38  ;;  %2308 = vmatpush1.bf16.msra.mxu1 %v4647_v1 }
 0xd0e   : > { %v2072_v40 = vmul.f32 %v5499_v32, %v5499_v32  ;;  %2309 = vmatprep.subr.bf16.mxu1 %v4652_v47 }
 0xd11   : > { %2310 = vmatpush1.bf16.msra.mxu1 %v4650_v60  ;;  %v4671_v60 = vld [vmem:[%s5098_s12 + $0x100] ss:$40 sps:$4 sm:$0xff]  }
 0xd12   : > { %2311 = vmatprep.subr.bf16.mxu1 %v4655_v51 }
 0xd15   : > { %2312 = vmatpush1.bf16.msra.mxu1 %v4653_v59 }
 0xd16   : > { %2313 = vmatprep.subr.bf16.mxu1 %v4658_v53  ;;  %v4672_v53 = vld [vmem:[%s5098_s12 + $0x150] ss:$40 sps:$4 sm:$0xff]  }
 0xd19   : > { %2314 = vmatpush1.bf16.msra.mxu1 %v4656_v54 }
 0xd1a   : > { %2315 = vmatprep.subr.bf16.mxu1 %v4661_v11  ;;  %v4673_v11 = vld [vmem:[%s5098_s12 + $0x1a0] ss:$40 sps:$4 sm:$0xff]  }
 0xd1d   : > { %2316 = vmatpush1.bf16.msra.mxu1 %v4659_v55  ;;  %v4675_v55 = vld [vmem:[%s5098_s12 + $0x240] ss:$40 sps:$4 sm:$0xff]  }
 0xd1e   : > { %2317 = vmatprep.subr.bf16.mxu1 %v4664_v56 }
 0xd21   : > { %2318 = vmatpush1.bf16.msra.mxu1 %v4662_v57 }
 0xd22   : > { %2319 = vmatprep.subr.bf16.mxu1 %v4667_v58 }
 0xd25   : > { %2320 = vmatpush1.bf16.msra.mxu1 %v4665_v61 }
 0xd26   : > { %4407 = vmatprep.subr.bf16.mxu1 %v4962_v15 }
 0xda8   : > { %v4355_v37 = vpop.f32.mrb[44].mxu1 }
 0xda9   : > { %v1985_v10 = vadd.f32 %v4355_v37, %v3994_v36  ;;  %v1976_v13 = vpop.f32.mrb[45].mxu1 }
 0xdaa   : > { %v4356_v16 = vpop.f32.mrb[46].mxu1  ;;  %v1977_v14 = vadd.f32 %v3994_v36, %v1976_v13 }
 0xdab   : > { %v5485_v18 = vadd.f32 %v4884_v17, %v1985_v10  ;;  %v1988_v20 = vadd.f32 %v4356_v16, %v3994_v36  ;;  %v1979_v22 = vpop.f32.mrb[47].mxu1 }
 0xdac   : > { %v5496_v30 = vadd.f32 %v4886_v29, %v1977_v14  ;;  %v1980_v31 = vadd.f32 %v3994_v36, %v1979_v22 }
 0xdad   : > { %v5490_v27 = vadd.f32 %v4885_v26, %v1988_v20  ;;  %1999 = vadd.xlane.f32.xlu0 %v5485_v18 }
 0xdae   : > { %v5510_v39 = vadd.f32 %v4887_v41, %v1980_v31  ;;  %v4668_v31 = vld [vmem:[%s5098_s12 + $0x10] ss:$40 sps:$4 sm:$0xff]   ;;  %v4888_v41 = vld [vmem:[%s5119_s25] sm:$0x7] }
 0xdaf   : > { %2001 = vadd.xlane.f32.xlu1 %v5490_v27  ;;  %4357 = vmatprep.subr.bf16.mxu0 %v4668_v31 }
 0xdb0   : > { %4358 = vmatpush3.bf16.msra.mxu0 %v4668_v31 }
 0xdb1   : > { %1995 = vadd.xlane.f32.xlu0 %v5496_v30 }
 0xdb3   : > { %2061 = vadd.xlane.f32.xlu1 %v5504_v33 }
 0xdb5   : > { %1997 = vadd.xlane.f32.xlu0 %v5510_v39 }
 0xdb7   : > { %2077 = vadd.xlane.f32.xlu1 %v2072_v40  ;;  %v5578_v40 = vrot.slane %v4888_v41, %v5216_v23 }
 0xdb9   : > { %2059 = vadd.xlane.f32.xlu0 %v5522_v42 }
 0xdbd   : > { %2075 = vadd.xlane.f32.xlu0 %v2071_v44  ;;  %v4670_v44 = vld [vmem:[%s5098_s12 + $0xb0] ss:$40 sps:$4 sm:$0xff]  }
 0xe3a   : > { %v2000_v0 = vpop.xlane.xlu0 %1999 }
 0xe3b   : > { %v2005_v2 = vmul.f32 0.0078125, %v2000_v0 }
 0xe3c   : > { %v2002_v3 = vpop.xlane.xlu1 %2001 }
 0xe3d   : > { %v5545_v4 = vsub.f32 %v5485_v18, %v2005_v2  ;;  %v2006_v50 = vmul.f32 0.0078125, %v2002_v3 }
 0xe3e   : > { %v1996_v21 = vpop.xlane.xlu0 %1995 }
 0xe3f   : > { %v5548_v5 = vsub.f32 %v5490_v27, %v2006_v50  ;;  %v2003_v19 = vmul.f32 0.0078125, %v1996_v21  ;;  %v2013_v52 = vmul.f32 %v5545_v4, %v5545_v4 }
 0xe40   : > { %v2062_v6 = vpop.xlane.xlu1 %2061 }
 0xe41   : > { %v5553_v45 = vsub.f32 %v5496_v30, %v2003_v19  ;;  %v2066_v12 = vmul.f32 0.0078125, %v2062_v6  ;;  %2019 = vadd.xlane.f32.xlu0 %v2013_v52  ;;  %v2014_v48 = vmul.f32 %v5548_v5, %v5548_v5 }
 0xe42   : > { %v1998_v8 = vpop.xlane.xlu0 %1997 }
 0xe43   : > { %v2004_v49 = vmul.f32 0.0078125, %v1998_v8  ;;  %2021 = vadd.xlane.f32.xlu1 %v2014_v48  ;;  %v2011_v34 = vmul.f32 %v5553_v45, %v5553_v45  ;;  %v5560_v37 = vsub.f32 %v5504_v33, %v2066_v12  ;;  %v4669_v33 = vld [vmem:[%s5098_s12 + $0x60] ss:$40 sps:$4 sm:$0xff]  }
 0xe44   : > { %v2078_v36 = vpop.xlane.xlu1 %2077  ;;  %4359 = vmatprep.subr.bf16.mxu0 %v4669_v33 }
 0xe45   : > { %v5563_v7 = vsub.f32 %v5510_v39, %v2004_v49  ;;  %v2084_v10 = vmul.f32 0.0078125, %v2078_v36  ;;  %2015 = vadd.xlane.f32.xlu0 %v2011_v34  ;;  %v2074_v22 = vmul.f32 %v5560_v37, %v5560_v37  ;;  %4360 = vmatpush3.bf16.msra.mxu0 %v4669_v33 }
 0xe46   : > { %v2060_v13 = vpop.xlane.xlu0 %2059  ;;  %4361 = vmatprep.subr.bf16.mxu0 %v4670_v44 }
 0xe47   : > { %v2088_v16 = vadd.f32 1e-05, %v2084_v10  ;;  %v2065_v17 = vmul.f32 0.0078125, %v2060_v13  ;;  %v2012_v14 = vmul.f32 %v5563_v7, %v5563_v7 }
 0xe49   : > { %4796 = vrsqrt.f32 %v2088_v16  ;;  %v5568_v20 = vsub.f32 %v5522_v42, %v2065_v17  ;;  %2017 = vadd.xlane.f32.xlu1 %v2012_v14  ;;  %4362 = vmatpush3.bf16.msra.mxu0 %v4670_v44 }
 0xe4a   : > { %v2076_v24 = vpop.xlane.xlu0 %2075  ;;  %4363 = vmatprep.subr.bf16.mxu0 %v4671_v60 }
 0xe4b   : > { %v2083_v26 = vmul.f32 0.0078125, %v2076_v24  ;;  %v2073_v28 = vmul.f32 %v5568_v20, %v5568_v20 }
 0xe4d   : > { %v2087_v29 = vadd.f32 1e-05, %v2083_v26  ;;  %2081 = vadd.xlane.f32.xlu1 %v2074_v22  ;;  %2079 = vadd.xlane.f32.xlu0 %v2073_v28 }
 0xe4e   : > { %4364 = vmatpush3.bf16.msra.mxu0 %v4671_v60 }
 0xe4f   : > { %4798 = vrsqrt.f32 %v2087_v29  ;;  %4365 = vmatprep.subr.bf16.mxu0 %v4672_v53 }
 0xe52   : > { %4366 = vmatpush3.bf16.msra.mxu0 %v4672_v53 }
 0xe53   : > { %v4797_v35 = vpop.eup %4796  ;;  %4367 = vmatprep.subr.bf16.mxu0 %v4673_v11 }
 0xe54   : > { %v2096_v42 = vmul.f32 %v4797_v35, %v5499_v32 }
 0xe56   : > { %v2100_v47 = vmul.f32 %v2096_v42, %v5578_v40  ;;  %4368 = vmatpush3.bf16.msra.mxu0 %v4673_v11 }
 0xe58   : > { %v2104_v59 = vadd.f32 %v2100_v47, %v5584_v62 }
 0xe59   : > { %v4799_v9 = vpop.eup %4798 }
 0xe5a   : > { %v2095_v1 = vmul.f32 %v4799_v9, %v5517_v38  ;;  %v4674_v38 = vld [vmem:[%s5098_s12 + $0x1f0] ss:$40 sps:$4 sm:$0xff]  }
 0xe5b   : > { %4369 = vmatprep.subr.bf16.mxu0 %v4674_v38 }
 0xe5c   : > { %v2099_v51 = vmul.f32 %v2095_v1, %v5578_v40  ;;  %4370 = vmatpush3.bf16.msra.mxu0 %v4674_v38 }
 0xe5d   : > { %4371 = vmatprep.subr.bf16.mxu0 %v4675_v55 }
 0xe5e   : > { %v2103_v32 = vadd.f32 %v2099_v51, %v5584_v62 }
 0xe60   : > { %v2212_v54 = vpack.c.bf16 %v2104_v59, %v2103_v32  ;;  %4372 = vmatpush3.bf16.msra.mxu0 %v4675_v55 }
 0xe61   : > { %4377 = vmatprep.subr.bf16.mxu0 %v4962_v15 }
 0xe62   : > { %2338 = vmatmul.mubr.bf16.vlgmr.msra.gmra.mrb[48].mxu1 %v2212_v54 }
 0xe63   : > { %2347 = vmatprep.mubr.bf16.mxu1 %v4961_v43 }
 0xece   : > { %v2020_v56 = vpop.xlane.xlu0 %2019 }
 0xecf   : > { %v2025_v57 = vmul.f32 0.0078125, %v2020_v56 }
 0xed0   : > { %v2022_v58 = vpop.xlane.xlu1 %2021 }
 0xed1   : > { %v2026_v61 = vmul.f32 0.0078125, %v2022_v58  ;;  %v2029_v0 = vadd.f32 1e-05, %v2025_v57 }
 0xed2   : > { %v2016_v2 = vpop.xlane.xlu0 %2015 }
 0xed3   : > { %v2030_v3 = vadd.f32 1e-05, %v2026_v61  ;;  %v2023_v50 = vmul.f32 0.0078125, %v2016_v2  ;;  %v4003_v2 = vld [vmem:[%s5114_s20 + $0x4] ss:$0 sm:$0xff] }
 0xed5   : > { %4800 = vrsqrt.f32 %v2030_v3  ;;  %v2027_v21 = vadd.f32 1e-05, %v2023_v50 }
 0xed6   : > { %4802 = vrsqrt.f32 %v2029_v0  ;;  %v2018_v19 = vpop.xlane.xlu1 %2017 }
 0xed7   : > { %4804 = vrsqrt.f32 %v2027_v21  ;;  %v2024_v52 = vmul.f32 0.0078125, %v2018_v19 }
 0xed9   : > { %v2028_v6 = vadd.f32 1e-05, %v2024_v52 }
 0xeda   : > { %v2082_v12 = vpop.xlane.xlu1 %2081  ;;  %v2080_v48 = vpop.xlane.xlu0 %2079 }
 0xedb   : > { %4806 = vrsqrt.f32 %v2028_v6  ;;  %v2086_v8 = vmul.f32 0.0078125, %v2082_v12  ;;  %v2085_v49 = vmul.f32 0.0078125, %v2080_v48 }
 0xedd   : > { %v2090_v34 = vadd.f32 1e-05, %v2086_v8  ;;  %v2089_v36 = vadd.f32 1e-05, %v2085_v49 }
 0xedf   : > { %v4801_v10 = vpop.eup %4800  ;;  %4808 = vrsqrt.f32 %v2090_v34 }
 0xee0   : > { %v4803_v13 = vpop.eup %4802  ;;  %4810 = vrsqrt.f32 %v2089_v36  ;;  %v2038_v17 = vmul.f32 %v4801_v10, %v5548_v5 }
 0xee1   : > { %v4805_v16 = vpop.eup %4804  ;;  %v2037_v22 = vmul.f32 %v4803_v13, %v5545_v4 }
 0xee2   : > { %v2035_v14 = vmul.f32 %v4805_v16, %v5553_v45  ;;  %v2046_v26 = vmul.f32 %v5578_v40, %v2038_v17 }
 0xee3   : > { %v2045_v31 = vmul.f32 %v5578_v40, %v2037_v22 }
 0xee4   : > { %v2043_v29 = vmul.f32 %v5578_v40, %v2035_v14  ;;  %v2054_v41 = vadd.f32 %v5584_v62, %v2046_v26 }
 0xee5   : > { %v4807_v24 = vpop.eup %4806  ;;  %v2053_v44 = vadd.f32 %v5584_v62, %v2045_v31  ;;  %v5660_v31 = vld [vmem:[%s5986_s3 + $0x8] sm:$0xff] }
 0xee6   : > { %v2036_v28 = vmul.f32 %v4807_v24, %v5563_v7  ;;  %v2051_v5 = vadd.f32 %v5584_v62, %v2043_v29 }
 0xee7   : > { %v2108_v1 = vpack.c.bf16 %v2054_v41, %v2053_v44  ;;  %v5669_v44 = vld [vmem:[%s5986_s3 + $0x10] sm:$0xff] }
 0xee8   : > { %v2044_v33 = vmul.f32 %v5578_v40, %v2036_v28  ;;  %v5655_v28 = vld [vmem:[%s5986_s3] sm:$0xff] }
 0xee9   : > { %v4809_v35 = vpop.eup %4808 }
 0xeea   : > { %v4811_v42 = vpop.eup %4810  ;;  %v2052_v45 = vadd.f32 %v5584_v62, %v2044_v33  ;;  %v2098_v4 = vmul.f32 %v4809_v35, %v5560_v37 }
 0xeeb   : > { %v2097_v7 = vmul.f32 %v4811_v42, %v5568_v20  ;;  %v493_v20 = vld [vmem:[%s5114_s20 + $0x5] sm:$0x3] }
 0xeec   : > { %v2107_v9 = vpack.c.bf16 %v2052_v45, %v2051_v5  ;;  %v2102_v46 = vmul.f32 %v2098_v4, %v5578_v40  ;;  %v2218_v32 = vrot.slane %v493_v20, %v5199_v63 }
 0xeed   : > { %v2101_v47 = vmul.f32 %v2097_v7, %v5578_v40  ;;  %v2222_v40 = vrot.slane %v493_v20, %v5216_v23 }
 0xeee   : > { %4373 = vmatprep.mubr.bf16.mxu0 %v2107_v9  ;;  %v2106_v60 = vadd.f32 %v2102_v46, %v5584_v62  ;;  %v5674_v9 = vld [vmem:[%s5986_s3 + $0x18] sm:$0xff] }
 0xeef   : > { %4374 = vmatmul.mubr.bf16.vlgmr.msra.gmra.mrb[32].mxu0 %v2108_v1  ;;  %v2105_v51 = vadd.f32 %v2101_v47, %v5584_v62 }
 0xef0   : > { %4379 = vmatprep.mubr.msk.bf16.mxu0 %vm4963_vm0, %v4962_v15 }
 0xef1   : > { %v2213_v37 = vpack.c.bf16 %v2106_v60, %v2105_v51 }
 0xef3   : > { %2348 = vmatmul.mubr.bf16.gmra.mrb[52].mxu1 %v2213_v37 }
 0xef4   : > { %4409 = vmatprep.mubr.msk.bf16.mxu1 %vm4963_vm0, %v4962_v15 }
 0xf35   : > { %v2339_v59 = vpop.f32.mrb[48].mxu1 }
 0xf36   : > { %v2341_v53 = vpop.f32.mrb[49].mxu1  ;;  %v2340_v11 = vadd.f32 %v2339_v59, %v2218_v32 }
 0xf37   : > { %v2343_v54 = vpop.f32.mrb[50].mxu1  ;;  %v2342_v55 = vadd.f32 %v2341_v53, %v2222_v40 }
 0xf38   : > { %v2344_v38 = vadd.f32 %v2343_v54, %v2218_v32  ;;  %v2345_v62 = vpop.f32.mrb[51].mxu1 }
 0xf39   : > { %v2346_v56 = vadd.f32 %v2345_v62, %v2222_v40 }
 0xf3a   : > { %v5623_v57 = vpack.c.bf16 %v2344_v38, %v2340_v11 }
 0xf3b   : > { %v5625_v58 = vpack.c.bf16 %v2346_v56, %v2342_v55 }
 0xf3c   : > { %v2366_v61 = vsel %vm860_vm1, %v5623_v57, 0 }
 0xf3d   : > { %4378 = vmatpush3.bf16.xpose.msra.mxu0 %v2366_v61 }
 0xf3e   : > { %4383 = vmatprep.subr.bf16.mxu0 %v4962_v15 }
 0xfc2   : > { %v4375_v0 = vpop.f32.mrb[32].mxu0 }
 0xfc3   : > { %v2197_v3 = vpop.f32.mrb[33].mxu0  ;;  %v2206_v21 = vadd.f32 %v4375_v0, %v4003_v2 }
 0xfc4   : > { %v4376_v50 = vpop.f32.mrb[34].mxu0  ;;  %v2198_v6 = vadd.f32 %v4003_v2, %v2197_v3 }
 0xfc5   : > { %v2209_v19 = vadd.f32 %v4376_v50, %v4003_v2  ;;  %v2200_v52 = vpop.f32.mrb[35].mxu0 }
 0xfc6   : > { %v2201_v12 = vadd.f32 %v4003_v2, %v2200_v52  ;;  %v2349_v48 = vpop.f32.mrb[52].mxu1 }
 0xfc7   : > { %v5631_v8 = vpack.c.bf16 %v2209_v19, %v2206_v21  ;;  %v2351_v49 = vpop.f32.mrb[53].mxu1  ;;  %v2350_v10 = vadd.f32 %v2349_v48, %v2218_v32 }
 0xfc8   : > { %v5633_v34 = vpack.c.bf16 %v2201_v12, %v2198_v6  ;;  %v2353_v36 = vpop.f32.mrb[54].mxu1  ;;  %v2352_v17 = vadd.f32 %v2351_v49, %v2222_v40 }
 0xfc9   : > { %v2354_v13 = vadd.f32 %v2353_v36, %v2218_v32  ;;  %v2355_v16 = vpop.f32.mrb[55].mxu1 }
 0xfca   : > { %v2356_v14 = vadd.f32 %v2355_v16, %v2222_v40  ;;  %4380 = vmatmul.mubr.msk.bf16.vlgmr.msra.gmra.mrb[36].mxu0 %vm860_vm1, %v5633_v34 }
 0xfcb   : > { %v5637_v22 = vpack.c.bf16 %v2354_v13, %v2350_v10  ;;  %4385 = vmatprep.mubr.msk.bf16.mxu0 %vm4963_vm0, %v4962_v15 }
 0xfcc   : > { %v5641_v24 = vpack.c.bf16 %v2356_v14, %v2352_v17 }
 0xfcd   : > { %v2413_v26 = vsel %vm860_vm1, %v5637_v22, 0 }
 0xfce   : > { %4384 = vmatpush3.bf16.xpose.msra.mxu0 %v2413_v26 }
 0xfcf   : > { %4389 = vmatprep.subr.bf16.mxu0 %v4962_v15 }
 0xfd5   : > { %4386 = vmatmul.mubr.msk.bf16.vlgmr.msra.gmra.mrb[40].mxu0 %vm860_vm1, %v5631_v8 }
 0xfd6   : > { %4390 = vmatpush3.bf16.msra.mxu0 %v5625_v58  ;;  %4391 = vmatprep.mubr.msk.bf16.mxu0 %vm4963_vm0, %v4962_v15 }
 0xfd7   : > { %4395 = vmatprep.subr.bf16.mxu0 %v4962_v15 }
0x109d   : > { %v2402_v29 = vpop.f32.mrb[36].mxu0 }
0x109e   : > { %v2403_v33 = vadd.f32 %v2402_v29, %v5655_v28  ;;  %v4381_v35 = vpop.f32.mrb[37].mxu0 }
0x109f   : > { %v2405_v41 = vpop.f32.mrb[38].mxu0 }
0x10a0   : > { %v2406_v42 = vadd.f32 %v2405_v41, %v5660_v31  ;;  %v4382_v5 = vpop.f32.mrb[39].mxu0  ;;  %v2456_v45 = vsel %vm955_vm2, %v2403_v33, -inf }
0x10a1   : > { %2457 = vmax.xlane.f32.xlu0 %v2456_v45 }
0x10a2   : > { %v2459_v4 = vsel %vm955_vm2, %v2406_v42, -inf }
0x10a3   : > { %2460 = vmax.xlane.f32.xlu1 %v2459_v4 }
0x10a8   : > { %v2449_v7 = vpop.f32.mrb[40].mxu0 }
0x10a9   : > { %v2450_v46 = vadd.f32 %v2449_v7, %v5669_v44  ;;  %v4387_v1 = vpop.f32.mrb[41].mxu0 }
0x10aa   : > { %v2452_v47 = vpop.f32.mrb[42].mxu0 }
0x10ab   : > { %v2453_v60 = vadd.f32 %v2452_v47, %v5674_v9  ;;  %v4388_v51 = vpop.f32.mrb[43].mxu0  ;;  %v2462_v37 = vsel %vm955_vm2, %v2450_v46, -inf }
0x10ac   : > { %2463 = vmax.xlane.f32.xlu0 %v2462_v37 }
0x10ad   : > { %v2465_v20 = vsel %vm955_vm2, %v2453_v60, -inf }
0x10ae   : > { %2466 = vmax.xlane.f32.xlu1 %v2465_v20 }
0x112e   : > { %v2458_v32 = vpop.xlane.xlu0 %2457 }
0x112f   : > { %v2468_v59 = vsub.f32 %v2403_v33, %v2458_v32 }
0x1130   : > { %v2461_v40 = vpop.xlane.xlu1 %2460 }
0x1131   : > { %v2472_v53 = vmul.f32 1.442695, %v2468_v59  ;;  %v2469_v54 = vsub.f32 %v2406_v42, %v2461_v40 }
0x1133   : > { %4812 = vpow2.f32 %v2472_v53  ;;  %v2474_v11 = vmul.f32 1.442695, %v2469_v54 }
0x1135   : > { %4814 = vpow2.f32 %v2474_v11 }
0x1139   : > { %v2464_v38 = vpop.xlane.xlu0 %2463 }
0x113a   : > { %v2470_v62 = vsub.f32 %v2450_v46, %v2464_v38 }
0x113b   : > { %v2467_v21 = vpop.xlane.xlu1 %2466 }
0x113c   : > { %v2476_v55 = vmul.f32 1.442695, %v2470_v62  ;;  %v2471_v19 = vsub.f32 %v2453_v60, %v2467_v21 }
0x113d   : > { %v4813_v56 = vpop.eup %4812 }
0x113e   : > { %4816 = vpow2.f32 %v2476_v55  ;;  %v2480_v61 = vsel %vm955_vm2, %v4813_v56, 0.0  ;;  %v2478_v52 = vmul.f32 1.442695, %v2471_v19 }
0x113f   : > { %v4815_v0 = vpop.eup %4814  ;;  %2481 = vadd.xlane.f32.xlu0 %v2480_v61 }
0x1140   : > { %v2483_v2 = vsel %vm955_vm2, %v4815_v0, 0.0  ;;  %4818 = vpow2.f32 %v2478_v52 }
0x1141   : > { %2484 = vadd.xlane.f32.xlu1 %v2483_v2 }
0x1148   : > { %v4817_v3 = vpop.eup %4816 }
0x1149   : > { %v2486_v50 = vsel %vm955_vm2, %v4817_v3, 0.0 }
0x114a   : > { %2487 = vadd.xlane.f32.xlu0 %v2486_v50  ;;  %v4819_v6 = vpop.eup %4818 }
0x114b   : > { %v2489_v12 = vsel %vm955_vm2, %v4819_v6, 0.0 }
0x1152   : > { %2649 = vrot.lane.b32.xlu1 %v5637_v22, %s4964_s18 }
0x1160   : > { %2596 = vrot.lane.b32.xlu0 %v5623_v57, %s4964_s18 }
0x1176   : > { %2490 = vadd.xlane.f32.xlu1 %v2489_v12 }
0x1187   : > { %2593 = vrot.lane.b32.xlu1 %v5633_v34, %s4964_s18 }
0x118b   : > { %2646 = vrot.lane.b32.xlu1 %v5631_v8, %s4964_s18 }
0x11cc   : > { %v2482_v48 = vpop.xlane.xlu0 %2481 }
0x11cd   : > { %4820 = vrcp.f32 %v2482_v48 }
0x11ce   : > { %v2485_v49 = vpop.xlane.xlu1 %2484 }
0x11cf   : > { %4822 = vrcp.f32 %v2485_v49 }
0x11d2   : > { %v2650_v36 = vpop.permute.xlu1 %2649 }
0x11d3   : > { %v2655_v10 = vsel %vm860_vm1, %v2650_v36, 0 }
0x11d4   : > { %4408 = vmatpush3.bf16.xpose.msra.mxu1 %v2655_v10 }
0x11d5   : > { %4419 = vmatprep.subr.bf16.mxu1 %v4962_v15 }
0x11d7   : > { %v4821_v13 = vpop.eup %4820  ;;  %v2488_v29 = vpop.xlane.xlu0 %2487 }
0x11d8   : > { %v2493_v17 = vmul.f32 %v4821_v13, %v4813_v56  ;;  %4824 = vrcp.f32 %v2488_v29 }
0x11d9   : > { %v4823_v16 = vpop.eup %4822 }
0x11da   : > { %v2495_v14 = vmul.f32 %v4823_v16, %v4815_v0 }
0x11db   : > { %v2597_v7 = vpop.permute.xlu0 %2596 }
0x11dc   : > { %v2500_v26 = vpack.c.bf16 %v2495_v14, %v2493_v17  ;;  %v2602_v1 = vsel %vm860_vm1, %v2597_v7, 0 }
0x11de   : > { %4392 = vmatmul.mubr.msk.bf16.vlgmr.msra.gmra.mrb[44].mxu0 %vm955_vm2, %v2500_v26 }
0x11df   : > { %4396 = vmatpush3.bf16.msra.mxu0 %v5641_v24  ;;  %4397 = vmatprep.mubr.msk.bf16.mxu0 %vm4963_vm0, %v4962_v15 }
0x11e0   : > { %4401 = vmatprep.subr.bf16.mxu0 %v4962_v15 }
0x11e2   : > { %v4825_v42 = vpop.eup %4824 }
0x11e3   : > { %v2497_v45 = vmul.f32 %v4825_v42, %v4817_v3 }
0x1203   : > { %v2491_v33 = vpop.xlane.xlu1 %2490 }
0x1204   : > { %4826 = vrcp.f32 %v2491_v33 }
0x1207   : > { %v2594_v35 = vpop.permute.xlu1 %2593 }
0x120b   : > { %v2647_v41 = vpop.permute.xlu1 %2646 }
0x120c   : > { %4410 = vmatmul.mubr.msk.bf16.vlgmr.msra.gmra.mrb[56].mxu1 %vm860_vm1, %v2647_v41 }
0x120d   : > { %4421 = vmatprep.mubr.msk.bf16.mxu1 %vm4963_vm0, %v4962_v15 }
0x120e   : > { %v4827_v5 = vpop.eup %4826 }
0x120f   : > { %v2499_v4 = vmul.f32 %v4827_v5, %v4819_v6 }
0x1211   : > { %v2501_v46 = vpack.c.bf16 %v2499_v4, %v2497_v45 }
0x1213   : > { %4398 = vmatmul.mubr.msk.bf16.vlgmr.msra.gmra.mrb[48].mxu0 %vm955_vm2, %v2501_v46 }
0x1214   : > { %4402 = vmatpush3.bf16.xpose.msra.mxu0 %v2602_v1  ;;  %4403 = vmatprep.mubr.msk.bf16.mxu0 %vm4963_vm0, %v4962_v15 }
0x1215   : > { %4413 = vmatprep.subr.bf16.mxu0 %v4962_v15 }
0x121b   : > { %4404 = vmatmul.mubr.msk.bf16.vlgmr.msra.gmra.mrb[52].mxu0 %vm860_vm1, %v2594_v35 }
0x121c   : > { %4415 = vmatprep.mubr.msk.bf16.mxu0 %vm4963_vm0, %v4962_v15 }
0x12b1   : > { %v5710_v47 = vpop.f32.mrb[44].mxu0 }
0x12b2   : > { %v4393_v60 = vpop.f32.mrb[45].mxu0 }
0x12b3   : > { %v5712_v51 = vpop.f32.mrb[46].mxu0 }
0x12b4   : > { %v4394_v37 = vpop.f32.mrb[47].mxu0 }
0x12df   : > { %v2691_v20 = vpop.f32.mrb[56].mxu1 }
0x12e0   : > { %v4411_v32 = vpop.f32.mrb[57].mxu1  ;;  %v2692_v0 = vadd.f32 %v2691_v20, %v5669_v44 }
0x12e1   : > { %v2694_v59 = vpop.f32.mrb[58].mxu1 }
0x12e2   : > { %v4412_v40 = vpop.f32.mrb[59].mxu1  ;;  %v2695_v19 = vadd.f32 %v2694_v59, %v5674_v9  ;;  %v2704_v52 = vsel %vm955_vm2, %v2692_v0, -inf }
0x12e4   : > { %v2707_v6 = vsel %vm955_vm2, %v2695_v19, -inf }
0x12e6   : > { %v5714_v53 = vpop.f32.mrb[48].mxu0 }
0x12e7   : > { %v4399_v54 = vpop.f32.mrb[49].mxu0 }
0x12e8   : > { %v5716_v11 = vpop.f32.mrb[50].mxu0 }
0x12e9   : > { %v4400_v38 = vpop.f32.mrb[51].mxu0 }
0x12ee   : > { %v2638_v62 = vpop.f32.mrb[52].mxu0 }
0x12ef   : > { %v2639_v55 = vadd.f32 %v2638_v62, %v5655_v28  ;;  %v4405_v56 = vpop.f32.mrb[53].mxu0 }
0x12f0   : > { %v2641_v61 = vpop.f32.mrb[54].mxu0 }
0x12f1   : > { %v2642_v2 = vadd.f32 %v2641_v61, %v5660_v31  ;;  %v4406_v3 = vpop.f32.mrb[55].mxu0  ;;  %v2698_v50 = vsel %vm955_vm2, %v2639_v55, -inf }
0x12f2   : > { %2699 = vmax.xlane.f32.xlu0 %v2698_v50 }
0x12f3   : > { %v2701_v21 = vsel %vm955_vm2, %v2642_v2, -inf }
0x12f4   : > { %2702 = vmax.xlane.f32.xlu1 %v2701_v21 }
0x12f6   : > { %2705 = vmax.xlane.f32.xlu0 %v2704_v52 }
0x12fa   : > { %2708 = vmax.xlane.f32.xlu0 %v2707_v6 }
0x137f   : > { %v2700_v12 = vpop.xlane.xlu0 %2699 }
0x1380   : > { %v2710_v48 = vsub.f32 %v2639_v55, %v2700_v12 }
0x1381   : > { %v2703_v5 = vpop.xlane.xlu1 %2702 }
0x1382   : > { %v2714_v10 = vmul.f32 1.442695, %v2710_v48  ;;  %v2711_v45 = vsub.f32 %v2642_v2, %v2703_v5 }
0x1383   : > { %v2706_v49 = vpop.xlane.xlu0 %2705 }
0x1384   : > { %v2712_v36 = vsub.f32 %v2692_v0, %v2706_v49  ;;  %v2716_v4 = vmul.f32 1.442695, %v2711_v45 }
0x1386   : > { %v2718_v13 = vmul.f32 1.442695, %v2712_v36 }
0x1387   : > { %v2709_v16 = vpop.xlane.xlu0 %2708 }
0x1388   : > { %4828 = vpow2.f32 %v2718_v13  ;;  %v2713_v17 = vsub.f32 %v2695_v19, %v2709_v16 }
0x1389   : > { %4830 = vpow2.f32 %v2714_v10 }
0x138a   : > { %v2720_v14 = vmul.f32 1.442695, %v2713_v17 }
0x138c   : > { %4832 = vpow2.f32 %v2720_v14 }
0x138d   : > { %4834 = vpow2.f32 %v2716_v4 }
0x1392   : > { %v4829_v26 = vpop.eup %4828 }
0x1393   : > { %v2728_v29 = vsel %vm955_vm2, %v4829_v26, 0.0  ;;  %v4831_v33 = vpop.eup %4830 }
0x1394   : > { %2729 = vadd.xlane.f32.xlu0 %v2728_v29  ;;  %v2722_v41 = vsel %vm955_vm2, %v4831_v33, 0.0 }
0x1396   : > { %v4833_v35 = vpop.eup %4832 }
0x1397   : > { %v2731_v42 = vsel %vm955_vm2, %v4833_v35, 0.0  ;;  %v4835_v7 = vpop.eup %4834 }
0x1398   : > { %2723 = vadd.xlane.f32.xlu0 %v2722_v41  ;;  %2732 = vadd.xlane.f32.xlu1 %v2731_v42  ;;  %v2725_v46 = vsel %vm955_vm2, %v4835_v7, 0.0 }
0x13a9   : > { %2793 = vrot.lane.b32.xlu1 %v5641_v24, %s4964_s18 }
0x13ad   : > { %2842 = vrot.lane.b32.xlu1 %v5623_v57, %s4965_s23 }
0x13ae   : > { %2745 = vrot.lane.b32.xlu0 %v5625_v58, %s4964_s18 }
0x13b2   : > { %2840 = vrot.lane.b32.xlu0 %v5633_v34, %s4965_s23 }
0x13d1   : > { %2726 = vadd.xlane.f32.xlu1 %v2725_v46 }
0x13e2   : > { %2893 = vrot.lane.b32.xlu1 %v5637_v22, %s4965_s23 }
0x13e6   : > { %2891 = vrot.lane.b32.xlu1 %v5631_v8, %s4965_s23 }
0x1421   : > { %v2730_v1 = vpop.xlane.xlu0 %2729 }
0x1422   : > { %4836 = vrcp.f32 %v2730_v1 }
0x1425   : > { %v2724_v60 = vpop.xlane.xlu0 %2723  ;;  %v2733_v37 = vpop.xlane.xlu1 %2732 }
0x1426   : > { %4838 = vrcp.f32 %v2733_v37 }
0x1427   : > { %4840 = vrcp.f32 %v2724_v60 }
0x1429   : > { %v2746_v20 = vpop.permute.xlu0 %2745  ;;  %v2794_v32 = vpop.permute.xlu1 %2793 }
0x142a   : > { %4414 = vmatpush3.bf16.msra.mxu0 %v2746_v20  ;;  %4420 = vmatpush3.bf16.msra.mxu1 %v2794_v32 }
0x142b   : > { %4431 = vmatprep.subr.bf16.mxu1 %v4962_v15  ;;  %4425 = vmatprep.subr.bf16.mxu0 %v4962_v15 }
0x142c   : > { %v4837_v59 = vpop.eup %4836 }
0x142d   : > { %v2739_v54 = vmul.f32 %v4837_v59, %v4829_v26  ;;  %v2843_v55 = vpop.permute.xlu1 %2842  ;;  %v2841_v12 = vpop.permute.xlu0 %2840 }
0x142e   : > { %v2848_v6 = vsel %vm860_vm1, %v2843_v55, 0 }
0x1430   : > { %v4839_v40 = vpop.eup %4838 }
0x1431   : > { %v2741_v38 = vmul.f32 %v4839_v40, %v4833_v35  ;;  %v4841_v2 = vpop.eup %4840 }
0x1432   : > { %v2735_v50 = vmul.f32 %v4841_v2, %v4831_v33 }
0x1433   : > { %v2743_v62 = vpack.c.bf16 %v2741_v38, %v2739_v54 }
0x1435   : > { %4422 = vmatmul.mubr.msk.bf16.vlgmr.msra.gmra.mrb[60].mxu1 %vm955_vm2, %v2743_v62 }
0x1436   : > { %4433 = vmatprep.mubr.msk.bf16.mxu1 %vm4963_vm0, %v4962_v15 }
0x145e   : > { %v2727_v56 = vpop.xlane.xlu1 %2726 }
0x145f   : > { %4842 = vrcp.f32 %v2727_v56 }
0x1462   : > { %v2894_v61 = vpop.permute.xlu1 %2893 }
0x1463   : > { %v2899_v0 = vsel %vm860_vm1, %v2894_v61, 0 }
0x1464   : > { %4432 = vmatpush3.bf16.xpose.msra.mxu1 %v2899_v0 }
0x1465   : > { %4443 = vmatprep.subr.bf16.mxu1 %v4962_v15 }
0x1466   : > { %v2892_v19 = vpop.permute.xlu1 %2891 }
0x1469   : > { %v4843_v3 = vpop.eup %4842 }
0x146a   : > { %v2737_v21 = vmul.f32 %v4843_v3, %v4835_v7 }
0x146b   : > { %4434 = vmatmul.mubr.msk.bf16.vlgmr.msra.gmra.mrb[64].mxu1 %vm860_vm1, %v2892_v19 }
0x146c   : > { %v2742_v52 = vpack.c.bf16 %v2737_v21, %v2735_v50  ;;  %4445 = vmatprep.mubr.msk.bf16.mxu1 %vm4963_vm0, %v4962_v15 }
0x146e   : > { %4416 = vmatmul.mubr.msk.bf16.vlgmr.msra.gmra.mrb[56].mxu0 %vm955_vm2, %v2742_v52 }
0x146f   : > { %4426 = vmatpush3.bf16.xpose.msra.mxu0 %v2848_v6  ;;  %4427 = vmatprep.mubr.msk.bf16.mxu0 %vm4963_vm0, %v4962_v15 }
0x1470   : > { %4437 = vmatprep.subr.bf16.mxu0 %v4962_v15 }
0x1476   : > { %4428 = vmatmul.mubr.msk.bf16.vlgmr.msra.gmra.mrb[60].mxu0 %vm860_vm1, %v2841_v12 }
0x1477   : > { %4439 = vmatprep.mubr.msk.bf16.mxu0 %vm4963_vm0, %v4962_v15 }
0x1508   : > { %v5760_v48 = vpop.f32.mrb[60].mxu1 }
0x1509   : > { %v4423_v49 = vpop.f32.mrb[61].mxu1 }
0x150a   : > { %v5762_v36 = vpop.f32.mrb[62].mxu1 }
0x150b   : > { %v4579_v10 = vpack.i.bf16 %v5762_v36, %v5760_v48  ;;  %v4424_v13 = vpop.f32.mrb[63].mxu1 }
0x153e   : > { %v2935_v16 = vpop.f32.mrb[64].mxu1 }
0x153f   : > { %v4435_v17 = vpop.f32.mrb[65].mxu1  ;;  %v2936_v46 = vadd.f32 %v2935_v16, %v5669_v44 }
0x1540   : > { %v2938_v14 = vpop.f32.mrb[66].mxu1 }
0x1541   : > { %v5766_v26 = vpop.f32.mrb[56].mxu0  ;;  %v4436_v29 = vpop.f32.mrb[67].mxu1  ;;  %v2939_v32 = vadd.f32 %v2938_v14, %v5674_v9  ;;  %v2948_v59 = vsel %vm955_vm2, %v2936_v46, -inf }
0x1542   : > { %v4417_v33 = vpop.f32.mrb[57].mxu0 }
0x1543   : > { %v5768_v35 = vpop.f32.mrb[58].mxu0  ;;  %v2951_v40 = vsel %vm955_vm2, %v2939_v32, -inf }
0x1544   : > { %v4574_v41 = vpack.i.bf16 %v5768_v35, %v5766_v26  ;;  %v4418_v42 = vpop.f32.mrb[59].mxu0 }
0x1549   : > { %v2884_v5 = vpop.f32.mrb[60].mxu0 }
0x154a   : > { %v2885_v45 = vadd.f32 %v2884_v5, %v5655_v28  ;;  %v4429_v4 = vpop.f32.mrb[61].mxu0 }
0x154b   : > { %v2887_v7 = vpop.f32.mrb[62].mxu0 }
0x154c   : > { %v2888_v1 = vadd.f32 %v2887_v7, %v5660_v31  ;;  %v4430_v60 = vpop.f32.mrb[63].mxu0  ;;  %v2942_v37 = vsel %vm955_vm2, %v2885_v45, -inf }
0x154d   : > { %2943 = vmax.xlane.f32.xlu0 %v2942_v37 }
0x154e   : > { %v2945_v20 = vsel %vm955_vm2, %v2888_v1, -inf }
0x154f   : > { %2946 = vmax.xlane.f32.xlu1 %v2945_v20 }
0x1551   : > { %2949 = vmax.xlane.f32.xlu0 %v2948_v59 }
0x1555   : > { %2952 = vmax.xlane.f32.xlu0 %v2951_v40 }
0x15da   : > { %v2944_v54 = vpop.xlane.xlu0 %2943 }
0x15db   : > { %v2954_v38 = vsub.f32 %v2885_v45, %v2944_v54 }
0x15dc   : > { %v2947_v49 = vpop.xlane.xlu1 %2946 }
0x15dd   : > { %v2958_v56 = vmul.f32 1.442695, %v2954_v38  ;;  %v2955_v13 = vsub.f32 %v2888_v1, %v2947_v49 }
0x15de   : > { %v2950_v62 = vpop.xlane.xlu0 %2949 }
0x15df   : > { %v2956_v55 = vsub.f32 %v2936_v46, %v2950_v62  ;;  %v2960_v16 = vmul.f32 1.442695, %v2955_v13 }
0x15e1   : > { %v2962_v61 = vmul.f32 1.442695, %v2956_v55 }
0x15e2   : > { %v2953_v0 = vpop.xlane.xlu0 %2952 }
0x15e3   : > { %4844 = vpow2.f32 %v2962_v61  ;;  %v2957_v2 = vsub.f32 %v2939_v32, %v2953_v0 }
0x15e4   : > { %4846 = vpow2.f32 %v2958_v56 }
0x15e5   : > { %v2964_v3 = vmul.f32 1.442695, %v2957_v2 }
0x15e7   : > { %4848 = vpow2.f32 %v2964_v3 }
0x15e8   : > { %4850 = vpow2.f32 %v2960_v16 }
0x15ed   : > { %v4845_v50 = vpop.eup %4844 }
0x15ee   : > { %v2972_v21 = vsel %vm955_vm2, %v4845_v50, 0.0  ;;  %v4847_v19 = vpop.eup %4846 }
0x15ef   : > { %2973 = vadd.xlane.f32.xlu0 %v2972_v21  ;;  %v2966_v6 = vsel %vm955_vm2, %v4847_v19, 0.0 }
0x15f1   : > { %v4849_v52 = vpop.eup %4848 }
0x15f2   : > { %v2975_v12 = vsel %vm955_vm2, %v4849_v52, 0.0  ;;  %v4851_v17 = vpop.eup %4850 }
0x15f3   : > { %2967 = vadd.xlane.f32.xlu0 %v2966_v6  ;;  %2976 = vadd.xlane.f32.xlu1 %v2975_v12  ;;  %v2969_v14 = vsel %vm955_vm2, %v4851_v17, 0.0 }
0x1604   : > { %3035 = vrot.lane.b32.xlu1 %v5641_v24, %s4965_s23 }
0x1608   : > { %3084 = vrot.lane.b32.xlu1 %v5623_v57, %s4966_s30 }
0x1609   : > { %2988 = vrot.lane.b32.xlu0 %v5625_v58, %s4965_s23 }
0x160d   : > { %3082 = vrot.lane.b32.xlu0 %v5633_v34, %s4966_s30 }
0x162c   : > { %2970 = vadd.xlane.f32.xlu1 %v2969_v14 }
0x163d   : > { %3135 = vrot.lane.b32.xlu1 %v5637_v22, %s4966_s30 }
0x1641   : > { %3133 = vrot.lane.b32.xlu1 %v5631_v8, %s4966_s30 }
0x167c   : > { %v2974_v57 = vpop.xlane.xlu0 %2973 }
0x167d   : > { %4852 = vrcp.f32 %v2974_v57 }
0x1680   : > { %v2968_v29 = vpop.xlane.xlu0 %2967  ;;  %v2977_v33 = vpop.xlane.xlu1 %2976 }
0x1681   : > { %4854 = vrcp.f32 %v2977_v33 }
0x1682   : > { %4856 = vrcp.f32 %v2968_v29 }
0x1684   : > { %v2989_v34 = vpop.permute.xlu0 %2988  ;;  %v3036_v42 = vpop.permute.xlu1 %3035 }
0x1685   : > { %4438 = vmatpush3.bf16.msra.mxu0 %v2989_v34  ;;  %4444 = vmatpush3.bf16.msra.mxu1 %v3036_v42 }
0x1686   : > { %4455 = vmatprep.subr.bf16.mxu1 %v4962_v15  ;;  %4449 = vmatprep.subr.bf16.mxu0 %v4962_v15 }
0x1687   : > { %v4853_v5 = vpop.eup %4852 }
0x1688   : > { %v2983_v4 = vmul.f32 %v4853_v5, %v4845_v50  ;;  %v3085_v8 = vpop.permute.xlu1 %3084  ;;  %v3083_v62 = vpop.permute.xlu0 %3082 }
0x1689   : > { %v3090_v38 = vsel %vm860_vm1, %v3085_v8, 0 }
0x168b   : > { %v4855_v45 = vpop.eup %4854 }
0x168c   : > { %v2985_v22 = vmul.f32 %v4855_v45, %v4849_v52  ;;  %v4857_v37 = vpop.eup %4856 }
0x168d   : > { %v2979_v32 = vmul.f32 %v4857_v37, %v4847_v19 }
0x168e   : > { %v2987_v7 = vpack.c.bf16 %v2985_v22, %v2983_v4 }
0x1690   : > { %4446 = vmatmul.mubr.msk.bf16.vlgmr.msra.gmra.mrb[68].mxu1 %vm955_vm2, %v2987_v7 }
0x1691   : > { %4457 = vmatprep.mubr.msk.bf16.mxu1 %vm4963_vm0, %v4962_v15 }
0x16b9   : > { %v2971_v46 = vpop.xlane.xlu1 %2970 }
0x16ba   : > { %4858 = vrcp.f32 %v2971_v46 }
0x16bd   : > { %v3136_v1 = vpop.permute.xlu1 %3135 }
0x16be   : > { %v3141_v60 = vsel %vm860_vm1, %v3136_v1, 0 }
0x16bf   : > { %4456 = vmatpush3.bf16.xpose.msra.mxu1 %v3141_v60 }
0x16c0   : > { %4467 = vmatprep.subr.bf16.mxu1 %v4962_v15 }
0x16c1   : > { %v3134_v40 = vpop.permute.xlu1 %3133 }
0x16c4   : > { %v4859_v20 = vpop.eup %4858 }
0x16c5   : > { %v2981_v59 = vmul.f32 %v4859_v20, %v4851_v17 }
0x16c6   : > { %4458 = vmatmul.mubr.msk.bf16.vlgmr.msra.gmra.mrb[72].mxu1 %vm860_vm1, %v3134_v40 }
0x16c7   : > { %v2986_v54 = vpack.c.bf16 %v2981_v59, %v2979_v32  ;;  %4469 = vmatprep.mubr.msk.bf16.mxu1 %vm4963_vm0, %v4962_v15 }
0x16c9   : > { %4440 = vmatmul.mubr.msk.bf16.vlgmr.msra.gmra.mrb[64].mxu0 %vm955_vm2, %v2986_v54 }
0x16ca   : > { %4450 = vmatpush3.bf16.xpose.msra.mxu0 %v3090_v38  ;;  %4451 = vmatprep.mubr.msk.bf16.mxu0 %vm4963_vm0, %v4962_v15 }
0x16cb   : > { %4461 = vmatprep.subr.bf16.mxu0 %v4962_v15 }
0x16d1   : > { %4452 = vmatmul.mubr.msk.bf16.vlgmr.msra.gmra.mrb[68].mxu0 %vm860_vm1, %v3083_v62 }
0x16d2   : > { %4463 = vmatprep.mubr.msk.bf16.mxu0 %vm4963_vm0, %v4962_v15 }
0x1763   : > { %v5814_v55 = vpop.f32.mrb[68].mxu1 }
0x1764   : > { %v4447_v56 = vpop.f32.mrb[69].mxu1 }
0x1765   : > { %v3078_v61 = vpop.f32.mrb[70].mxu1 }
0x1766   : > { %v4589_v0 = vpack.i.bf16 %v3078_v61, %v5814_v55  ;;  %v4448_v2 = vpop.f32.mrb[71].mxu1 }
0x1799   : > { %v3177_v3 = vpop.f32.mrb[72].mxu1 }
0x179a   : > { %v4459_v50 = vpop.f32.mrb[73].mxu1  ;;  %v3178_v57 = vadd.f32 %v3177_v3, %v5669_v44 }
0x179b   : > { %v3180_v21 = vpop.f32.mrb[74].mxu1 }
0x179c   : > { %v3028_v19 = vpop.f32.mrb[64].mxu0  ;;  %v4460_v52 = vpop.f32.mrb[75].mxu1  ;;  %v3181_v5 = vadd.f32 %v3180_v21, %v5674_v9  ;;  %v3190_v45 = vsel %vm955_vm2, %v3178_v57, -inf }
0x179d   : > { %v4441_v6 = vpop.f32.mrb[65].mxu0 }
0x179e   : > { %v3031_v12 = vpop.f32.mrb[66].mxu0  ;;  %v4676_v6 = vld [vmem:[%s5098_s12 + $0x1c] ss:$40 sps:$4 sm:$0xff]  }
0x179f   : > { %v4584_v49 = vpack.i.bf16 %v3031_v12, %v3028_v19  ;;  %v4442_v13 = vpop.f32.mrb[67].mxu0  ;;  %v4677_v12 = vld [vmem:[%s5098_s12 + $0x6c] ss:$40 sps:$4 sm:$0xff]  }
0x17a0   : > { %v4679_v13 = vld [vmem:[%s5098_s12 + $0x10c] ss:$40 sps:$4 sm:$0xff]  }
0x17a4   : > { %v3126_v16 = vpop.f32.mrb[68].mxu0 }
0x17a5   : > { %v3127_v17 = vadd.f32 %v3126_v16, %v5655_v28  ;;  %v4453_v15 = vpop.f32.mrb[69].mxu0  ;;  %v3193_v28 = vsel %vm955_vm2, %v3181_v5, -inf  ;;  %v4680_v16 = vld [vmem:[%s5098_s12 + $0x15c] ss:$40 sps:$4 sm:$0xff]  }
0x17a6   : > { %v3129_v14 = vpop.f32.mrb[70].mxu0  ;;  %v4682_v15 = vld [vmem:[%s5098_s12 + $0x1fc] ss:$40 sps:$4 sm:$0xff]  }
0x17a7   : > { %v3130_v29 = vadd.f32 %v3129_v14, %v5660_v31  ;;  %v4454_v33 = vpop.f32.mrb[71].mxu0  ;;  %v3184_v34 = vsel %vm955_vm2, %v3127_v17, -inf  ;;  %v4683_v14 = vld [vmem:[%s5098_s12 + $0x24c] ss:$40 sps:$4 sm:$0xff]  }
0x17a8   : > { %3185 = vmax.xlane.f32.xlu0 %v3184_v34 }
0x17a9   : > { %v3187_v42 = vsel %vm955_vm2, %v3130_v29, -inf }
0x17aa   : > { %3188 = vmax.xlane.f32.xlu1 %v3187_v42 }
0x17ac   : > { %3191 = vmax.xlane.f32.xlu0 %v3190_v45 }
0x17b0   : > { %3194 = vmax.xlane.f32.xlu0 %v3193_v28 }
0x1835   : > { %v3186_v4 = vpop.xlane.xlu0 %3185 }
0x1836   : > { %v3196_v22 = vsub.f32 %v3127_v17, %v3186_v4  ;;  %v4681_v17 = vld [vmem:[%s5098_s12 + $0x1ac] ss:$40 sps:$4 sm:$0xff]  }
0x1837   : > { %v3189_v44 = vpop.xlane.xlu1 %3188 }
0x1838   : > { %v3200_v8 = vmul.f32 1.442695, %v3196_v22  ;;  %v3197_v46 = vsub.f32 %v3130_v29, %v3189_v44 }
0x1839   : > { %v3192_v7 = vpop.xlane.xlu0 %3191 }
0x183a   : > { %v3198_v31 = vsub.f32 %v3178_v57, %v3192_v7  ;;  %v3202_v20 = vmul.f32 1.442695, %v3197_v46 }
0x183c   : > { %v3204_v1 = vmul.f32 1.442695, %v3198_v31 }
0x183d   : > { %v3195_v60 = vpop.xlane.xlu0 %3194 }
0x183e   : > { %4860 = vpow2.f32 %v3204_v1  ;;  %v3199_v37 = vsub.f32 %v3181_v5, %v3195_v60 }
0x183f   : > { %4862 = vpow2.f32 %v3200_v8 }
0x1840   : > { %v3206_v9 = vmul.f32 1.442695, %v3199_v37 }
0x1842   : > { %4864 = vpow2.f32 %v3206_v9 }
0x1843   : > { %4866 = vpow2.f32 %v3202_v20 }
0x1848   : > { %v4861_v32 = vpop.eup %4860 }
0x1849   : > { %v3214_v59 = vsel %vm955_vm2, %v4861_v32, 0.0  ;;  %v4863_v40 = vpop.eup %4862 }
0x184a   : > { %3215 = vadd.xlane.f32.xlu0 %v3214_v59  ;;  %v3208_v38 = vsel %vm955_vm2, %v4863_v40, 0.0 }
0x184c   : > { %v4865_v54 = vpop.eup %4864 }
0x184d   : > { %v3217_v62 = vsel %vm955_vm2, %v4865_v54, 0.0  ;;  %v4867_v55 = vpop.eup %4866 }
0x184e   : > { %3209 = vadd.xlane.f32.xlu0 %v3208_v38  ;;  %3218 = vadd.xlane.f32.xlu1 %v3217_v62  ;;  %v3211_v56 = vsel %vm955_vm2, %v4867_v55, 0.0 }
0x1852   : > { %3212 = vadd.xlane.f32.xlu1 %v3211_v56 }
0x1863   : > { %3277 = vrot.lane.b32.xlu1 %v5641_v24, %s4966_s30 }
0x1864   : > { %3230 = vrot.lane.b32.xlu0 %v5625_v58, %s4966_s30 }
0x1867   : > { %4575 = vrot.lane.b32.xlu1 %v4574_v41, %s4966_s30 }
0x1868   : > { %4585 = vrot.lane.b32.xlu0 %v4584_v49, %s4965_s23  ;;  %v4678_v49 = vld [vmem:[%s5098_s12 + $0xbc] ss:$40 sps:$4 sm:$0xff]  }
0x186b   : > { %4580 = vrot.lane.b32.xlu1 %v4579_v10, %s4966_s30 }
0x186f   : > { %4590 = vrot.lane.b32.xlu1 %v4589_v0, %s4965_s23 }
0x18d7   : > { %v3216_v61 = vpop.xlane.xlu0 %3215 }
0x18d8   : > { %4868 = vrcp.f32 %v3216_v61 }
0x18db   : > { %v3210_v24 = vpop.xlane.xlu0 %3209  ;;  %v3219_v2 = vpop.xlane.xlu1 %3218 }
0x18dc   : > { %4870 = vrcp.f32 %v3219_v2 }
0x18dd   : > { %4872 = vrcp.f32 %v3210_v24 }
0x18df   : > { %v3231_v58 = vpop.permute.xlu0 %3230  ;;  %v3213_v3 = vpop.xlane.xlu1 %3212 }
0x18e0   : > { %4874 = vrcp.f32 %v3213_v3  ;;  %4462 = vmatpush3.bf16.msra.mxu0 %v3231_v58 }
0x18e1   : > { %4473 = vmatprep.subr.bf16.mxu0 %v4676_v6 }
0x18e2   : > { %v4869_v35 = vpop.eup %4868 }
0x18e3   : > { %v3278_v26 = vpop.permute.xlu1 %3277  ;;  %v3225_v36 = vmul.f32 %v4869_v35, %v4861_v32  ;;  %v4586_v9 = vpop.permute.xlu0 %4585 }
0x18e4   : > { %4468 = vmatpush3.bf16.msra.mxu1 %v3278_v26  ;;  %v4588_v24 = vunpack.i.h.bf16 %v4586_v9  ;;  %v4587_v2 = vunpack.i.l.bf16 %v4586_v9  ;;  %v4698_v9 = vld [vmem:[%s5098_s12 + $0x164] ss:$40 sps:$4 sm:$0xff]  }
0x18e6   : > { %v4871_v41 = vpop.eup %4870 }
0x18e7   : > { %v4873_v48 = vpop.eup %4872  ;;  %v3227_v10 = vmul.f32 %v4871_v41, %v4865_v54  ;;  %v4576_v44 = vpop.permute.xlu1 %4575 }
0x18e8   : > { %v3221_v21 = vmul.f32 %v4873_v48, %v4863_v40  ;;  %v4578_v1 = vunpack.i.h.bf16 %v4576_v44  ;;  %v4577_v60 = vunpack.i.l.bf16 %v4576_v44 }
0x18e9   : > { %v3229_v50 = vpack.c.bf16 %v3227_v10, %v3225_v36  ;;  %v4044_v10 = vld [vmem:[%s5114_s20 + $0x7] ss:$0 sm:$0xff] }
0x18ea   : > { %v4875_v0 = vpop.eup %4874  ;;  %v3373_v62 = vsel %vm860_vm1, %v5712_v51, %v4578_v1  ;;  %v4692_v1 = vld [vmem:[%s5098_s12 + $0xc4] ss:$40 sps:$4 sm:$0xff]  }
0x18eb   : > { %v3223_v19 = vmul.f32 %v4875_v0, %v4867_v55  ;;  %4470 = vmatmul.mubr.msk.bf16.vlgmr.msra.gmra.mrb[76].mxu1 %vm955_vm2, %v3229_v50  ;;  %v4581_v7 = vpop.permute.xlu1 %4580  ;;  %v3372_v55 = vsel %vm860_vm1, %v5710_v47, %v4577_v60  ;;  %v3377_v41 = vsel %vm1876_vm3, %v3373_v62, %v4588_v24  ;;  %v4690_v60 = vld [vmem:[%s5098_s12 + $0xc0] ss:$40 sps:$4 sm:$0xff]   ;;  %v4707_v62 = vld [vmem:[%s5098_s12 + $0x254] ss:$40 sps:$4 sm:$0xff]  }
0x18ec   : > { %3678 = vmatprep.mubr.bf16.mxu1 %v4961_v43  ;;  %v4583_v8 = vunpack.i.h.bf16 %v4581_v7  ;;  %v4582_v46 = vunpack.i.l.bf16 %v4581_v7  ;;  %v3376_v51 = vsel %vm1876_vm3, %v3372_v55, %v4587_v2  ;;  %v4705_v55 = vld [vmem:[%s5098_s12 + $0x250] ss:$40 sps:$4 sm:$0xff]   ;;  %v4710_v24 = vld [vmem:[%s5109_s16 + $0x48] sm:$0xff]  }
0x18ed   : > { %v3228_v52 = vpack.c.bf16 %v3223_v19, %v3221_v21  ;;  %v4711_v2 = vld [vmem:[%s5109_s16 + $0x8] sm:$0xff]  }
0x18ee   : > { %v3375_v59 = vsel %vm860_vm1, %v5716_v11, %v4583_v8  ;;  %v3374_v40 = vsel %vm860_vm1, %v5714_v53, %v4582_v46 }
0x18ef   : > { %4464 = vmatmul.mubr.msk.bf16.vlgmr.msra.gmra.mrb[72].mxu0 %vm955_vm2, %v3228_v52  ;;  %v4591_v31 = vpop.permute.xlu1 %4590 }
0x18f0   : > { %4474 = vmatpush3.bf16.msra.mxu0 %v4676_v6  ;;  %v4593_v37 = vunpack.i.h.bf16 %v4591_v31  ;;  %v4592_v20 = vunpack.i.l.bf16 %v4591_v31 }
0x18f1   : > { %4475 = vmatprep.subr.bf16.mxu0 %v4677_v12 }
0x18f2   : > { %v3378_v56 = vsel %vm1876_vm3, %v3374_v40, %v4592_v20  ;;  %v3379_v61 = vsel %vm1876_vm3, %v3375_v59, %v4593_v37  ;;  %v4695_v37 = vld [vmem:[%s5098_s12 + $0x114] ss:$40 sps:$4 sm:$0xff]   ;;  %v4693_v20 = vld [vmem:[%s5098_s12 + $0x110] ss:$40 sps:$4 sm:$0xff]  }
0x18f3   : > { %v4701_v59 = vld [vmem:[%s5098_s12 + $0x1b4] ss:$40 sps:$4 sm:$0xff]   ;;  %v4699_v40 = vld [vmem:[%s5098_s12 + $0x1b0] ss:$40 sps:$4 sm:$0xff]  }
0x18f4   : > { %4476 = vmatpush3.bf16.msra.mxu0 %v4677_v12 }
0x18f5   : > { %4477 = vmatprep.subr.bf16.mxu0 %v4678_v49 }
0x18f8   : > { %4478 = vmatpush3.bf16.msra.mxu0 %v4678_v49 }
0x18f9   : > { %4479 = vmatprep.subr.bf16.mxu0 %v4679_v13 }
0x18fc   : > { %4480 = vmatpush3.bf16.msra.mxu0 %v4679_v13 }
0x18fd   : > { %4481 = vmatprep.subr.bf16.mxu0 %v4680_v16 }
0x1900   : > { %4482 = vmatpush3.bf16.msra.mxu0 %v4680_v16 }
0x1901   : > { %4483 = vmatprep.subr.bf16.mxu0 %v4681_v17 }
0x1904   : > { %4484 = vmatpush3.bf16.msra.mxu0 %v4681_v17 }
0x1905   : > { %4485 = vmatprep.subr.bf16.mxu0 %v4682_v15 }
0x1908   : > { %4486 = vmatpush3.bf16.msra.mxu0 %v4682_v15 }
0x1909   : > { %4487 = vmatprep.subr.bf16.mxu0 %v4683_v14 }
0x190c   : > { %4488 = vmatpush3.bf16.msra.mxu0 %v4683_v14  ;;  %v4686_v14 = vld [vmem:[%s5098_s12 + $0x24] ss:$40 sps:$4 sm:$0xff]  }
0x190d   : > { %3646 = vmatprep.subr.bf16.mxu1 %v4686_v14 }
0x19be   : > { %v3317_v57 = vpop.f32.mrb[76].mxu1 }
0x19bf   : > { %v4471_v29 = vpop.f32.mrb[77].mxu1 }
0x19c0   : > { %v3320_v33 = vpop.f32.mrb[78].mxu1 }
0x19c1   : > { %v4599_v34 = vpack.i.bf16 %v3320_v33, %v3317_v57  ;;  %v4472_v42 = vpop.f32.mrb[79].mxu1  ;;  %v4689_v57 = vld [vmem:[%s5098_s12 + $0x74] ss:$40 sps:$4 sm:$0xff]  }
0x19c2   : > { %v3270_v5 = vpop.f32.mrb[72].mxu0 }
0x19c3   : > { %v4465_v45 = vpop.f32.mrb[73].mxu0  ;;  %4600 = vrot.lane.b32.xlu1 %v4599_v34, %s4964_s18 }
0x19c4   : > { %v3273_v28 = vpop.f32.mrb[74].mxu0 }
0x19c5   : > { %v4594_v4 = vpack.i.bf16 %v3273_v28, %v3270_v5  ;;  %v4466_v22 = vpop.f32.mrb[75].mxu0 }
0x19c7   : > { %4595 = vrot.lane.b32.xlu0 %v4594_v4, %s4964_s18 }
0x1a35   : > { %v4601_v32 = vpop.permute.xlu1 %4600 }
0x1a36   : > { %v4603_v54 = vunpack.i.h.bf16 %v4601_v32  ;;  %v4602_v38 = vunpack.i.l.bf16 %v4601_v32  ;;  %v4696_v32 = vld [vmem:[%s5098_s12 + $0x160] ss:$40 sps:$4 sm:$0xff]  }
0x1a38   : > { %v3382_v11 = vsel %vm1881_vm4, %v3378_v56, %v4602_v38  ;;  %v3383_v58 = vsel %vm1881_vm4, %v3379_v61, %v4603_v54  ;;  %v4704_v54 = vld [vmem:[%s5098_s12 + $0x204] ss:$40 sps:$4 sm:$0xff]   ;;  %v4702_v38 = vld [vmem:[%s5098_s12 + $0x200] ss:$40 sps:$4 sm:$0xff]  }
0x1a39   : > { %v4596_v53 = vpop.permute.xlu0 %4595  ;;  %v3385_v3 = vpack.c.bf16 %v3383_v58, %v3382_v11  ;;  %v4708_v56 = vld [vmem:[%s5109_s16 + $0x40] sm:$0xff]   ;;  %v4712_v11 = vld [vmem:[%s5109_s16 + $0x50] sm:$0xff]  }
0x1a3a   : > { %v4598_v26 = vunpack.i.h.bf16 %v4596_v53  ;;  %v4597_v35 = vunpack.i.l.bf16 %v4596_v53  ;;  %v4709_v61 = vld [vmem:[%s5109_s16] sm:$0xff]   ;;  %4193 = vmatprep.subr.bf16.mxu0 %v4708_v56  ;;  %v4713_v58 = vld [vmem:[%s5109_s16 + $0x10] sm:$0xff]   ;;  %v4714_v53 = vld [vmem:[%s5109_s16 + $0x58] sm:$0xff]  }
0x1a3c   : > { %v3380_v47 = vsel %vm1881_vm4, %v3376_v51, %v4597_v35  ;;  %v3381_v48 = vsel %vm1881_vm4, %v3377_v41, %v4598_v26  ;;  %v4716_v26 = vld [vmem:[%s5109_s16 + $0x60] sm:$0xff]   ;;  %v4718_v51 = vld [vmem:[%s5109_s16 + $0x68] sm:$0xff]  }
0x1a3d   : > { %v3384_v36 = vpack.c.bf16 %v3381_v48, %v3380_v47  ;;  %v4717_v35 = vld [vmem:[%s5109_s16 + $0x20] sm:$0xff]  }
0x1a3f   : > { %4489 = vmatprep.mubr.bf16.mxu0 %v3384_v36 }
0x1a40   : > { %4490 = vmatmul.mubr.bf16.vlgmr.msra.gmra.mrb[76].mxu0 %v3385_v3  ;;  %v4715_v3 = vld [vmem:[%s5109_s16 + $0x18] sm:$0xff]  }
0x1a41   : > { %4194 = vmatpush3.bf16.msra.mxu0 %v4709_v61 }
0x1a42   : > { %4195 = vmatprep.subr.bf16.mxu0 %v4710_v24 }
0x1a45   : > { %4196 = vmatpush3.bf16.msra.mxu0 %v4711_v2 }
0x1a46   : > { %4197 = vmatprep.subr.bf16.mxu0 %v4712_v11 }
0x1a49   : > { %4198 = vmatpush3.bf16.msra.mxu0 %v4713_v58 }
0x1a4a   : > { %4199 = vmatprep.subr.bf16.mxu0 %v4714_v53 }
0x1a4d   : > { %4200 = vmatpush3.bf16.msra.mxu0 %v4715_v3 }
0x1a4e   : > { %4201 = vmatprep.subr.bf16.mxu0 %v4716_v26 }
0x1a51   : > { %4202 = vmatpush3.bf16.msra.mxu0 %v4717_v35 }
0x1a52   : > { %4203 = vmatprep.subr.bf16.mxu0 %v4718_v51 }
0x1b13   : > { %v4491_v0 = vpop.f32.mrb[76].mxu0 }
0x1b14   : > { %v3474_v50 = vpop.f32.mrb[77].mxu0  ;;  %v3483_v6 = vadd.f32 %v4491_v0, %v4044_v10 }
0x1b15   : > { %v3475_v21 = vadd.f32 %v4044_v10, %v3474_v50  ;;  %v4492_v19 = vpop.f32.mrb[78].mxu0 }
0x1b16   : > { %v3477_v52 = vpop.f32.mrb[79].mxu0  ;;  %v5881_v16 = vadd.f32 %v3483_v6, %v5485_v18  ;;  %v3486_v17 = vadd.f32 %v4492_v19, %v4044_v10 }
0x1b17   : > { %v5874_v12 = vadd.f32 %v3475_v21, %v5496_v30  ;;  %v3478_v49 = vadd.f32 %v4044_v10, %v3477_v52  ;;  %v4684_v30 = vld [vmem:[%s5098_s12 + $0x20] ss:$40 sps:$4 sm:$0xff]  }
0x1b18   : > { %v5886_v15 = vadd.f32 %v3486_v17, %v5490_v27  ;;  %3647 = vmatpush1.bf16.msra.mxu1 %v4684_v30  ;;  %v4890_v17 = vld [vmem:[%s5119_s25] sm:$0x7] }
0x1b19   : > { %v5877_v13 = vadd.f32 %v3478_v49, %v5510_v39  ;;  %3493 = vadd.xlane.f32.xlu0 %v5874_v12  ;;  %v4687_v39 = vld [vmem:[%s5098_s12 + $0x70] ss:$40 sps:$4 sm:$0xff]   ;;  %3648 = vmatprep.subr.bf16.mxu1 %v4689_v57  ;;  %v3540_v30 = vrot.slane %v4890_v17, %v5219_v25 }
0x1b1b   : > { %3495 = vadd.xlane.f32.xlu1 %v5877_v13 }
0x1b1c   : > { %3649 = vmatpush1.bf16.msra.mxu1 %v4687_v39 }
0x1b1d   : > { %3497 = vadd.xlane.f32.xlu0 %v5881_v16  ;;  %3650 = vmatprep.subr.bf16.mxu1 %v4692_v1 }
0x1b20   : > { %3651 = vmatpush1.bf16.msra.mxu1 %v4690_v60 }
0x1b21   : > { %3499 = vadd.xlane.f32.xlu0 %v5886_v15  ;;  %3652 = vmatprep.subr.bf16.mxu1 %v4695_v37  ;;  %v4719_v37 = vld [vmem:[%s5109_s16 + $0x28] sm:$0xff]  }
0x1b22   : > { %4204 = vmatpush3.bf16.msra.mxu0 %v4719_v37 }
0x1b24   : > { %3653 = vmatpush1.bf16.msra.mxu1 %v4693_v20  ;;  %v4720_v20 = vld [vmem:[%s5109_s16 + $0x70] sm:$0xff]  }
0x1b25   : > { %3654 = vmatprep.subr.bf16.mxu1 %v4698_v9  ;;  %4205 = vmatprep.subr.bf16.mxu0 %v4720_v20  ;;  %v4722_v9 = vld [vmem:[%s5109_s16 + $0x78] sm:$0xff]  }
0x1b28   : > { %3655 = vmatpush1.bf16.msra.mxu1 %v4696_v32  ;;  %v4723_v32 = vld [vmem:[%s5109_s16 + $0x38] sm:$0xff]  }
0x1b29   : > { %3656 = vmatprep.subr.bf16.mxu1 %v4701_v59 }
0x1b2c   : > { %3657 = vmatpush1.bf16.msra.mxu1 %v4699_v40 }
0x1b2d   : > { %3658 = vmatprep.subr.bf16.mxu1 %v4704_v54 }
0x1b30   : > { %3659 = vmatpush1.bf16.msra.mxu1 %v4702_v38 }
0x1b31   : > { %3660 = vmatprep.subr.bf16.mxu1 %v4707_v62 }
0x1b34   : > { %3661 = vmatpush1.bf16.msra.mxu1 %v4705_v55 }
0x1ba6   : > { %v3494_v18 = vpop.xlane.xlu0 %3493 }
0x1ba7   : > { %v3501_v29 = vmul.f32 0.0078125, %v3494_v18 }
0x1ba8   : > { %v3496_v33 = vpop.xlane.xlu1 %3495 }
0x1ba9   : > { %v5894_v34 = vsub.f32 %v5874_v12, %v3501_v29  ;;  %v3502_v42 = vmul.f32 0.0078125, %v3496_v33  ;;  %v4891_v33 = vld [vmem:[%s5119_s25 + $0x3] sm:$0x7] }
0x1baa   : > { %v3498_v27 = vpop.xlane.xlu0 %3497 }
0x1bab   : > { %v5897_v5 = vsub.f32 %v5877_v13, %v3502_v42  ;;  %v3503_v45 = vmul.f32 0.0078125, %v3498_v27  ;;  %v3509_v28 = vmul.f32 %v5894_v34, %v5894_v34  ;;  %v3548_v42 = vrot.slane %v4891_v33, %v5219_v25 }
0x1bad   : > { %v5902_v4 = vsub.f32 %v5881_v16, %v3503_v45  ;;  %3513 = vadd.xlane.f32.xlu0 %v3509_v28  ;;  %v3510_v22 = vmul.f32 %v5897_v5, %v5897_v5 }
0x1bae   : > { %v3500_v44 = vpop.xlane.xlu0 %3499 }
0x1baf   : > { %v3504_v7 = vmul.f32 0.0078125, %v3500_v44  ;;  %3515 = vadd.xlane.f32.xlu1 %v3510_v22  ;;  %v3511_v31 = vmul.f32 %v5902_v4, %v5902_v4 }
0x1bb1   : > { %v5909_v8 = vsub.f32 %v5886_v15, %v3504_v7  ;;  %3517 = vadd.xlane.f32.xlu0 %v3511_v31 }
0x1bb3   : > { %v3512_v46 = vmul.f32 %v5909_v8, %v5909_v8 }
0x1bb5   : > { %3519 = vadd.xlane.f32.xlu1 %v3512_v46 }
0x1c3a   : > { %v3514_v41 = vpop.xlane.xlu0 %3513 }
0x1c3b   : > { %v3521_v47 = vmul.f32 0.0078125, %v3514_v41 }
0x1c3c   : > { %v3516_v48 = vpop.xlane.xlu1 %3515 }
0x1c3d   : > { %v3525_v36 = vadd.f32 1e-05, %v3521_v47  ;;  %v3522_v10 = vmul.f32 0.0078125, %v3516_v48 }
0x1c3e   : > { %v3518_v0 = vpop.xlane.xlu0 %3517 }
0x1c3f   : > { %4876 = vrsqrt.f32 %v3525_v36  ;;  %v3526_v50 = vadd.f32 1e-05, %v3522_v10  ;;  %v3523_v21 = vmul.f32 0.0078125, %v3518_v0 }
0x1c41   : > { %4878 = vrsqrt.f32 %v3526_v50  ;;  %v3527_v19 = vadd.f32 1e-05, %v3523_v21 }
0x1c42   : > { %v3520_v52 = vpop.xlane.xlu1 %3519 }
0x1c43   : > { %4880 = vrsqrt.f32 %v3527_v19  ;;  %v3524_v6 = vmul.f32 0.0078125, %v3520_v52 }
0x1c45   : > { %v3528_v49 = vadd.f32 1e-05, %v3524_v6 }
0x1c47   : > { %4882 = vrsqrt.f32 %v3528_v49  ;;  %v4069_v49 = vld [vmem:[%s5114_s20 + $0xa] ss:$0 sm:$0xff] }
0x1c49   : > { %v4877_v14 = vpop.eup %4876 }
0x1c4a   : > { %v3533_v57 = vmul.f32 %v4877_v14, %v5894_v34 }
0x1c4b   : > { %v4879_v39 = vpop.eup %4878 }
0x1c4c   : > { %v3534_v18 = vmul.f32 %v4879_v39, %v5897_v5  ;;  %v3541_v29 = vmul.f32 %v3540_v30, %v3533_v57 }
0x1c4d   : > { %v4881_v27 = vpop.eup %4880 }
0x1c4e   : > { %v3542_v45 = vmul.f32 %v3540_v30, %v3534_v18  ;;  %v3549_v28 = vadd.f32 %v3548_v42, %v3541_v29  ;;  %v3535_v44 = vmul.f32 %v4881_v27, %v5902_v4  ;;  %v4721_v4 = vld [vmem:[%s5109_s16 + $0x30] sm:$0xff]  }
0x1c4f   : > { %4206 = vmatpush3.bf16.msra.mxu0 %v4721_v4 }
0x1c50   : > { %v3550_v22 = vadd.f32 %v3548_v42, %v3542_v45  ;;  %v3543_v5 = vmul.f32 %v3540_v30, %v3535_v44  ;;  %4207 = vmatprep.subr.bf16.mxu0 %v4722_v9 }
0x1c51   : > { %v4883_v7 = vpop.eup %4882 }
0x1c52   : > { %v3553_v31 = vpack.c.bf16 %v3550_v22, %v3549_v28  ;;  %v3536_v34 = vmul.f32 %v4883_v7, %v5909_v8  ;;  %v3551_v1 = vadd.f32 %v3548_v42, %v3543_v5  ;;  %v495_v8 = vld [vmem:[%s5114_s20 + $0x8] sm:$0x3] }
0x1c53   : > { %4208 = vmatpush3.bf16.msra.mxu0 %v4723_v32  ;;  %v3559_v59 = vrot.slane %v495_v8, %v5199_v63  ;;  %v3563_v40 = vrot.slane %v495_v8, %v5216_v23 }
0x1c54   : > { %3679 = vmatmul.mubr.bf16.vlgmr.msra.gmra.mrb[80].mxu1 %v3553_v31  ;;  %v3544_v46 = vmul.f32 %v3540_v30, %v3536_v34 }
0x1c55   : > { %3688 = vmatprep.mubr.bf16.mxu1 %v4961_v43 }
0x1c56   : > { %v3552_v25 = vadd.f32 %v3548_v42, %v3544_v46 }
0x1c58   : > { %v3554_v60 = vpack.c.bf16 %v3552_v25, %v3551_v1 }
0x1c5c   : > { %3689 = vmatmul.mubr.bf16.gmra.mrb[84].mxu1 %v3554_v60 }
0x1d27   : > { %v3680_v43 = vpop.f32.mrb[80].mxu1 }
0x1d28   : > { %v3681_v54 = vadd.f32 %v3680_v43, %v3559_v59  ;;  %v3682_v38 = vpop.f32.mrb[81].mxu1 }
0x1d29   : > { %v3683_v62 = vadd.f32 %v3682_v38, %v3563_v40  ;;  %v3684_v55 = vpop.f32.mrb[82].mxu1 }
0x1d2a   : > { %v3685_v56 = vadd.f32 %v3684_v55, %v3559_v59  ;;  %v3686_v61 = vpop.f32.mrb[83].mxu1  ;;  %v3699_v2 = vmax.f32 %v3681_v54, 0.0 }
0x1d2b   : > { %v3687_v24 = vadd.f32 %v3686_v61, %v3563_v40  ;;  %v3700_v58 = vmax.f32 %v3683_v62, 0.0 }
0x1d2c   : > { %v3701_v11 = vmax.f32 %v3685_v56, 0.0 }
0x1d2d   : > { %v3702_v53 = vmax.f32 %v3687_v24, 0.0 }
0x1d2e   : > { %v3707_v3 = vpack.c.bf16 %v3701_v11, %v3699_v2 }
0x1d2f   : > { %v3708_v26 = vpack.c.bf16 %v3702_v53, %v3700_v58  ;;  %v3690_v35 = vpop.f32.mrb[84].mxu1 }
0x1d30   : > { %v3691_v51 = vadd.f32 %v3690_v35, %v3559_v59  ;;  %v3692_v41 = vpop.f32.mrb[85].mxu1 }
0x1d31   : > { %v3693_v63 = vadd.f32 %v3692_v41, %v3563_v40  ;;  %v3694_v23 = vpop.f32.mrb[86].mxu1  ;;  %3845 = vmatprep.mubr.bf16.mxu0 %v3708_v26 }
0x1d32   : > { %v3695_v47 = vadd.f32 %v3694_v23, %v3559_v59  ;;  %v3696_v48 = vpop.f32.mrb[87].mxu1  ;;  %3846 = vmatmul.mubr.bf16.vlgmr.msra.gmra.mrb[80].mxu0 %v3707_v3  ;;  %v3703_v10 = vmax.f32 %v3691_v51, 0.0 }
0x1d33   : > { %v3697_v36 = vadd.f32 %v3696_v48, %v3563_v40  ;;  %v3704_v50 = vmax.f32 %v3693_v63, 0.0 }
0x1d34   : > { %v3705_v0 = vmax.f32 %v3695_v47, 0.0 }
0x1d35   : > { %v3706_v21 = vmax.f32 %v3697_v36, 0.0 }
0x1d36   : > { %v3709_v19 = vpack.c.bf16 %v3705_v0, %v3703_v10 }
0x1d37   : > { %v3710_v52 = vpack.c.bf16 %v3706_v21, %v3704_v50 }
0x1d39   : > { %3853 = vmatprep.mubr.bf16.mxu0 %v3710_v52 }
0x1d3a   : > { %3854 = vmatmul.mubr.bf16.gmra.mrb[84].mxu0 %v3709_v19 }
0x1e05   : > { %v4209_v6 = vpop.f32.mrb[80].mxu0 }
0x1e06   : > { %v4210_v17 = vpop.f32.mrb[81].mxu0 }
0x1e07   : > { %v4211_v30 = vadd.f32 %v4210_v17, %v4209_v6  ;;  %v4212_v14 = vpop.f32.mrb[82].mxu0 }
0x1e08   : > { %v4213_v57 = vpop.f32.mrb[83].mxu0 }
0x1e09   : > { %v3848_v39 = vadd.f32 %v4211_v30, %v4069_v49  ;;  %v4214_v18 = vadd.f32 %v4213_v57, %v4212_v14 }
0x1e0b   : > { %v3862_v29 = vadd.f32 %v3848_v39, %v5874_v12  ;;  %v3851_v33 = vadd.f32 %v4214_v18, %v4069_v49 }
0x1e0d   : > { %3866 = vst [vmem:[%s5991_s8] sm:$0xff] %v3862_v29  ;;  %v3863_v42 = vadd.f32 %v3851_v33, %v5877_v13  ;;  %v4215_v27 = vpop.f32.mrb[84].mxu0 }
0x1e0e   : > { %v4216_v45 = vpop.f32.mrb[85].mxu0 }
0x1e0f   : > { %3867 = vst [vmem:[%s5991_s8 + $0x8] sm:$0xff] %v3863_v42  ;;  %v4217_v28 = vadd.f32 %v4216_v45, %v4215_v27  ;;  %v4218_v22 = vpop.f32.mrb[86].mxu0 }
0x1e10   : > { %v4219_v44 = vpop.f32.mrb[87].mxu0 }
0x1e11   : > { %v3856_v7 = vadd.f32 %v4217_v28, %v4069_v49  ;;  %v4220_v31 = vadd.f32 %v4219_v44, %v4218_v22 }
0x1e13   : > { %v3864_v12 = vadd.f32 %v3856_v7, %v5881_v16  ;;  %v3859_v34 = vadd.f32 %v4220_v31, %v4069_v49 }
0x1e15   : > { %3868 = vst [vmem:[%s5991_s8 + $0x10] sm:$0xff] %v3864_v12  ;;  %v3865_v13 = vadd.f32 %v3859_v34, %v5886_v15 }
0x1e17   : > { %3869 = vst [vmem:[%s5991_s8 + $0x18] sm:$0xff] %v3865_v13 }
0x1e18 PF: > { %p18_p8 = scmp.ge.s32.totalorder %s5034_s10, 4   ;;  %s5995_s27 = smov %s4948_s28 }
0x1e19   : > { %s5996_s28 = smov %s4952_s29  ;;  %s5997_s29 = smov %s5044_s13 }
0x1e1a   : > { %s5998_s30 = smov %s5034_s10  ;;  %20 = sbr.rel (!%p18_p8) target bundleno = 3 (0x3), region = 101 }
0x1e21   :  { %3881 = vsyncpa [#allocation3], 1 }
0x1e22   :  { %3883 = vsyncpa [#allocation3 + $0x1], 1 }

</bundles_post_ra>
